<compile_context>
chip_gen: v7x
topology: tpu7x:2x2x1
jax: 0.10.0
libtpu: 0.0.40
codegen_flags: <defaults>
</compile_context>

<pallas_src>
import functools

import jax
import jax.numpy as jnp
from jax import lax
from jax.experimental import pallas as pl
from jax.experimental.pallas import tpu as pltpu


def _round_up(x, m):
    return (x + m - 1) // m * m


# --------------------------------------------------------------------------- #
# Pass 1: 3x3 conv (im2col matmul) + per-channel sum / sum-of-squares
# --------------------------------------------------------------------------- #
def conv_stats_kernel(patch_ref, w1_ref, y_ref, sum_ref, sq_ref):
    # patch_ref : (tile_m, 9*Cpad) bf16   im2col slab for this M-tile
    # w1_ref    : (9*Cpad, Ppad)   bf16   3x3 conv weight, tap-major
    # y_ref     : (tile_m, Ppad)   f32    conv output tile (stored for pass 2)
    # sum_ref   : (1, Ppad)        f32    resident accumulator (same block every step)
    # sq_ref    : (1, Ppad)        f32    resident accumulator
    @pl.when(pl.program_id(0) == 0)
    def _init():
        sum_ref[...] = jnp.zeros_like(sum_ref)
        sq_ref[...] = jnp.zeros_like(sq_ref)

    y = jnp.dot(patch_ref[...], w1_ref[...], preferred_element_type=jnp.float32)
    y_ref[...] = y
    sum_ref[...] += jnp.sum(y, axis=0, keepdims=True)
    sq_ref[...] += jnp.sum(y * y, axis=0, keepdims=True)


# --------------------------------------------------------------------------- #
# Pass 2: BN normalize -> pwconv1 -> GELU -> pwconv2 -> layer scale -> residual
# --------------------------------------------------------------------------- #
def bn_mlp_kernel(y_ref, sum_ref, sq_ref, bnw_ref, bnb_ref, w2_ref, w3_ref,
                  gamma_ref, xres_ref, out_ref, *, inv_m):
    # Per-channel BN affine from the pass-1 sums (biased batch variance).
    mean = sum_ref[...] * inv_m
    var = jnp.maximum(sq_ref[...] * inv_m - mean * mean, 0.0)
    scale = bnw_ref[...] * lax.rsqrt(var + 1e-5)
    shift = bnb_ref[...] - mean * scale

    xn = y_ref[...] * scale + shift                              # (tile_m, Ppad) f32

    h = jnp.dot(xn.astype(jnp.bfloat16), w2_ref[...],
                preferred_element_type=jnp.float32)              # (tile_m, Hpad)
    inv_sqrt2 = jnp.float32(0.7071067811865476)
    h = 0.5 * h * (1.0 + lax.erf(h * inv_sqrt2))                 # exact GELU

    z = jnp.dot(h.astype(jnp.bfloat16), w3_ref[...],
                preferred_element_type=jnp.float32)              # (tile_m, Ppad)

    out_ref[...] = xres_ref[...] + z * gamma_ref[...]


# --------------------------------------------------------------------------- #
# Wrapper (NCHW in / NCHW out to match the PyTorch module)
# --------------------------------------------------------------------------- #
def bottleneck_forward(x_nchw, params, *, tile_m=256):
    """x_nchw: (N, C, H, W) float32, with inplanes == planes (downsample=None)."""
    w1p, bn_w_p, bn_b_p, w2p, w3p, gamma_p = params
    N, C, H, W = x_nchw.shape
    P = C                           # residual add requires planes == inplanes
    Cpad = w1p.shape[0] // 9
    Ppad = w1p.shape[1]
    Hpad = w2p.shape[1]
    M = N * H * W
    Mpad = _round_up(M, tile_m)
    num_tiles = Mpad // tile_m
    k1 = 9 * Cpad

    # TODO(synk): keep model activations NHWC end-to-end and build the im2col slab
    # per-tile inside the kernel (halo DMA) to remove the transpose/pad/9x-read
    # wrapper plumbing from the HBM path at large H*W.
    x_nhwc = jnp.transpose(x_nchw, (0, 2, 3, 1)).astype(jnp.float32)

    # Residual path: channel-padded to lane-dense Ppad, flattened over M.
    x_res = jnp.pad(x_nhwc, ((0, 0), (0, 0), (0, 0), (0, Ppad - C)))
    x_res = jnp.pad(x_res.reshape(M, Ppad), ((0, Mpad - M), (0, 0)))

    # im2col slab for the 3x3 / pad-1 conv: (Mpad, 9*Cpad), tap-major, bf16.
    x_c = jnp.pad(x_nhwc, ((0, 0), (1, 1), (1, 1), (0, Cpad - C)))
    taps = [x_c[:, dy:dy + H, dx:dx + W, :] for dy in range(3) for dx in range(3)]
    patches = jnp.concatenate(taps, axis=-1).reshape(M, k1)
    patches = jnp.pad(patches, ((0, Mpad - M), (0, 0))).astype(jnp.bfloat16)

    # ----- pass 1: conv + BN statistics -----
    flops1 = 2 * Mpad * k1 * Ppad
    bytes1 = Mpad * k1 * 2 + k1 * Ppad * 2 + Mpad * Ppad * 4 + 2 * Ppad * 4
    y1, s_sum, s_sq = pl.pallas_call(
        conv_stats_kernel,
        grid_spec=pltpu.PrefetchScalarGridSpec(
            num_scalar_prefetch=0,
            grid=(num_tiles,),
            in_specs=[
                pl.BlockSpec((tile_m, k1), lambda i: (i, 0)),
                pl.BlockSpec((k1, Ppad), lambda i: (0, 0)),
            ],
            out_specs=[
                pl.BlockSpec((tile_m, Ppad), lambda i: (i, 0)),
                pl.BlockSpec((1, Ppad), lambda i: (0, 0)),
                pl.BlockSpec((1, Ppad), lambda i: (0, 0)),
            ],
        ),
        out_shape=[
            jax.ShapeDtypeStruct((Mpad, Ppad), jnp.float32),
            jax.ShapeDtypeStruct((1, Ppad), jnp.float32),
            jax.ShapeDtypeStruct((1, Ppad), jnp.float32),
        ],
        compiler_params=pltpu.CompilerParams(
            dimension_semantics=("arbitrary",),      # stat accumulators are resident
            vmem_limit_bytes=32 * 1024 * 1024,
        ),
        cost_estimate=pl.CostEstimate(
            flops=flops1, transcendentals=0, bytes_accessed=bytes1),
    )(patches, w1p)

    # ----- pass 2: normalize + MLP + layer scale + residual -----
    flops2 = 4 * Mpad * Ppad * Hpad + 10 * Mpad * Ppad
    bytes2 = 3 * Mpad * Ppad * 4 + 2 * Ppad * Hpad * 2 + 5 * Ppad * 4
    kernel2 = functools.partial(bn_mlp_kernel, inv_m=float(1.0 / M))
    out = pl.pallas_call(
        kernel2,
        grid_spec=pltpu.PrefetchScalarGridSpec(
            num_scalar_prefetch=0,
            grid=(num_tiles,),
            in_specs=[
                pl.BlockSpec((tile_m, Ppad), lambda i: (i, 0)),   # conv output y1
                pl.BlockSpec((1, Ppad), lambda i: (0, 0)),        # sum
                pl.BlockSpec((1, Ppad), lambda i: (0, 0)),        # sum of squares
                pl.BlockSpec((1, Ppad), lambda i: (0, 0)),        # bn weight
                pl.BlockSpec((1, Ppad), lambda i: (0, 0)),        # bn bias
                pl.BlockSpec((Ppad, Hpad), lambda i: (0, 0)),     # pwconv1 weight
                pl.BlockSpec((Hpad, Ppad), lambda i: (0, 0)),     # pwconv2 weight
                pl.BlockSpec((1, Ppad), lambda i: (0, 0)),        # gamma (layer scale)
                pl.BlockSpec((tile_m, Ppad), lambda i: (i, 0)),   # residual x
            ],
            out_specs=pl.BlockSpec((tile_m, Ppad), lambda i: (i, 0)),
        ),
        out_shape=jax.ShapeDtypeStruct((Mpad, Ppad), jnp.float32),
        compiler_params=pltpu.CompilerParams(
            dimension_semantics=("parallel",),       # independent M-tiles (megacore)
            vmem_limit_bytes=32 * 1024 * 1024,
        ),
        cost_estimate=pl.CostEstimate(
            flops=flops2, transcendentals=Mpad * Hpad, bytes_accessed=bytes2),
        input_output_aliases={8: 0},                 # reuse x_res HBM buffer for out
    )(y1, s_sum, s_sq, bn_w_p, bn_b_p, w2p, w3p, gamma_p, x_res)

    out = out[:M, :P].reshape(N, H, W, P)
    return jnp.transpose(out, (0, 3, 1, 2))


# --------------------------------------------------------------------------- #
# Parameter construction (kernel layout + PyTorch layout for the reference)
# --------------------------------------------------------------------------- #
def make_params(key, inplanes, planes, layer_scale_init_value=1e-6):
    Cpad = _round_up(inplanes, 128)
    Ppad = _round_up(planes, 128)
    Hpad = _round_up(4 * planes, 128)

    k1, k2, k3 = jax.random.split(key, 3)
    # PyTorch-layout weights (f32) kept for the pure-JAX reference.
    w1_t = 0.1 * jax.random.normal(k1, (planes, inplanes, 3, 3), jnp.float32)
    w2_t = 0.1 * jax.random.normal(k2, (4 * planes, planes), jnp.float32)
    w3_t = 0.1 * jax.random.normal(k3, (planes, 4 * planes), jnp.float32)

    # dwconv (P,Cin,3,3) -> (ky,kx,Cin,P), zero-padded to lane-dense dims,
    # flattened to one (9*Cpad, Ppad) im2col weight in bf16.
    w1 = jnp.transpose(w1_t, (2, 3, 1, 0))
    w1 = jnp.pad(w1, ((0, 0), (0, 0), (0, Cpad - inplanes), (0, Ppad - planes)))
    w1p = w1.reshape(9 * Cpad, Ppad).astype(jnp.bfloat16)

    # BatchNorm2d default init: weight=1, bias=0 (padding values are inert).
    bn_w_p = jnp.pad(jnp.ones((1, planes), jnp.float32),
                     ((0, 0), (0, Ppad - planes)), constant_values=1.0)
    bn_b_p = jnp.zeros((1, Ppad), jnp.float32)

    # pwconv1 (4P,P) -> (Ppad, Hpad), pwconv2 (P,4P) -> (Hpad, Ppad), bf16.
    w2p = jnp.pad(jnp.transpose(w2_t, (1, 0)),
                  ((0, Ppad - planes), (0, Hpad - 4 * planes))).astype(jnp.bfloat16)
    w3p = jnp.pad(jnp.transpose(w3_t, (1, 0)),
                  ((0, Hpad - 4 * planes), (0, Ppad - planes))).astype(jnp.bfloat16)

    gamma_p = jnp.pad(jnp.full((1, planes), layer_scale_init_value, jnp.float32),
                      ((0, 0), (0, Ppad - planes)))

    return (w1p, bn_w_p, bn_b_p, w2p, w3p, gamma_p), (w1_t, w2_t, w3_t)


def bottleneck_reference(x_nchw, torch_weights, gamma_val=1e-6):
    """Pure-JAX f32 reference mirroring the PyTorch module (for validation)."""
    w1_t, w2_t, w3_t = torch_weights
    y = lax.conv_general_dilated(
        x_nchw, w1_t, window_strides=(1, 1), padding=((1, 1), (1, 1)),
        dimension_numbers=("NCHW", "OIHW", "NCHW"))
    mean = jnp.mean(y, axis=(0, 2, 3), keepdims=True)
    var = jnp.mean((y - mean) ** 2, axis=(0, 2, 3), keepdims=True)
    y = (y - mean) * lax.rsqrt(var + 1e-5)
    y = lax.conv_general_dilated(
        y, w2_t[:, :, None, None], (1, 1), "VALID",
        dimension_numbers=("NCHW", "OIHW", "NCHW"))
    y = 0.5 * y * (1.0 + lax.erf(y * jnp.float32(0.7071067811865476)))
    y = lax.conv_general_dilated(
        y, w3_t[:, :, None, None], (1, 1), "VALID",
        dimension_numbers=("NCHW", "OIHW", "NCHW"))
    y = y * jnp.float32(gamma_val)
    return x_nchw + y


if __name__ == "__main__":
    N, inplanes, H, W = 2, 4, 16, 16
    planes = inplanes  # residual add requires matching channels (downsample=None)

    key = jax.random.PRNGKey(0)
    kx, kp = jax.random.split(key)
    x = jax.random.normal(kx, (N, inplanes, H, W), jnp.float32)

    params, torch_weights = make_params(kp, inplanes, planes)

    fwd = jax.jit(functools.partial(bottleneck_forward, tile_m=256))
    out = jax.block_until_ready(fwd(x, params))

    ref = jax.block_until_ready(bottleneck_reference(x, torch_weights))
    assert out.shape == (N, planes, H, W)
    assert jnp.allclose(out, ref, rtol=1e-3, atol=1e-3), (
        float(jnp.max(jnp.abs(out - ref))))

    print("KERNEL_OK")
</pallas_src>

<mosaic_0001>
module attributes {stable_mosaic.version = 11 : i64} {
  func.func @conv_stats_kernel(%arg0: i32, %arg1: memref<256x1152xbf16, #tpu.memory_space<vmem>>, %arg2: memref<1152x128xbf16, #tpu.memory_space<vmem>>, %arg3: memref<256x128xf32, #tpu.memory_space<vmem>>, %arg4: memref<1x128xf32, #tpu.memory_space<vmem>>, %arg5: memref<1x128xf32, #tpu.memory_space<vmem>>) attributes {dimension_semantics = [#tpu.dimension_semantics<arbitrary>], iteration_bounds = array<i64: 2>, scalar_prefetch = 0 : i64, scratch_operands = 0 : i64, tpu.core_type = #tpu.core_type<tc>, window_params = [{transform_indices = @transform_0, window_bounds = array<i64: 256, 1152>}, {pipeline_mode = #tpu.pipeline_mode<synchronous>, transform_indices = @transform_1, window_bounds = array<i64: 1152, 128>}, {transform_indices = @transform_2, window_bounds = array<i64: 256, 128>}, {pipeline_mode = #tpu.pipeline_mode<synchronous>, transform_indices = @transform_3, window_bounds = array<i64: 1, 128>}, {pipeline_mode = #tpu.pipeline_mode<synchronous>, transform_indices = @transform_4, window_bounds = array<i64: 1, 128>}]} {
    %c0_i32 = arith.constant 0 : i32
    %0 = arith.cmpi eq, %arg0, %c0_i32 : i32
    %1 = arith.extui %0 : i1 to i32
    %c0_i32_0 = arith.constant 0 : i32
    %2 = arith.cmpi ne, %1, %c0_i32_0 : i32
    scf.if %2 {
      %cst_16 = arith.constant 0.000000e+00 : f32
      %18 = vector.broadcast %cst_16 : f32 to vector<1x128xf32>
      %c0_17 = arith.constant 0 : index
      %c0_18 = arith.constant 0 : index
      %19 = vector.load %arg4[%c0_17, %c0_18] : memref<1x128xf32, #tpu.memory_space<vmem>>, vector<1x128xf32>
      tpu.vector_store %arg4[%c0_17, %c0_18], %18 {strides = array<i32>} : memref<1x128xf32, #tpu.memory_space<vmem>>, vector<1x128xf32>,
      %cst_19 = arith.constant 0.000000e+00 : f32
      %20 = vector.broadcast %cst_19 : f32 to vector<1x128xf32>
      %c0_20 = arith.constant 0 : index
      %c0_21 = arith.constant 0 : index
      %21 = vector.load %arg5[%c0_20, %c0_21] : memref<1x128xf32, #tpu.memory_space<vmem>>, vector<1x128xf32>
      tpu.vector_store %arg5[%c0_20, %c0_21], %20 {strides = array<i32>} : memref<1x128xf32, #tpu.memory_space<vmem>>, vector<1x128xf32>,
    } else {
    }
    %c0 = arith.constant 0 : index
    %c0_1 = arith.constant 0 : index
    %3 = vector.load %arg1[%c0, %c0_1] : memref<256x1152xbf16, #tpu.memory_space<vmem>>, vector<256x1152xbf16>
    %c0_2 = arith.constant 0 : index
    %c0_3 = arith.constant 0 : index
    %4 = vector.load %arg2[%c0_2, %c0_3] : memref<1152x128xbf16, #tpu.memory_space<vmem>>, vector<1152x128xbf16>
    %cst = arith.constant dense<0.000000e+00> : vector<256x128xf32>
    %5 = tpu.matmul %3, %4, %cst {dimension_numbers = #tpu.dot_dimension_numbers<[1], [0], [0], [1], [0, 0, 1, 1], [], []>} : vector<256x1152xbf16>, vector<1152x128xbf16>, vector<256x128xf32> -> vector<256x128xf32>
    %c0_4 = arith.constant 0 : index
    %c0_5 = arith.constant 0 : index
    %6 = vector.load %arg3[%c0_4, %c0_5] : memref<256x128xf32, #tpu.memory_space<vmem>>, vector<256x128xf32>
    tpu.vector_store %arg3[%c0_4, %c0_5], %5 {strides = array<i32>} : memref<256x128xf32, #tpu.memory_space<vmem>>, vector<256x128xf32>,
    %c0_6 = arith.constant 0 : index
    %c0_7 = arith.constant 0 : index
    %7 = vector.load %arg4[%c0_6, %c0_7] : memref<1x128xf32, #tpu.memory_space<vmem>>, vector<1x128xf32>
    %cst_8 = arith.constant dense<0.000000e+00> : vector<128xf32>
    %8 = vector.multi_reduction <add>, %5, %cst_8 [0] : vector<256x128xf32> to vector<128xf32>
    %9 = vector.shape_cast %8 : vector<128xf32> to vector<1x128xf32>
    %10 = arith.addf %7, %9 : vector<1x128xf32>
    %c0_9 = arith.constant 0 : index
    %c0_10 = arith.constant 0 : index
    %11 = vector.load %arg4[%c0_9, %c0_10] : memref<1x128xf32, #tpu.memory_space<vmem>>, vector<1x128xf32>
    tpu.vector_store %arg4[%c0_9, %c0_10], %10 {strides = array<i32>} : memref<1x128xf32, #tpu.memory_space<vmem>>, vector<1x128xf32>,
    %c0_11 = arith.constant 0 : index
    %c0_12 = arith.constant 0 : index
    %12 = vector.load %arg5[%c0_11, %c0_12] : memref<1x128xf32, #tpu.memory_space<vmem>>, vector<1x128xf32>
    %13 = arith.mulf %5, %5 : vector<256x128xf32>
    %cst_13 = arith.constant dense<0.000000e+00> : vector<128xf32>
    %14 = vector.multi_reduction <add>, %13, %cst_13 [0] : vector<256x128xf32> to vector<128xf32>
    %15 = vector.shape_cast %14 : vector<128xf32> to vector<1x128xf32>
    %16 = arith.addf %12, %15 : vector<1x128xf32>
    %c0_14 = arith.constant 0 : index
    %c0_15 = arith.constant 0 : index
    %17 = vector.load %arg5[%c0_14, %c0_15] : memref<1x128xf32, #tpu.memory_space<vmem>>, vector<1x128xf32>
    tpu.vector_store %arg5[%c0_14, %c0_15], %16 {strides = array<i32>} : memref<1x128xf32, #tpu.memory_space<vmem>>, vector<1x128xf32>,
    return
  }
  func.func @transform_0(%arg0: i32) -> (i32, i32) {
    %c0_i32 = arith.constant 0 : i32
    %c0_i32_0 = arith.constant 0 : i32
    return %arg0, %c0_i32 : i32, i32
  }
  func.func @transform_1(%arg0: i32) -> (i32, i32) {
    %c0_i32 = arith.constant 0 : i32
    %c0_i32_0 = arith.constant 0 : i32
    %c0_i32_1 = arith.constant 0 : i32
    return %c0_i32, %c0_i32_0 : i32, i32
  }
  func.func @transform_2(%arg0: i32) -> (i32, i32) {
    %c0_i32 = arith.constant 0 : i32
    %c0_i32_0 = arith.constant 0 : i32
    return %arg0, %c0_i32 : i32, i32
  }
  func.func @transform_3(%arg0: i32) -> (i32, i32) {
    %c0_i32 = arith.constant 0 : i32
    %c0_i32_0 = arith.constant 0 : i32
    %c0_i32_1 = arith.constant 0 : i32
    return %c0_i32, %c0_i32_0 : i32, i32
  }
  func.func @transform_4(%arg0: i32) -> (i32, i32) {
    %c0_i32 = arith.constant 0 : i32
    %c0_i32_0 = arith.constant 0 : i32
    %c0_i32_1 = arith.constant 0 : i32
    return %c0_i32, %c0_i32_0 : i32, i32
  }
}

module attributes {stable_mosaic.version = 11 : i64} {
  func.func @bn_mlp_kernel(%arg0: i32, %arg1: memref<256x128xf32, #tpu.memory_space<vmem>>, %arg2: memref<1x128xf32, #tpu.memory_space<vmem>>, %arg3: memref<1x128xf32, #tpu.memory_space<vmem>>, %arg4: memref<1x128xf32, #tpu.memory_space<vmem>>, %arg5: memref<1x128xf32, #tpu.memory_space<vmem>>, %arg6: memref<128x128xbf16, #tpu.memory_space<vmem>>, %arg7: memref<128x128xbf16, #tpu.memory_space<vmem>>, %arg8: memref<1x128xf32, #tpu.memory_space<vmem>>, %arg9: memref<256x128xf32, #tpu.memory_space<vmem>>, %arg10: memref<256x128xf32, #tpu.memory_space<vmem>>) attributes {dimension_semantics = [#tpu.dimension_semantics<parallel>], iteration_bounds = array<i64: 2>, scalar_prefetch = 0 : i64, scratch_operands = 0 : i64, tpu.core_type = #tpu.core_type<tc>, window_params = [{transform_indices = @transform_0, window_bounds = array<i64: 256, 128>}, {pipeline_mode = #tpu.pipeline_mode<synchronous>, transform_indices = @transform_1, window_bounds = array<i64: 1, 128>}, {pipeline_mode = #tpu.pipeline_mode<synchronous>, transform_indices = @transform_2, window_bounds = array<i64: 1, 128>}, {pipeline_mode = #tpu.pipeline_mode<synchronous>, transform_indices = @transform_3, window_bounds = array<i64: 1, 128>}, {pipeline_mode = #tpu.pipeline_mode<synchronous>, transform_indices = @transform_4, window_bounds = array<i64: 1, 128>}, {pipeline_mode = #tpu.pipeline_mode<synchronous>, transform_indices = @transform_5, window_bounds = array<i64: 128, 128>}, {pipeline_mode = #tpu.pipeline_mode<synchronous>, transform_indices = @transform_6, window_bounds = array<i64: 128, 128>}, {pipeline_mode = #tpu.pipeline_mode<synchronous>, transform_indices = @transform_7, window_bounds = array<i64: 1, 128>}, {transform_indices = @transform_8, window_bounds = array<i64: 256, 128>}, {transform_indices = @transform_9, window_bounds = array<i64: 256, 128>}]} {
    %c0 = arith.constant 0 : index
    %c0_0 = arith.constant 0 : index
    %0 = vector.load %arg2[%c0, %c0_0] : memref<1x128xf32, #tpu.memory_space<vmem>>, vector<1x128xf32>
    %cst = arith.constant 0.001953125 : f32
    %1 = vector.broadcast %cst : f32 to vector<1x128xf32>
    %2 = arith.mulf %0, %1 : vector<1x128xf32>
    %c0_1 = arith.constant 0 : index
    %c0_2 = arith.constant 0 : index
    %3 = vector.load %arg3[%c0_1, %c0_2] : memref<1x128xf32, #tpu.memory_space<vmem>>, vector<1x128xf32>
    %cst_3 = arith.constant 0.001953125 : f32
    %4 = vector.broadcast %cst_3 : f32 to vector<1x128xf32>
    %5 = arith.mulf %3, %4 : vector<1x128xf32>
    %6 = arith.mulf %2, %2 : vector<1x128xf32>
    %7 = arith.subf %5, %6 : vector<1x128xf32>
    %cst_4 = arith.constant 0.000000e+00 : f32
    %8 = vector.broadcast %cst_4 : f32 to vector<1x128xf32>
    %9 = arith.maximumf %7, %8 : vector<1x128xf32>
    %c0_5 = arith.constant 0 : index
    %c0_6 = arith.constant 0 : index
    %10 = vector.load %arg4[%c0_5, %c0_6] : memref<1x128xf32, #tpu.memory_space<vmem>>, vector<1x128xf32>
    %cst_7 = arith.constant 9.99999974E-6 : f32
    %11 = vector.broadcast %cst_7 : f32 to vector<1x128xf32>
    %12 = arith.addf %9, %11 : vector<1x128xf32>
    %13 = math.rsqrt %12 : vector<1x128xf32>
    %14 = arith.mulf %10, %13 : vector<1x128xf32>
    %c0_8 = arith.constant 0 : index
    %c0_9 = arith.constant 0 : index
    %15 = vector.load %arg5[%c0_8, %c0_9] : memref<1x128xf32, #tpu.memory_space<vmem>>, vector<1x128xf32>
    %16 = arith.mulf %2, %14 : vector<1x128xf32>
    %17 = arith.subf %15, %16 : vector<1x128xf32>
    %c0_10 = arith.constant 0 : index
    %c0_11 = arith.constant 0 : index
    %18 = vector.load %arg1[%c0_10, %c0_11] : memref<256x128xf32, #tpu.memory_space<vmem>>, vector<256x128xf32>
    %19 = vector.broadcast %14 : vector<1x128xf32> to vector<256x128xf32>
    %20 = arith.mulf %18, %19 : vector<256x128xf32>
    %21 = vector.broadcast %17 : vector<1x128xf32> to vector<256x128xf32>
    %22 = arith.addf %20, %21 : vector<256x128xf32>
    %23 = arith.truncf %22 : vector<256x128xf32> to vector<256x128xbf16>
    %c0_12 = arith.constant 0 : index
    %c0_13 = arith.constant 0 : index
    %24 = vector.load %arg6[%c0_12, %c0_13] : memref<128x128xbf16, #tpu.memory_space<vmem>>, vector<128x128xbf16>
    %cst_14 = arith.constant dense<0.000000e+00> : vector<256x128xf32>
    %25 = tpu.matmul %23, %24, %cst_14 {dimension_numbers = #tpu.dot_dimension_numbers<[1], [0], [0], [1], [0, 0, 1, 1], [], []>} : vector<256x128xbf16>, vector<128x128xbf16>, vector<256x128xf32> -> vector<256x128xf32>
    %cst_15 = arith.constant 5.000000e-01 : f32
    %26 = vector.broadcast %cst_15 : f32 to vector<256x128xf32>
    %27 = arith.mulf %26, %25 : vector<256x128xf32>
    %cst_16 = arith.constant 0.707106769 : f32
    %28 = vector.broadcast %cst_16 : f32 to vector<256x128xf32>
    %29 = arith.mulf %25, %28 : vector<256x128xf32>
    %30 = math.erf %29 : vector<256x128xf32>
    %cst_17 = arith.constant 1.000000e+00 : f32
    %31 = vector.broadcast %cst_17 : f32 to vector<256x128xf32>
    %32 = arith.addf %31, %30 : vector<256x128xf32>
    %33 = arith.mulf %27, %32 : vector<256x128xf32>
    %34 = arith.truncf %33 : vector<256x128xf32> to vector<256x128xbf16>
    %c0_18 = arith.constant 0 : index
    %c0_19 = arith.constant 0 : index
    %35 = vector.load %arg7[%c0_18, %c0_19] : memref<128x128xbf16, #tpu.memory_space<vmem>>, vector<128x128xbf16>
    %cst_20 = arith.constant dense<0.000000e+00> : vector<256x128xf32>
    %36 = tpu.matmul %34, %35, %cst_20 {dimension_numbers = #tpu.dot_dimension_numbers<[1], [0], [0], [1], [0, 0, 1, 1], [], []>} : vector<256x128xbf16>, vector<128x128xbf16>, vector<256x128xf32> -> vector<256x128xf32>
    %c0_21 = arith.constant 0 : index
    %c0_22 = arith.constant 0 : index
    %37 = vector.load %arg9[%c0_21, %c0_22] : memref<256x128xf32, #tpu.memory_space<vmem>>, vector<256x128xf32>
    %c0_23 = arith.constant 0 : index
    %c0_24 = arith.constant 0 : index
    %38 = vector.load %arg8[%c0_23, %c0_24] : memref<1x128xf32, #tpu.memory_space<vmem>>, vector<1x128xf32>
    %39 = vector.broadcast %38 : vector<1x128xf32> to vector<256x128xf32>
    %40 = arith.mulf %36, %39 : vector<256x128xf32>
    %41 = arith.addf %37, %40 : vector<256x128xf32>
    %c0_25 = arith.constant 0 : index
    %c0_26 = arith.constant 0 : index
    %42 = vector.load %arg10[%c0_25, %c0_26] : memref<256x128xf32, #tpu.memory_space<vmem>>, vector<256x128xf32>
    tpu.vector_store %arg10[%c0_25, %c0_26], %41 {strides = array<i32>} : memref<256x128xf32, #tpu.memory_space<vmem>>, vector<256x128xf32>,
    return
  }
  func.func @transform_0(%arg0: i32) -> (i32, i32) {
    %c0_i32 = arith.constant 0 : i32
    %c0_i32_0 = arith.constant 0 : i32
    return %arg0, %c0_i32 : i32, i32
  }
  func.func @transform_1(%arg0: i32) -> (i32, i32) {
    %c0_i32 = arith.constant 0 : i32
    %c0_i32_0 = arith.constant 0 : i32
    %c0_i32_1 = arith.constant 0 : i32
    return %c0_i32, %c0_i32_0 : i32, i32
  }
  func.func @transform_2(%arg0: i32) -> (i32, i32) {
    %c0_i32 = arith.constant 0 : i32
    %c0_i32_0 = arith.constant 0 : i32
    %c0_i32_1 = arith.constant 0 : i32
    return %c0_i32, %c0_i32_0 : i32, i32
  }
  func.func @transform_3(%arg0: i32) -> (i32, i32) {
    %c0_i32 = arith.constant 0 : i32
    %c0_i32_0 = arith.constant 0 : i32
    %c0_i32_1 = arith.constant 0 : i32
    return %c0_i32, %c0_i32_0 : i32, i32
  }
  func.func @transform_4(%arg0: i32) -> (i32, i32) {
    %c0_i32 = arith.constant 0 : i32
    %c0_i32_0 = arith.constant 0 : i32
    %c0_i32_1 = arith.constant 0 : i32
    return %c0_i32, %c0_i32_0 : i32, i32
  }
  func.func @transform_5(%arg0: i32) -> (i32, i32) {
    %c0_i32 = arith.constant 0 : i32
    %c0_i32_0 = arith.constant 0 : i32
    %c0_i32_1 = arith.constant 0 : i32
    return %c0_i32, %c0_i32_0 : i32, i32
  }
  func.func @transform_6(%arg0: i32) -> (i32, i32) {
    %c0_i32 = arith.constant 0 : i32
    %c0_i32_0 = arith.constant 0 : i32
    %c0_i32_1 = arith.constant 0 : i32
    return %c0_i32, %c0_i32_0 : i32, i32
  }
  func.func @transform_7(%arg0: i32) -> (i32, i32) {
    %c0_i32 = arith.constant 0 : i32
    %c0_i32_0 = arith.constant 0 : i32
    %c0_i32_1 = arith.constant 0 : i32
    return %c0_i32, %c0_i32_0 : i32, i32
  }
  func.func @transform_8(%arg0: i32) -> (i32, i32) {
    %c0_i32 = arith.constant 0 : i32
    %c0_i32_0 = arith.constant 0 : i32
    return %arg0, %c0_i32 : i32, i32
  }
  func.func @transform_9(%arg0: i32) -> (i32, i32) {
    %c0_i32 = arith.constant 0 : i32
    %c0_i32_0 = arith.constant 0 : i32
    return %arg0, %c0_i32 : i32, i32
  }
}

</mosaic_0001>

<bundles_post_ra>
// kernel: bottleneck_forward.3
= control target key start
LH: loop header
LB: loop body
LE: loop exit
PB: predicated region body
PF: predicated region fallthrough
CT: control target
= control target key end

     0   :  { %s1648_s30 = smov 0   ;;  %s2009_s0 = inlined_call_operand.vmem [shape: f32[512,128], index: 0, kind: input, shape index: {}]   ;;  %s2010_s1 = inlined_call_operand.vmem [shape: f32[1,128], index: 1, kind: input, shape index: {}]   ;;  %s2011_s2 = inlined_call_operand.vmem [shape: f32[1,128], index: 2, kind: input, shape index: {}]   ;;  %s2012_s3 = inlined_call_operand.vmem [shape: f32[1,128], index: 3, kind: input, shape index: {}]   ;;  %s2013_s4 = inlined_call_operand.vmem [shape: f32[1,128], index: 4, kind: input, shape index: {}]   ;;  %s2014_s5 = inlined_call_operand.vmem [shape: bf16[128,128], index: 5, kind: input, shape index: {}]   ;;  %s2015_s6 = inlined_call_operand.vmem [shape: bf16[128,128], index: 6, kind: input, shape index: {}]   ;;  %s2016_s7 = inlined_call_operand.vmem [shape: f32[1,128], index: 7, kind: input, shape index: {}]   ;;  %s2017_s8 = inlined_call_operand.vmem [shape: f32[512,128], index: 8, kind: input, shape index: {}, may-alias: {8,9}]   ;;  %s2018_s9 = inlined_call_operand.vmem [shape: f32[512,128], index: 9, kind: output, shape index: {}, may-alias: {8,9}]  }
   0x1 LB: > { %s1326_s10 = sadd.s32 4294967295, %s1596_s30   ;;  %p1330_p0 = scmp.ge.s32.totalorder %s1596_s30, 1  ;;  %s1596_s30 = sphi %s1648_s30, %s19_s30  }
   0x2   : > { %p299_p1 = scmp.lt.s32.totalorder %s1596_s30, 3 }
   0x4   : > { %p300_p2 = pnand %p1330_p0, %p299_p1 }
   0x5   : > { %v1508_v0 = vld [vmem:[%s2014_s5] sm:$0xff] (!%p300_p2)   ;;  %v1509_v1 = vld [vmem:[%s2014_s5 + $0x8] sm:$0xff] (!%p300_p2)   ;;  %v1510_v2 = vld [vmem:[%s2014_s5 + $0x10] sm:$0xff] (!%p300_p2)   ;;  %s1331_s23 = sshll.u32 (!%p300_p2), %s1326_s10, 5  ;;  %v406_v13 = vlaneseq (!%p300_p2) }
   0x6   : > { %303 = sbr.rel (%p300_p2) target bundleno = 552 (0x228), region = 56  ;;  %1404 = vmatprep.subr.bf16.mxu0 (!%p300_p2), %v1508_v0  ;;  %v1511_v3 = vld [vmem:[%s2014_s5 + $0x18] sm:$0xff] (!%p300_p2)   ;;  %v359_v4 = vld [vmem:[%s2010_s1] sm:$0x1] (!%p300_p2)  ;;  %p341_p3 = scmp.lt.s32.totalorder (!%p300_p2), %s1331_s23, 63  ;;  %v1513_v12 = vld [vmem:[%s2014_s5 + $0x28] sm:$0xff] (!%p300_p2)  }
   0x7   : > { %1405 = vmatpush3.bf16.msra.mxu0 (!%p300_p2), %v1508_v0  ;;  %v361_v5 = vld [vmem:[%s2011_s2] sm:$0x1] (!%p300_p2)  ;;  %v360_v6 = vmul.f32 (!%p300_p2), 0.001953125, %v359_v4  ;;  %v1514_v15 = vld [vmem:[%s2014_s5 + $0x30] sm:$0xff] (!%p300_p2)   ;;  %v407_v16 = vshrl.u32 (!%p300_p2), %v406_v13, 7  ;;  %v1517_v18 = vld [vmem:[%s2015_s6 + $0x8] sm:$0xff] (!%p300_p2)  }
   0x8   : > { %1406 = vmatprep.subr.bf16.mxu0 (!%p300_p2), %v1509_v1  ;;  %v362_v7 = vmul.f32 (!%p300_p2), 0.001953125, %v361_v5  ;;  %v1512_v9 = vld [vmem:[%s2014_s5 + $0x20] sm:$0xff] (!%p300_p2)   ;;  %v1515_v19 = vld [vmem:[%s2014_s5 + $0x38] sm:$0xff] (!%p300_p2)  }
   0x9   : > { %v363_v8 = vmul.f32 (!%p300_p2), %v360_v6, %v360_v6  ;;  %v1516_v17 = vld [vmem:[%s2015_s6] sm:$0xff] (!%p300_p2)   ;;  %v408_v21 = vsub.s32 (!%p300_p2), 0, %v407_v16 }
   0xa   : > { %1452 = vmatprep.subr.bf16.mxu1 (!%p300_p2), %v1516_v17  ;;  %v366_v20 = vld [vmem:[%s2012_s3] sm:$0x1] (!%p300_p2) }
   0xb   : > { %1407 = vmatpush3.bf16.msra.mxu0 (!%p300_p2), %v1509_v1  ;;  %v364_v10 = vsub.f32 (!%p300_p2), %v362_v7, %v363_v8  ;;  %1453 = vmatpush3.bf16.msra.mxu1 (!%p300_p2), %v1516_v17  ;;  %v370_v24 = vld [vmem:[%s2013_s4] sm:$0x1] (!%p300_p2) }
   0xc   : > { %1408 = vmatprep.subr.bf16.mxu0 (!%p300_p2), %v1510_v2  ;;  %1454 = vmatprep.subr.bf16.mxu1 (!%p300_p2), %v1517_v18 }
   0xd   : > { %v365_v11 = vmax.f32 %v364_v10, 0.0  ;;  %s2020_s23 = smov (!%p341_p3, %s1331_s23), 63 }
   0xe   : > { %s1686_s12 = sshll.u32 %s2020_s23, 3 }
   0xf   : > { %1409 = vmatpush3.bf16.msra.mxu0 %v1510_v2  ;;  %v367_v14 = vadd.f32 1e-05, %v365_v11  ;;  %1455 = vmatpush3.bf16.msra.mxu1 %v1517_v18  ;;  %s1701_s21 = scalar_lea.vmem %s2009_s0, %s1686_s12  ;;  %s1828_s19 = scalar_lea.vmem %s2017_s8, %s1686_s12 }
  0x10   : > { %1410 = vmatprep.subr.bf16.mxu0 %v1511_v3  ;;  %v373_v25 = vld [vmem:[%s1701_s21] sm:$0xff]  ;;  %v374_v26 = vld [vmem:[%s1701_s21 + $0x8] sm:$0xff]  ;;  %v375_v27 = vld [vmem:[%s1701_s21 + $0x10] sm:$0xff]  ;;  %s1909_s24 = scalar_lea.vmem %s2018_s9, %s1686_s12 }
  0x11   : > { %1524 = vrsqrt.f32 %v367_v14  ;;  %v376_v30 = vld [vmem:[%s1701_s21 + $0x18] sm:$0xff]  ;;  %v377_v31 = vld [vmem:[%s1701_s21 + $0x20] sm:$0xff]  ;;  %v378_v32 = vld [vmem:[%s1701_s21 + $0x28] sm:$0xff] }
  0x12   : > { %v379_v41 = vld [vmem:[%s1701_s21 + $0x30] sm:$0xff]  ;;  %v380_v42 = vld [vmem:[%s1701_s21 + $0x38] sm:$0xff]  ;;  %v381_v43 = vld [vmem:[%s1701_s21 + $0x40] sm:$0xff] }
  0x13   : > { %1411 = vmatpush3.bf16.msra.mxu0 %v1511_v3  ;;  %v382_v44 = vld [vmem:[%s1701_s21 + $0x48] sm:$0xff]  ;;  %v383_v62 = vld [vmem:[%s1701_s21 + $0x50] sm:$0xff]  ;;  %v384_v63 = vld [vmem:[%s1701_s21 + $0x58] sm:$0xff] }
  0x14   : > { %1412 = vmatprep.subr.bf16.mxu0 %v1512_v9  ;;  %v385_v0 = vld [vmem:[%s1701_s21 + $0x60] sm:$0xff]  ;;  %v386_v1 = vld [vmem:[%s1701_s21 + $0x68] sm:$0xff]  ;;  %v388_v13 = vld [vmem:[%s1701_s21 + $0x78] sm:$0xff] }
  0x15   : > { %v389_v14 = vld [vmem:[%s1701_s21 + $0x80] sm:$0xff] }
  0x17   : > { %1413 = vmatpush3.bf16.msra.mxu0 %v1512_v9 }
  0x18   : > { %1414 = vmatprep.subr.bf16.mxu0 %v1513_v12 }
  0x1b   : > { %1415 = vmatpush3.bf16.msra.mxu0 %v1513_v12  ;;  %v1525_v22 = vpop.eup %1524  ;;  %v387_v12 = vld [vmem:[%s1701_s21 + $0x70] sm:$0xff] }
  0x1c   : > { %1416 = vmatprep.subr.bf16.mxu0 %v1514_v15  ;;  %v369_v23 = vmul.f32 %v1525_v22, %v366_v20 }
  0x1e   : > { %v371_v28 = vmul.f32 %v369_v23, %v360_v6  ;;  %v1709_v29 = vrot.slane %v369_v23, %v408_v21 }
  0x1f   : > { %1417 = vmatpush3.bf16.msra.mxu0 %v1514_v15  ;;  %v390_v15 = vld [vmem:[%s1701_s21 + $0x88] sm:$0xff] }
  0x20   : > { %1418 = vmatprep.subr.bf16.mxu0 %v1515_v19  ;;  %v372_v33 = vsub.f32 %v370_v24, %v371_v28  ;;  %v411_v34 = vmul.f32 %v1709_v29, %v373_v25  ;;  %v412_v35 = vmul.f32 %v1709_v29, %v374_v26  ;;  %v413_v36 = vmul.f32 %v1709_v29, %v375_v27  ;;  %v391_v26 = vld [vmem:[%s1701_s21 + $0x90] sm:$0xff]  ;;  %v392_v27 = vld [vmem:[%s1701_s21 + $0x98] sm:$0xff]  ;;  %v393_v28 = vld [vmem:[%s1701_s21 + $0xa0] sm:$0xff] }
  0x21   : > { %v414_v37 = vmul.f32 %v1709_v29, %v376_v30  ;;  %v415_v38 = vmul.f32 %v1709_v29, %v377_v31  ;;  %v416_v39 = vmul.f32 %v1709_v29, %v378_v32  ;;  %v417_v51 = vmul.f32 %v1709_v29, %v379_v41  ;;  %v394_v30 = vld [vmem:[%s1701_s21 + $0xa8] sm:$0xff] }
  0x22   : > { %v1720_v40 = vrot.slane %v372_v33, %v408_v21  ;;  %v418_v52 = vmul.f32 %v1709_v29, %v380_v42  ;;  %v419_v55 = vmul.f32 %v1709_v29, %v381_v43  ;;  %v420_v56 = vmul.f32 %v1709_v29, %v382_v44  ;;  %v395_v42 = vld [vmem:[%s1701_s21 + $0xb0] sm:$0xff]  ;;  %v396_v43 = vld [vmem:[%s1701_s21 + $0xb8] sm:$0xff]  ;;  %v397_v44 = vld [vmem:[%s1701_s21 + $0xc0] sm:$0xff] }
  0x23   : > { %1419 = vmatpush3.bf16.msra.mxu0 %v1515_v19  ;;  %v421_v3 = vmul.f32 %v1709_v29, %v383_v62  ;;  %v422_v4 = vmul.f32 %v1709_v29, %v384_v63  ;;  %v423_v6 = vmul.f32 %v1709_v29, %v385_v0  ;;  %v424_v7 = vmul.f32 %v1709_v29, %v386_v1 }
  0x24   : > { %v449_v45 = vadd.f32 %v1720_v40, %v411_v34  ;;  %v450_v46 = vadd.f32 %v1720_v40, %v412_v35  ;;  %v451_v47 = vadd.f32 %v1720_v40, %v413_v36  ;;  %v452_v48 = vadd.f32 %v1720_v40, %v414_v37 }
  0x25   : > { %v453_v49 = vadd.f32 %v1720_v40, %v415_v38  ;;  %v454_v50 = vadd.f32 %v1720_v40, %v416_v39  ;;  %v455_v58 = vadd.f32 %v1720_v40, %v417_v51  ;;  %v456_v59 = vadd.f32 %v1720_v40, %v418_v52 }
  0x26   : > { %v481_v53 = vpack.c.bf16 %v450_v46, %v449_v45  ;;  %v482_v54 = vpack.c.bf16 %v452_v48, %v451_v47  ;;  %v457_v60 = vadd.f32 %v1720_v40, %v419_v55  ;;  %v458_v61 = vadd.f32 %v1720_v40, %v420_v56  ;;  %v398_v45 = vld [vmem:[%s1701_s21 + $0xc8] sm:$0xff]  ;;  %v399_v56 = vld [vmem:[%s1701_s21 + $0xd0] sm:$0xff] }
  0x27   : > { %v483_v57 = vpack.c.bf16 %v454_v50, %v453_v49  ;;  %v484_v2 = vpack.c.bf16 %v456_v59, %v455_v58  ;;  %v459_v8 = vadd.f32 %v1720_v40, %v421_v3  ;;  %v460_v9 = vadd.f32 %v1720_v40, %v422_v4  ;;  %v401_v58 = vld [vmem:[%s1701_s21 + $0xe0] sm:$0xff]  ;;  %v402_v59 = vld [vmem:[%s1701_s21 + $0xe8] sm:$0xff] }
  0x28   : > { %1420 = vmatprep.mubr.bf16.mxu0 %v481_v53  ;;  %v485_v5 = vpack.c.bf16 %v458_v61, %v457_v60  ;;  %v461_v10 = vadd.f32 %v1720_v40, %v423_v6  ;;  %v462_v11 = vadd.f32 %v1720_v40, %v424_v7  ;;  %v425_v17 = vmul.f32 %v1709_v29, %v387_v12  ;;  %v403_v6 = vld [vmem:[%s1701_s21 + $0xf0] sm:$0xff]  ;;  %v404_v7 = vld [vmem:[%s1701_s21 + $0xf8] sm:$0xff] }
  0x29   : > { %1421 = vmatmul.mubr.bf16.vlgmr.msra.gmra.mrb[0].mxu0 %v482_v54  ;;  %v486_v16 = vpack.c.bf16 %v460_v9, %v459_v8  ;;  %v426_v18 = vmul.f32 %v1709_v29, %v388_v13  ;;  %v427_v20 = vmul.f32 %v1709_v29, %v389_v14  ;;  %v428_v21 = vmul.f32 %v1709_v29, %v390_v15  ;;  %v1518_v15 = vld [vmem:[%s2015_s6 + $0x10] sm:$0xff]  }
  0x2a   : > { %1424 = vmatprep.mubr.bf16.mxu0 %v483_v57  ;;  %v487_v19 = vpack.c.bf16 %v462_v11, %v461_v10  ;;  %v463_v22 = vadd.f32 %v1720_v40, %v425_v17  ;;  %v429_v32 = vmul.f32 %v1709_v29, %v391_v26  ;;  %v430_v33 = vmul.f32 %v1709_v29, %v392_v27  ;;  %v400_v57 = vld [vmem:[%s1701_s21 + $0xd8] sm:$0xff]  ;;  %v1522_v17 = vld [vmem:[%s2015_s6 + $0x30] sm:$0xff]  }
  0x2b   : > { %v464_v23 = vadd.f32 %v1720_v40, %v426_v18  ;;  %v465_v24 = vadd.f32 %v1720_v40, %v427_v20  ;;  %v466_v25 = vadd.f32 %v1720_v40, %v428_v21  ;;  %v431_v35 = vmul.f32 %v1709_v29, %v393_v28  ;;  %1456 = vmatprep.subr.bf16.mxu1 %v1518_v15  ;;  %v1523_v18 = vld [vmem:[%s2015_s6 + $0x38] sm:$0xff]  }
  0x2c   : > { %v432_v36 = vmul.f32 %v1709_v29, %v394_v30  ;;  %v467_v37 = vadd.f32 %v1720_v40, %v429_v32  ;;  %v468_v38 = vadd.f32 %v1720_v40, %v430_v33  ;;  %v433_v47 = vmul.f32 %v1709_v29, %v395_v42  ;;  %1457 = vmatpush3.bf16.msra.mxu1 %v1518_v15 }
  0x2d   : > { %v488_v31 = vpack.c.bf16 %v464_v23, %v463_v22  ;;  %v489_v34 = vpack.c.bf16 %v466_v25, %v465_v24  ;;  %v469_v39 = vadd.f32 %v1720_v40, %v431_v35  ;;  %v434_v48 = vmul.f32 %v1709_v29, %v396_v43 }
  0x2e   : > { %v470_v41 = vadd.f32 %v1720_v40, %v432_v36  ;;  %v490_v46 = vpack.c.bf16 %v468_v38, %v467_v37  ;;  %v435_v50 = vmul.f32 %v1709_v29, %v397_v44  ;;  %v436_v51 = vmul.f32 %v1709_v29, %v398_v45 }
  0x2f   : > { %v471_v52 = vadd.f32 %v1720_v40, %v433_v47  ;;  %v472_v53 = vadd.f32 %v1720_v40, %v434_v48  ;;  %v437_v61 = vmul.f32 %v1709_v29, %v399_v56  ;;  %v438_v62 = vmul.f32 %v1709_v29, %v400_v57 }
  0x30   : > { %v491_v49 = vpack.c.bf16 %v470_v41, %v469_v39  ;;  %v473_v54 = vadd.f32 %v1720_v40, %v435_v50  ;;  %v474_v55 = vadd.f32 %v1720_v40, %v436_v51  ;;  %v439_v0 = vmul.f32 %v1709_v29, %v401_v58 }
  0x31   : > { %1425 = vmatmul.mubr.bf16.gmra.mrb[4].mxu0 %v484_v2  ;;  %v492_v60 = vpack.c.bf16 %v472_v53, %v471_v52  ;;  %v440_v1 = vmul.f32 %v1709_v29, %v402_v59  ;;  %v475_v2 = vadd.f32 %v1720_v40, %v437_v61  ;;  %v476_v3 = vadd.f32 %v1720_v40, %v438_v62 }
  0x32   : > { %1428 = vmatprep.mubr.bf16.mxu0 %v485_v5  ;;  %v493_v63 = vpack.c.bf16 %v474_v55, %v473_v54  ;;  %v477_v4 = vadd.f32 %v1720_v40, %v439_v0  ;;  %v441_v9 = vmul.f32 %v1709_v29, %v403_v6  ;;  %v442_v10 = vmul.f32 %v1709_v29, %v404_v7  ;;  %v1520_v29 = vld [vmem:[%s2015_s6 + $0x20] sm:$0xff]  }
  0x33   : > { %v478_v5 = vadd.f32 %v1720_v40, %v440_v1  ;;  %v494_v8 = vpack.c.bf16 %v476_v3, %v475_v2 }
  0x34   : > { %v479_v12 = vadd.f32 %v1720_v40, %v441_v9  ;;  %v480_v13 = vadd.f32 %v1720_v40, %v442_v10  ;;  %v1521_v40 = vld [vmem:[%s2015_s6 + $0x28] sm:$0xff]  }
  0x35   : > { %v495_v11 = vpack.c.bf16 %v478_v5, %v477_v4 }
  0x36   : > { %v496_v14 = vpack.c.bf16 %v480_v13, %v479_v12 }
  0x39   : > { %1429 = vmatmul.mubr.bf16.gmra.mrb[8].mxu0 %v486_v16  ;;  %v1519_v16 = vld [vmem:[%s2015_s6 + $0x18] sm:$0xff]  }
  0x3a   : > { %1432 = vmatprep.mubr.bf16.mxu0 %v487_v19  ;;  %1458 = vmatprep.subr.bf16.mxu1 %v1519_v16 }
  0x3b   : > { %1459 = vmatpush3.bf16.msra.mxu1 %v1519_v16 }
  0x3c   : > { %1460 = vmatprep.subr.bf16.mxu1 %v1520_v29 }
  0x3f   : > { %1461 = vmatpush3.bf16.msra.mxu1 %v1520_v29 }
  0x40   : > { %1462 = vmatprep.subr.bf16.mxu1 %v1521_v40 }
  0x41   : > { %1433 = vmatmul.mubr.bf16.gmra.mrb[12].mxu0 %v488_v31 }
  0x42   : > { %1436 = vmatprep.mubr.bf16.mxu0 %v489_v34 }
  0x43   : > { %1463 = vmatpush3.bf16.msra.mxu1 %v1521_v40 }
  0x44   : > { %1464 = vmatprep.subr.bf16.mxu1 %v1522_v17 }
  0x47   : > { %1465 = vmatpush3.bf16.msra.mxu1 %v1522_v17 }
  0x48   : > { %1466 = vmatprep.subr.bf16.mxu1 %v1523_v18 }
  0x49   : > { %1437 = vmatmul.mubr.bf16.gmra.mrb[16].mxu0 %v490_v46 }
  0x4a   : > { %1440 = vmatprep.mubr.bf16.mxu0 %v491_v49 }
  0x4b   : > { %1467 = vmatpush3.bf16.msra.mxu1 %v1523_v18 }
  0x51   : > { %1441 = vmatmul.mubr.bf16.gmra.mrb[20].mxu0 %v492_v60 }
  0x52   : > { %1444 = vmatprep.mubr.bf16.mxu0 %v493_v63 }
  0x59   : > { %1445 = vmatmul.mubr.bf16.gmra.mrb[24].mxu0 %v494_v8 }
  0x5a   : > { %1448 = vmatprep.mubr.bf16.mxu0 %v495_v11 }
  0x61   : > { %1449 = vmatmul.mubr.bf16.gmra.mrb[28].mxu0 %v496_v14 }
  0xfc   : > { %v1422_v19 = vpop.f32.mrb[0].mxu0 }
  0xfd   : > { %v756_v20 = vmul.f32 0.70710677, %v1422_v19  ;;  %v595_v21 = vpop.f32.mrb[1].mxu0  ;;  %v724_v43 = vmul.f32 0.5, %v1422_v19 }
  0xfe   : > { %v754_v22 = vmul.f32 0.70710677, %v595_v21  ;;  %v1423_v23 = vpop.f32.mrb[2].mxu0  ;;  %v722_v47 = vmul.f32 0.5, %v595_v21 }
  0xff   : > { %1526 = verf.f32 %v756_v20  ;;  %v757_v24 = vmul.f32 0.70710677, %v1423_v23  ;;  %v598_v25 = vpop.f32.mrb[3].mxu0  ;;  %v725_v44 = vmul.f32 0.5, %v1423_v23 }
 0x100   : > { %1528 = verf.f32 %v754_v22  ;;  %v755_v26 = vmul.f32 0.70710677, %v598_v25  ;;  %v723_v48 = vmul.f32 0.5, %v598_v25 }
 0x101   : > { %1530 = verf.f32 %v757_v24 }
 0x102   : > { %1532 = verf.f32 %v755_v26 }
 0x104   : > { %v1426_v27 = vpop.f32.mrb[4].mxu0 }
 0x105   : > { %v760_v28 = vmul.f32 0.70710677, %v1426_v27  ;;  %v611_v30 = vpop.f32.mrb[5].mxu0  ;;  %v728_v5 = vmul.f32 0.5, %v1426_v27 }
 0x106   : > { %v758_v31 = vmul.f32 0.70710677, %v611_v30  ;;  %v1427_v32 = vpop.f32.mrb[6].mxu0  ;;  %v726_v9 = vmul.f32 0.5, %v611_v30 }
 0x107   : > { %1534 = verf.f32 %v760_v28  ;;  %v761_v33 = vmul.f32 0.70710677, %v1427_v32  ;;  %v614_v34 = vpop.f32.mrb[7].mxu0  ;;  %v729_v6 = vmul.f32 0.5, %v1427_v32 }
 0x108   : > { %1536 = verf.f32 %v758_v31  ;;  %v759_v35 = vmul.f32 0.70710677, %v614_v34  ;;  %v727_v10 = vmul.f32 0.5, %v614_v34 }
 0x109   : > { %v1527_v36 = vpop.eup %1526  ;;  %1538 = verf.f32 %v761_v33 }
 0x10a   : > { %v1529_v37 = vpop.eup %1528  ;;  %v820_v38 = vadd.f32 1.0, %v1527_v36  ;;  %1540 = verf.f32 %v759_v35 }
 0x10b   : > { %v1531_v39 = vpop.eup %1530  ;;  %v818_v41 = vadd.f32 1.0, %v1529_v37 }
 0x10c   : > { %v1533_v42 = vpop.eup %1532  ;;  %v821_v45 = vadd.f32 1.0, %v1531_v39  ;;  %v1430_v46 = vpop.f32.mrb[8].mxu0  ;;  %v852_v52 = vmul.f32 %v820_v38, %v724_v43 }
 0x10d   : > { %v764_v49 = vmul.f32 0.70710677, %v1430_v46  ;;  %v627_v50 = vpop.f32.mrb[9].mxu0  ;;  %v819_v51 = vadd.f32 1.0, %v1533_v42  ;;  %v850_v58 = vmul.f32 %v818_v41, %v722_v47  ;;  %v732_v30 = vmul.f32 0.5, %v1430_v46 }
 0x10e   : > { %v853_v53 = vmul.f32 %v821_v45, %v725_v44  ;;  %v762_v54 = vmul.f32 0.70710677, %v627_v50  ;;  %v1431_v55 = vpop.f32.mrb[10].mxu0  ;;  %v730_v34 = vmul.f32 0.5, %v627_v50 }
 0x10f   : > { %1542 = verf.f32 %v764_v49  ;;  %v765_v56 = vmul.f32 0.70710677, %v1431_v55  ;;  %v630_v57 = vpop.f32.mrb[11].mxu0  ;;  %v851_v59 = vmul.f32 %v819_v51, %v723_v48  ;;  %v733_v31 = vmul.f32 0.5, %v1431_v55 }
 0x110   : > { %1544 = verf.f32 %v762_v54  ;;  %v763_v60 = vmul.f32 0.70710677, %v630_v57  ;;  %v883_v61 = vpack.c.bf16 %v853_v53, %v852_v52  ;;  %v731_v35 = vmul.f32 0.5, %v630_v57 }
 0x111   : > { %v1535_v62 = vpop.eup %1534  ;;  %1546 = verf.f32 %v765_v56  ;;  %v882_v63 = vpack.c.bf16 %v851_v59, %v850_v58 }
 0x112   : > { %v1537_v0 = vpop.eup %1536  ;;  %v824_v1 = vadd.f32 1.0, %v1535_v62  ;;  %1548 = verf.f32 %v763_v60 }
 0x113   : > { %v1539_v2 = vpop.eup %1538  ;;  %v822_v3 = vadd.f32 1.0, %v1537_v0  ;;  %1468 = vmatprep.mubr.bf16.mxu1 %v882_v63 }
 0x114   : > { %v1541_v4 = vpop.eup %1540  ;;  %v825_v7 = vadd.f32 1.0, %v1539_v2  ;;  %v1434_v8 = vpop.f32.mrb[12].mxu0  ;;  %1469 = vmatmul.mubr.bf16.vlgmr.msra.gmra.mrb[0].mxu1 %v883_v61  ;;  %v856_v14 = vmul.f32 %v824_v1, %v728_v5 }
 0x115   : > { %v823_v11 = vadd.f32 1.0, %v1541_v4  ;;  %v768_v12 = vmul.f32 0.70710677, %v1434_v8  ;;  %v643_v13 = vpop.f32.mrb[13].mxu0  ;;  %v854_v40 = vmul.f32 %v822_v3, %v726_v9  ;;  %v736_v57 = vmul.f32 0.5, %v1434_v8 }
 0x116   : > { %v857_v15 = vmul.f32 %v825_v7, %v729_v6  ;;  %v766_v16 = vmul.f32 0.70710677, %v643_v13  ;;  %v1435_v29 = vpop.f32.mrb[14].mxu0  ;;  %v734_v61 = vmul.f32 0.5, %v643_v13 }
 0x117   : > { %v855_v17 = vmul.f32 %v823_v11, %v727_v10  ;;  %1550 = verf.f32 %v768_v12  ;;  %v769_v18 = vmul.f32 0.70710677, %v1435_v29  ;;  %v646_v19 = vpop.f32.mrb[15].mxu0  ;;  %v737_v58 = vmul.f32 0.5, %v1435_v29 }
 0x118   : > { %1552 = verf.f32 %v766_v16  ;;  %v767_v20 = vmul.f32 0.70710677, %v646_v19  ;;  %v885_v21 = vpack.c.bf16 %v857_v15, %v856_v14  ;;  %v735_v62 = vmul.f32 0.5, %v646_v19 }
 0x119   : > { %v1543_v22 = vpop.eup %1542  ;;  %1554 = verf.f32 %v769_v18  ;;  %v884_v23 = vpack.c.bf16 %v855_v17, %v854_v40 }
 0x11a   : > { %v1545_v24 = vpop.eup %1544  ;;  %v828_v25 = vadd.f32 1.0, %v1543_v22  ;;  %1556 = verf.f32 %v767_v20 }
 0x11b   : > { %v1547_v26 = vpop.eup %1546  ;;  %v826_v27 = vadd.f32 1.0, %v1545_v24  ;;  %1472 = vmatprep.mubr.bf16.mxu1 %v884_v23 }
 0x11c   : > { %v1549_v28 = vpop.eup %1548  ;;  %v829_v32 = vadd.f32 1.0, %v1547_v26  ;;  %v1438_v33 = vpop.f32.mrb[16].mxu0  ;;  %1473 = vmatmul.mubr.bf16.gmra.mrb[4].mxu1 %v885_v21  ;;  %v860_v39 = vmul.f32 %v828_v25, %v732_v30 }
 0x11d   : > { %v827_v36 = vadd.f32 1.0, %v1549_v28  ;;  %v772_v37 = vmul.f32 0.70710677, %v1438_v33  ;;  %v659_v38 = vpop.f32.mrb[17].mxu0  ;;  %v858_v44 = vmul.f32 %v826_v27, %v730_v34  ;;  %v740_v17 = vmul.f32 0.5, %v1438_v33 }
 0x11e   : > { %v861_v41 = vmul.f32 %v829_v32, %v733_v31  ;;  %v770_v42 = vmul.f32 0.70710677, %v659_v38  ;;  %v1439_v43 = vpop.f32.mrb[18].mxu0  ;;  %v738_v21 = vmul.f32 0.5, %v659_v38 }
 0x11f   : > { %v859_v45 = vmul.f32 %v827_v36, %v731_v35  ;;  %1558 = verf.f32 %v772_v37  ;;  %v773_v47 = vmul.f32 0.70710677, %v1439_v43  ;;  %v662_v48 = vpop.f32.mrb[19].mxu0  ;;  %v741_v18 = vmul.f32 0.5, %v1439_v43 }
 0x120   : > { %1560 = verf.f32 %v770_v42  ;;  %v771_v46 = vmul.f32 0.70710677, %v662_v48  ;;  %v887_v49 = vpack.c.bf16 %v861_v41, %v860_v39  ;;  %v739_v22 = vmul.f32 0.5, %v662_v48 }
 0x121   : > { %v1551_v51 = vpop.eup %1550  ;;  %1562 = verf.f32 %v773_v47  ;;  %v886_v52 = vpack.c.bf16 %v859_v45, %v858_v44 }
 0x122   : > { %v1553_v50 = vpop.eup %1552  ;;  %v832_v53 = vadd.f32 1.0, %v1551_v51  ;;  %1564 = verf.f32 %v771_v46 }
 0x123   : > { %v1555_v54 = vpop.eup %1554  ;;  %v830_v55 = vadd.f32 1.0, %v1553_v50  ;;  %1476 = vmatprep.mubr.bf16.mxu1 %v886_v52 }
 0x124   : > { %v1557_v56 = vpop.eup %1556  ;;  %v833_v59 = vadd.f32 1.0, %v1555_v54  ;;  %v1442_v60 = vpop.f32.mrb[20].mxu0  ;;  %1477 = vmatmul.mubr.bf16.gmra.mrb[8].mxu1 %v887_v49  ;;  %v864_v2 = vmul.f32 %v832_v53, %v736_v57 }
 0x125   : > { %v831_v63 = vadd.f32 1.0, %v1557_v56  ;;  %v776_v0 = vmul.f32 0.70710677, %v1442_v60  ;;  %v675_v1 = vpop.f32.mrb[21].mxu0  ;;  %v862_v6 = vmul.f32 %v830_v55, %v734_v61  ;;  %v744_v45 = vmul.f32 0.5, %v1442_v60 }
 0x126   : > { %v865_v3 = vmul.f32 %v833_v59, %v737_v58  ;;  %v774_v4 = vmul.f32 0.70710677, %v675_v1  ;;  %v1443_v5 = vpop.f32.mrb[22].mxu0  ;;  %v742_v49 = vmul.f32 0.5, %v675_v1 }
 0x127   : > { %v863_v7 = vmul.f32 %v831_v63, %v735_v62  ;;  %1566 = verf.f32 %v776_v0  ;;  %v777_v9 = vmul.f32 0.70710677, %v1443_v5  ;;  %v678_v10 = vpop.f32.mrb[23].mxu0  ;;  %v745_v47 = vmul.f32 0.5, %v1443_v5 }
 0x128   : > { %1568 = verf.f32 %v774_v4  ;;  %v775_v8 = vmul.f32 0.70710677, %v678_v10  ;;  %v889_v11 = vpack.c.bf16 %v865_v3, %v864_v2  ;;  %v743_v51 = vmul.f32 0.5, %v678_v10 }
 0x129   : > { %v1559_v12 = vpop.eup %1558  ;;  %1570 = verf.f32 %v777_v9  ;;  %v888_v14 = vpack.c.bf16 %v863_v7, %v862_v6 }
 0x12a   : > { %v1561_v13 = vpop.eup %1560  ;;  %v836_v15 = vadd.f32 1.0, %v1559_v12  ;;  %1572 = verf.f32 %v775_v8 }
 0x12b   : > { %v1563_v16 = vpop.eup %1562  ;;  %v834_v29 = vadd.f32 1.0, %v1561_v13  ;;  %1480 = vmatprep.mubr.bf16.mxu1 %v888_v14 }
 0x12c   : > { %v1565_v40 = vpop.eup %1564  ;;  %v837_v19 = vadd.f32 1.0, %v1563_v16  ;;  %v1446_v20 = vpop.f32.mrb[24].mxu0  ;;  %1481 = vmatmul.mubr.bf16.gmra.mrb[12].mxu1 %v889_v11  ;;  %v868_v26 = vmul.f32 %v836_v15, %v740_v17 }
 0x12d   : > { %v835_v23 = vadd.f32 1.0, %v1565_v40  ;;  %v780_v24 = vmul.f32 0.70710677, %v1446_v20  ;;  %v691_v25 = vpop.f32.mrb[25].mxu0  ;;  %v866_v31 = vmul.f32 %v834_v29, %v738_v21  ;;  %v748_v7 = vmul.f32 0.5, %v1446_v20 }
 0x12e   : > { %v869_v27 = vmul.f32 %v837_v19, %v741_v18  ;;  %v778_v28 = vmul.f32 0.70710677, %v691_v25  ;;  %v1447_v30 = vpop.f32.mrb[26].mxu0  ;;  %v746_v8 = vmul.f32 0.5, %v691_v25 }
 0x12f   : > { %v867_v32 = vmul.f32 %v835_v23, %v739_v22  ;;  %1574 = verf.f32 %v780_v24  ;;  %v781_v34 = vmul.f32 0.70710677, %v1447_v30  ;;  %v694_v35 = vpop.f32.mrb[27].mxu0  ;;  %v749_v9 = vmul.f32 0.5, %v1447_v30 }
 0x130   : > { %1576 = verf.f32 %v778_v28  ;;  %v779_v33 = vmul.f32 0.70710677, %v694_v35  ;;  %v891_v36 = vpack.c.bf16 %v869_v27, %v868_v26  ;;  %v747_v11 = vmul.f32 0.5, %v694_v35 }
 0x131   : > { %v1567_v37 = vpop.eup %1566  ;;  %1578 = verf.f32 %v781_v34  ;;  %v890_v39 = vpack.c.bf16 %v867_v32, %v866_v31 }
 0x132   : > { %v1569_v38 = vpop.eup %1568  ;;  %v840_v41 = vadd.f32 1.0, %v1567_v37  ;;  %1580 = verf.f32 %v779_v33  ;;  %v1125_v37 = vld [vmem:[%s1828_s19 + $0x10] sm:$0xff] }
 0x133   : > { %v1571_v42 = vpop.eup %1570  ;;  %v838_v43 = vadd.f32 1.0, %v1569_v38  ;;  %1484 = vmatprep.mubr.bf16.mxu1 %v890_v39  ;;  %v1123_v39 = vld [vmem:[%s1828_s19] sm:$0xff] }
 0x134   : > { %v1573_v44 = vpop.eup %1572  ;;  %v841_v48 = vadd.f32 1.0, %v1571_v42  ;;  %v1450_v46 = vpop.f32.mrb[28].mxu0  ;;  %1485 = vmatmul.mubr.bf16.gmra.mrb[16].mxu1 %v891_v36  ;;  %v872_v54 = vmul.f32 %v840_v41, %v744_v45  ;;  %v1833_v36 = vld [vmem:[%s2016_s7] ss:$0 sm:$0xff]  ;;  %v1126_v41 = vld [vmem:[%s1828_s19 + $0x18] sm:$0xff]  ;;  %v1124_v42 = vld [vmem:[%s1828_s19 + $0x8] sm:$0xff] }
 0x135   : > { %v839_v52 = vadd.f32 1.0, %v1573_v44  ;;  %v784_v50 = vmul.f32 0.70710677, %v1450_v46  ;;  %v707_v53 = vpop.f32.mrb[29].mxu0  ;;  %v870_v58 = vmul.f32 %v838_v43, %v742_v49  ;;  %v752_v20 = vmul.f32 0.5, %v1450_v46  ;;  %v1129_v43 = vld [vmem:[%s1828_s19 + $0x30] sm:$0xff] }
 0x136   : > { %v873_v55 = vmul.f32 %v841_v48, %v745_v47  ;;  %v782_v56 = vmul.f32 0.70710677, %v707_v53  ;;  %v1451_v57 = vpop.f32.mrb[30].mxu0  ;;  %v750_v25 = vmul.f32 0.5, %v707_v53  ;;  %v1127_v44 = vld [vmem:[%s1828_s19 + $0x20] sm:$0xff]  ;;  %v1130_v45 = vld [vmem:[%s1828_s19 + $0x38] sm:$0xff] }
 0x137   : > { %v871_v59 = vmul.f32 %v839_v52, %v743_v51  ;;  %1582 = verf.f32 %v784_v50  ;;  %v785_v61 = vmul.f32 0.70710677, %v1451_v57  ;;  %v710_v62 = vpop.f32.mrb[31].mxu0  ;;  %v753_v24 = vmul.f32 0.5, %v1451_v57  ;;  %v1128_v47 = vld [vmem:[%s1828_s19 + $0x28] sm:$0xff]  ;;  %v1133_v48 = vld [vmem:[%s1828_s19 + $0x50] sm:$0xff] }
 0x138   : > { %1584 = verf.f32 %v782_v56  ;;  %v783_v60 = vmul.f32 0.70710677, %v710_v62  ;;  %v893_v63 = vpack.c.bf16 %v873_v55, %v872_v54  ;;  %v751_v27 = vmul.f32 0.5, %v710_v62  ;;  %v1845_v46 = vld [vmem:[%s1828_s19 + $0x40] sm:$0xff]  ;;  %v1848_v49 = vld [vmem:[%s1828_s19 + $0x58] sm:$0xff]  ;;  %v1851_v51 = vld [vmem:[%s1828_s19 + $0x48] sm:$0xff] }
 0x139   : > { %v1575_v0 = vpop.eup %1574  ;;  %1586 = verf.f32 %v785_v61  ;;  %v892_v2 = vpack.c.bf16 %v871_v59, %v870_v58  ;;  %v1854_v52 = vld [vmem:[%s1828_s19 + $0x70] sm:$0xff]  ;;  %v1857_v50 = vld [vmem:[%s1828_s19 + $0x60] sm:$0xff]  ;;  %v1860_v53 = vld [vmem:[%s1828_s19 + $0x78] sm:$0xff] }
 0x13a   : > { %v1577_v1 = vpop.eup %1576  ;;  %v844_v3 = vadd.f32 1.0, %v1575_v0  ;;  %1588 = verf.f32 %v783_v60  ;;  %v1863_v54 = vld [vmem:[%s1828_s19 + $0x68] sm:$0xff]  ;;  %v1866_v55 = vld [vmem:[%s1828_s19 + $0x90] sm:$0xff]  ;;  %v1869_v56 = vld [vmem:[%s1828_s19 + $0x80] sm:$0xff] }
 0x13b   : > { %v1579_v4 = vpop.eup %1578  ;;  %v842_v5 = vadd.f32 1.0, %v1577_v1  ;;  %1488 = vmatprep.mubr.bf16.mxu1 %v892_v2  ;;  %v1872_v57 = vld [vmem:[%s1828_s19 + $0x98] sm:$0xff]  ;;  %v1875_v58 = vld [vmem:[%s1828_s19 + $0x88] sm:$0xff]  ;;  %v1878_v59 = vld [vmem:[%s1828_s19 + $0xb0] sm:$0xff] }
 0x13c   : > { %v1581_v6 = vpop.eup %1580  ;;  %v845_v10 = vadd.f32 1.0, %v1579_v4  ;;  %1489 = vmatmul.mubr.bf16.gmra.mrb[20].mxu1 %v893_v63  ;;  %v876_v14 = vmul.f32 %v844_v3, %v748_v7  ;;  %v1881_v61 = vld [vmem:[%s1828_s19 + $0xa0] sm:$0xff]  ;;  %v1884_v62 = vld [vmem:[%s1828_s19 + $0xb8] sm:$0xff]  ;;  %v1887_v60 = vld [vmem:[%s1828_s19 + $0xa8] sm:$0xff] }
 0x13d   : > { %v843_v12 = vadd.f32 1.0, %v1581_v6  ;;  %v874_v15 = vmul.f32 %v842_v5, %v746_v8  ;;  %v1890_v63 = vld [vmem:[%s1828_s19 + $0xd0] sm:$0xff]  ;;  %v1893_v0 = vld [vmem:[%s1828_s19 + $0xc0] sm:$0xff]  ;;  %v1897_v3 = vld [vmem:[%s1828_s19 + $0xd8] sm:$0xff] }
 0x13e   : > { %v877_v13 = vmul.f32 %v845_v10, %v749_v9  ;;  %v1900_v4 = vld [vmem:[%s1828_s19 + $0xc8] sm:$0xff]  ;;  %v1903_v5 = vld [vmem:[%s1828_s19 + $0xf0] sm:$0xff]  ;;  %v1913_v9 = vld [vmem:[%s1828_s19 + $0xe0] sm:$0xff] }
 0x13f   : > { %v875_v16 = vmul.f32 %v843_v12, %v747_v11  ;;  %v1916_v10 = vld [vmem:[%s1828_s19 + $0xf8] sm:$0xff]  ;;  %v1919_v8 = vld [vmem:[%s1828_s19 + $0xe8] sm:$0xff] }
 0x140   : > { %v895_v29 = vpack.c.bf16 %v877_v13, %v876_v14 }
 0x141   : > { %v1583_v40 = vpop.eup %1582  ;;  %v894_v17 = vpack.c.bf16 %v875_v16, %v874_v15 }
 0x142   : > { %v1585_v18 = vpop.eup %1584  ;;  %v848_v19 = vadd.f32 1.0, %v1583_v40 }
 0x143   : > { %v1587_v21 = vpop.eup %1586  ;;  %v846_v22 = vadd.f32 1.0, %v1585_v18  ;;  %1492 = vmatprep.mubr.bf16.mxu1 %v894_v17 }
 0x144   : > { %v1589_v23 = vpop.eup %1588  ;;  %v849_v26 = vadd.f32 1.0, %v1587_v21  ;;  %1493 = vmatmul.mubr.bf16.gmra.mrb[24].mxu1 %v895_v29  ;;  %v880_v30 = vmul.f32 %v848_v19, %v752_v20 }
 0x145   : > { %v847_v28 = vadd.f32 1.0, %v1589_v23  ;;  %v878_v32 = vmul.f32 %v846_v22, %v750_v25 }
 0x146   : > { %v881_v31 = vmul.f32 %v849_v26, %v753_v24 }
 0x147   : > { %v879_v34 = vmul.f32 %v847_v28, %v751_v27 }
 0x148   : > { %v897_v35 = vpack.c.bf16 %v881_v31, %v880_v30 }
 0x149   : > { %v896_v33 = vpack.c.bf16 %v879_v34, %v878_v32 }
 0x14b   : > { %1496 = vmatprep.mubr.bf16.mxu1 %v896_v33 }
 0x14c   : > { %1497 = vmatmul.mubr.bf16.gmra.mrb[28].mxu1 %v897_v35 }
 0x1e7   : > { %v1470_v38 = vpop.f32.mrb[0].mxu1 }
 0x1e8   : > { %v1164_v2 = vmul.f32 %v1470_v38, %v1833_v36  ;;  %v996_v1 = vpop.f32.mrb[1].mxu1 }
 0x1e9   : > { %v1162_v6 = vmul.f32 %v1833_v36, %v996_v1  ;;  %v1471_v7 = vpop.f32.mrb[2].mxu1 }
 0x1ea   : > { %v1196_v11 = vadd.f32 %v1164_v2, %v1125_v37  ;;  %v1165_v12 = vmul.f32 %v1471_v7, %v1833_v36  ;;  %v999_v14 = vpop.f32.mrb[3].mxu1 }
 0x1eb   : > { %v1194_v13 = vadd.f32 %v1162_v6, %v1123_v39  ;;  %v1163_v15 = vmul.f32 %v1833_v36, %v999_v14 }
 0x1ec   : > { %v1197_v16 = vadd.f32 %v1165_v12, %v1126_v41  ;;  %1228 = vst [vmem:[%s1909_s24 + $0x10] sm:$0xff] %v1196_v11 }
 0x1ed   : > { %v1195_v29 = vadd.f32 %v1163_v15, %v1124_v42  ;;  %1226 = vst [vmem:[%s1909_s24] sm:$0xff] %v1194_v13 }
 0x1ee   : > { %1229 = vst [vmem:[%s1909_s24 + $0x18] sm:$0xff] %v1197_v16 }
 0x1ef   : > { %v1474_v40 = vpop.f32.mrb[4].mxu1  ;;  %1227 = vst [vmem:[%s1909_s24 + $0x8] sm:$0xff] %v1195_v29 }
 0x1f0   : > { %v1168_v17 = vmul.f32 %v1474_v40, %v1833_v36  ;;  %v1012_v18 = vpop.f32.mrb[5].mxu1 }
 0x1f1   : > { %v1166_v19 = vmul.f32 %v1833_v36, %v1012_v18  ;;  %v1475_v21 = vpop.f32.mrb[6].mxu1 }
 0x1f2   : > { %v1200_v22 = vadd.f32 %v1168_v17, %v1129_v43  ;;  %v1169_v23 = vmul.f32 %v1475_v21, %v1833_v36  ;;  %v1015_v20 = vpop.f32.mrb[7].mxu1 }
 0x1f3   : > { %v1198_v24 = vadd.f32 %v1166_v19, %v1127_v44  ;;  %v1167_v26 = vmul.f32 %v1833_v36, %v1015_v20 }
 0x1f4   : > { %v1201_v25 = vadd.f32 %v1169_v23, %v1130_v45  ;;  %1232 = vst [vmem:[%s1909_s24 + $0x30] sm:$0xff] %v1200_v22 }
 0x1f5   : > { %v1199_v27 = vadd.f32 %v1167_v26, %v1128_v47  ;;  %1230 = vst [vmem:[%s1909_s24 + $0x20] sm:$0xff] %v1198_v24 }
 0x1f6   : > { %1233 = vst [vmem:[%s1909_s24 + $0x38] sm:$0xff] %v1201_v25 }
 0x1f7   : > { %v1478_v28 = vpop.f32.mrb[8].mxu1  ;;  %1231 = vst [vmem:[%s1909_s24 + $0x28] sm:$0xff] %v1199_v27 }
 0x1f8   : > { %v1172_v30 = vmul.f32 %v1478_v28, %v1833_v36  ;;  %v1028_v31 = vpop.f32.mrb[9].mxu1 }
 0x1f9   : > { %v1170_v32 = vmul.f32 %v1833_v36, %v1028_v31  ;;  %v1479_v34 = vpop.f32.mrb[10].mxu1 }
 0x1fa   : > { %v1204_v35 = vadd.f32 %v1172_v30, %v1133_v48  ;;  %v1173_v33 = vmul.f32 %v1479_v34, %v1833_v36  ;;  %v1031_v37 = vpop.f32.mrb[11].mxu1 }
 0x1fb   : > { %v1202_v39 = vadd.f32 %v1170_v32, %v1845_v46  ;;  %v1171_v38 = vmul.f32 %v1833_v36, %v1031_v37 }
 0x1fc   : > { %v1205_v41 = vadd.f32 %v1173_v33, %v1848_v49  ;;  %1236 = vst [vmem:[%s1909_s24 + $0x50] sm:$0xff] %v1204_v35 }
 0x1fd   : > { %v1203_v42 = vadd.f32 %v1171_v38, %v1851_v51  ;;  %1234 = vst [vmem:[%s1909_s24 + $0x40] sm:$0xff] %v1202_v39 }
 0x1fe   : > { %1237 = vst [vmem:[%s1909_s24 + $0x58] sm:$0xff] %v1205_v41 }
 0x1ff   : > { %v1482_v43 = vpop.f32.mrb[12].mxu1  ;;  %1235 = vst [vmem:[%s1909_s24 + $0x48] sm:$0xff] %v1203_v42 }
 0x200   : > { %v1176_v44 = vmul.f32 %v1482_v43, %v1833_v36  ;;  %v1044_v45 = vpop.f32.mrb[13].mxu1 }
 0x201   : > { %v1174_v47 = vmul.f32 %v1833_v36, %v1044_v45  ;;  %v1483_v48 = vpop.f32.mrb[14].mxu1 }
 0x202   : > { %v1208_v46 = vadd.f32 %v1176_v44, %v1854_v52  ;;  %v1177_v49 = vmul.f32 %v1483_v48, %v1833_v36  ;;  %v1047_v2 = vpop.f32.mrb[15].mxu1 }
 0x203   : > { %v1206_v51 = vadd.f32 %v1174_v47, %v1857_v50  ;;  %v1175_v1 = vmul.f32 %v1833_v36, %v1047_v2 }
 0x204   : > { %v1209_v6 = vadd.f32 %v1177_v49, %v1860_v53  ;;  %1240 = vst [vmem:[%s1909_s24 + $0x70] sm:$0xff] %v1208_v46 }
 0x205   : > { %v1207_v7 = vadd.f32 %v1175_v1, %v1863_v54  ;;  %1238 = vst [vmem:[%s1909_s24 + $0x60] sm:$0xff] %v1206_v51 }
 0x206   : > { %1241 = vst [vmem:[%s1909_s24 + $0x78] sm:$0xff] %v1209_v6 }
 0x207   : > { %v1486_v11 = vpop.f32.mrb[16].mxu1  ;;  %1239 = vst [vmem:[%s1909_s24 + $0x68] sm:$0xff] %v1207_v7 }
 0x208   : > { %v1180_v52 = vmul.f32 %v1486_v11, %v1833_v36  ;;  %v1060_v12 = vpop.f32.mrb[17].mxu1 }
 0x209   : > { %v1178_v50 = vmul.f32 %v1833_v36, %v1060_v12  ;;  %v1487_v14 = vpop.f32.mrb[18].mxu1 }
 0x20a   : > { %v1212_v13 = vadd.f32 %v1180_v52, %v1866_v55  ;;  %v1181_v53 = vmul.f32 %v1487_v14, %v1833_v36  ;;  %v1063_v15 = vpop.f32.mrb[19].mxu1 }
 0x20b   : > { %v1210_v54 = vadd.f32 %v1178_v50, %v1869_v56  ;;  %v1179_v16 = vmul.f32 %v1833_v36, %v1063_v15 }
 0x20c   : > { %v1213_v29 = vadd.f32 %v1181_v53, %v1872_v57  ;;  %1244 = vst [vmem:[%s1909_s24 + $0x90] sm:$0xff] %v1212_v13 }
 0x20d   : > { %v1211_v40 = vadd.f32 %v1179_v16, %v1875_v58  ;;  %1242 = vst [vmem:[%s1909_s24 + $0x80] sm:$0xff] %v1210_v54 }
 0x20e   : > { %1245 = vst [vmem:[%s1909_s24 + $0x98] sm:$0xff] %v1213_v29 }
 0x20f   : > { %v1490_v17 = vpop.f32.mrb[20].mxu1  ;;  %1243 = vst [vmem:[%s1909_s24 + $0x88] sm:$0xff] %v1211_v40 }
 0x210   : > { %v1184_v55 = vmul.f32 %v1490_v17, %v1833_v36  ;;  %v1076_v18 = vpop.f32.mrb[21].mxu1 }
 0x211   : > { %v1182_v56 = vmul.f32 %v1833_v36, %v1076_v18  ;;  %v1491_v19 = vpop.f32.mrb[22].mxu1 }
 0x212   : > { %v1216_v21 = vadd.f32 %v1184_v55, %v1878_v59  ;;  %v1185_v57 = vmul.f32 %v1491_v19, %v1833_v36  ;;  %v1079_v22 = vpop.f32.mrb[23].mxu1 }
 0x213   : > { %v1214_v58 = vadd.f32 %v1182_v56, %v1881_v61  ;;  %v1183_v23 = vmul.f32 %v1833_v36, %v1079_v22 }
 0x214   : > { %v1217_v20 = vadd.f32 %v1185_v57, %v1884_v62  ;;  %1248 = vst [vmem:[%s1909_s24 + $0xb0] sm:$0xff] %v1216_v21 }
 0x215   : > { %v1215_v24 = vadd.f32 %v1183_v23, %v1887_v60  ;;  %1246 = vst [vmem:[%s1909_s24 + $0xa0] sm:$0xff] %v1214_v58 }
 0x216   : > { %1249 = vst [vmem:[%s1909_s24 + $0xb8] sm:$0xff] %v1217_v20 }
 0x217   : > { %v1494_v26 = vpop.f32.mrb[24].mxu1  ;;  %1247 = vst [vmem:[%s1909_s24 + $0xa8] sm:$0xff] %v1215_v24 }
 0x218   : > { %v1188_v59 = vmul.f32 %v1494_v26, %v1833_v36  ;;  %v1092_v25 = vpop.f32.mrb[25].mxu1 }
 0x219   : > { %v1186_v61 = vmul.f32 %v1833_v36, %v1092_v25  ;;  %v1495_v27 = vpop.f32.mrb[26].mxu1 }
 0x21a   : > { %v1220_v28 = vadd.f32 %v1188_v59, %v1890_v63  ;;  %v1189_v62 = vmul.f32 %v1495_v27, %v1833_v36  ;;  %v1095_v30 = vpop.f32.mrb[27].mxu1 }
 0x21b   : > { %v1218_v60 = vadd.f32 %v1186_v61, %v1893_v0  ;;  %v1187_v31 = vmul.f32 %v1833_v36, %v1095_v30 }
 0x21c   : > { %v1221_v32 = vadd.f32 %v1189_v62, %v1897_v3  ;;  %1252 = vst [vmem:[%s1909_s24 + $0xd0] sm:$0xff] %v1220_v28 }
 0x21d   : > { %v1219_v34 = vadd.f32 %v1187_v31, %v1900_v4  ;;  %1250 = vst [vmem:[%s1909_s24 + $0xc0] sm:$0xff] %v1218_v60 }
 0x21e   : > { %1253 = vst [vmem:[%s1909_s24 + $0xd8] sm:$0xff] %v1221_v32 }
 0x21f   : > { %v1498_v35 = vpop.f32.mrb[28].mxu1  ;;  %1251 = vst [vmem:[%s1909_s24 + $0xc8] sm:$0xff] %v1219_v34 }
 0x220   : > { %v1192_v63 = vmul.f32 %v1498_v35, %v1833_v36  ;;  %v1108_v33 = vpop.f32.mrb[29].mxu1 }
 0x221   : > { %v1190_v0 = vmul.f32 %v1833_v36, %v1108_v33  ;;  %v1499_v37 = vpop.f32.mrb[30].mxu1 }
 0x222   : > { %v1224_v39 = vadd.f32 %v1192_v63, %v1903_v5  ;;  %v1193_v3 = vmul.f32 %v1499_v37, %v1833_v36  ;;  %v1111_v38 = vpop.f32.mrb[31].mxu1 }
 0x223   : > { %v1222_v4 = vadd.f32 %v1190_v0, %v1913_v9  ;;  %v1191_v41 = vmul.f32 %v1833_v36, %v1111_v38 }
 0x224   : > { %v1225_v42 = vadd.f32 %v1193_v3, %v1916_v10  ;;  %1256 = vst [vmem:[%s1909_s24 + $0xf0] sm:$0xff] %v1224_v39 }
 0x225   : > { %v1223_v43 = vadd.f32 %v1191_v41, %v1919_v8  ;;  %1254 = vst [vmem:[%s1909_s24 + $0xe0] sm:$0xff] %v1222_v4 }
 0x226   : > { %1257 = vst [vmem:[%s1909_s24 + $0xf8] sm:$0xff] %v1225_v42 }
 0x227   : > { %1255 = vst [vmem:[%s1909_s24 + $0xe8] sm:$0xff] %v1223_v43 }
 0x228 PF: > { %s19_s30 = sadd.s32 1, %s1596_s30  }
 0x229   : > { %p16_p4 = scmp.ge.s32.totalorder %s19_s30, 4  }
 0x22b   :  { %18 = sbr.rel (!%p16_p4) target bundleno = 1 (0x1), region = 89 }

// kernel: bottleneck_forward.2
= control target key start
LH: loop header
LB: loop body
LE: loop exit
PB: predicated region body
PF: predicated region fallthrough
CT: control target
= control target key end

     0   :  { %s3783_s15 = smov 0   ;;  %s4562_s0 = inlined_call_operand.vmem [shape: bf16[512,1152], index: 0, kind: input, shape index: {}]   ;;  %s4563_s1 = inlined_call_operand.vmem [shape: bf16[1152,128], index: 1, kind: input, shape index: {}]   ;;  %s4564_s2 = inlined_call_operand.vmem [shape: f32[512,128], index: 2, kind: output, shape index: {0}]   ;;  %s4565_s3 = inlined_call_operand.vmem [shape: f32[1,128], index: 3, kind: output, shape index: {1}]   ;;  %s4566_s4 = inlined_call_operand.vmem [shape: f32[1,128], index: 4, kind: output, shape index: {2}]  }
   0x1 LB: > { %s2695_s16 = sadd.s32 4294967295, %s3755_s15   ;;  %p2699_p0 = scmp.ge.s32.totalorder %s3755_s15, 1  ;;  %s3755_s15 = sphi %s3783_s15, %s15_s15  }
   0x2   : > { %p159_p1 = scmp.lt.s32.totalorder %s3755_s15, 3 }
   0x4   : > { %p160_p2 = pnand %p2699_p0, %p159_p1 }
   0x5   : > { %s2700_s17 = sshll.u32 (!%p160_p2), %s2695_s16, 5  ;;  %p2704_p4 = scmp.ne.s32.totalorder (!%p160_p2), %s2695_s16, 0 }
   0x6   : > { %163 = sbr.rel (%p160_p2) target bundleno = 574 (0x23e), region = 28  ;;  %p187_p3 = scmp.lt.s32.totalorder (!%p160_p2), %s2700_s17, 63 }
   0xd   : > { %s4568_s17 = smov (!%p187_p3, %s2700_s17), 63  ;;  %203 = sbr.rel (%p2704_p4) target bundleno = 20 (0x14), region = 32 }
   0xe   : > { %s3459_s18 = smul.u32 36, %s4568_s17  ;;  %s2703_s19 = sshll.u32 %s4568_s17, 3  ;;  %v3757_v0 = vmov (!%p2704_p4), 0.0  }
   0xf   : > { %s3794_s22 = scalar_lea.vmem %s4564_s2, %s2703_s19  ;;  %204 = vst [vmem:[%s4565_s3] sm:$0x1] (!%p2704_p4), %v3757_v0  ;;  %205 = vst [vmem:[%s4566_s4] sm:$0x1] (!%p2704_p4), %v3757_v0 }
  0x10   : > { %s3799_s25 = scalar_lea.vmem %s4562_s0, %s3459_s18 }
  0x14 PF: > { %v3469_v1 = vld [vmem:[%s4563_s1 + $0x40] sm:$0xff]   ;;  %v3471_v3 = vld [vmem:[%s4563_s1 + $0x48] sm:$0xff]   ;;  %v3473_v5 = vld [vmem:[%s4563_s1 + $0x50] sm:$0xff]  }
  0x15   : > { %v3470_v2 = vld [vmem:[%s4563_s1] sm:$0xff]   ;;  %2923 = vmatprep.subr.bf16.mxu0 %v3469_v1  ;;  %3443 = vmatprep.subr.bf16.mxu1 %v3469_v1  ;;  %v3472_v4 = vld [vmem:[%s4563_s1 + $0x8] sm:$0xff]   ;;  %v3474_v6 = vld [vmem:[%s4563_s1 + $0x10] sm:$0xff]  }
  0x16   : > { %2924 = vmatpush3.bf16.msra.mxu0 %v3470_v2  ;;  %3451 = vmatpush3.bf16.msra.mxu1 %v3470_v2  ;;  %v3475_v7 = vld [vmem:[%s4563_s1 + $0x58] sm:$0xff]   ;;  %v3477_v9 = vld [vmem:[%s4563_s1 + $0x60] sm:$0xff]   ;;  %v3479_v11 = vld [vmem:[%s4563_s1 + $0x68] sm:$0xff]  }
  0x17   : > { %2925 = vmatprep.subr.bf16.mxu0 %v3471_v3  ;;  %3444 = vmatprep.subr.bf16.mxu1 %v3471_v3  ;;  %v3476_v8 = vld [vmem:[%s4563_s1 + $0x18] sm:$0xff]   ;;  %v3478_v10 = vld [vmem:[%s4563_s1 + $0x20] sm:$0xff]   ;;  %v3480_v14 = vld [vmem:[%s4563_s1 + $0x28] sm:$0xff]  }
  0x18   : > { %v3487_v12 = vld [vmem:[%s3799_s25 + $0x4] ss:$36 sps:$4 sm:$0xff]   ;;  %v3481_v15 = vld [vmem:[%s4563_s1 + $0x70] sm:$0xff]   ;;  %v3483_v17 = vld [vmem:[%s4563_s1 + $0x78] sm:$0xff]  }
  0x19   : > { %v3490_v13 = vld [vmem:[%s3799_s25 + $0x364] ss:$36 sps:$4 sm:$0xff]   ;;  %1710 = vmatprep.mubr.bf16.mxu0 %v3487_v12  ;;  %v3482_v16 = vld [vmem:[%s4563_s1 + $0x30] sm:$0xff]   ;;  %v3484_v18 = vld [vmem:[%s4563_s1 + $0x38] sm:$0xff]  }
  0x1a   : > { %2926 = vmatpush3.bf16.msra.mxu0 %v3472_v4  ;;  %3452 = vmatpush3.bf16.msra.mxu1 %v3472_v4  ;;  %v3491_v19 = vld [vmem:[%s4563_s1 + $0xc0] sm:$0xff]   ;;  %v3495_v25 = vld [vmem:[%s4563_s1 + $0xc8] sm:$0xff]   ;;  %v3503_v33 = vld [vmem:[%s4563_s1 + $0xd0] sm:$0xff]  }
  0x1b   : > { %2927 = vmatprep.subr.bf16.mxu0 %v3473_v5  ;;  %3445 = vmatprep.subr.bf16.mxu1 %v3473_v5  ;;  %v3485_v20 = vld [vmem:[%s3799_s25] ss:$36 sps:$4 sm:$0xff]   ;;  %v3497_v26 = vld [vmem:[%s3799_s25 + $0x4c] ss:$36 sps:$4 sm:$0xff]   ;;  %v3505_v35 = vld [vmem:[%s4563_s1 + $0xd8] sm:$0xff]  }
  0x1c   : > { %1806 = vmatprep.mubr.bf16.mxu1 %v3490_v13  ;;  %v3488_v21 = vld [vmem:[%s3799_s25 + $0x360] ss:$36 sps:$4 sm:$0xff]   ;;  %v3499_v27 = vld [vmem:[%s3799_s25 + $0x3ac] ss:$36 sps:$4 sm:$0xff]   ;;  %v3509_v36 = vld [vmem:[%s3799_s25 + $0x94] ss:$36 sps:$4 sm:$0xff]  }
  0x1d   : > { %v3492_v22 = vld [vmem:[%s4563_s1 + $0x140] sm:$0xff]   ;;  %v3506_v28 = vld [vmem:[%s4563_s1 + $0x148] sm:$0xff]   ;;  %v3504_v34 = vld [vmem:[%s4563_s1 + $0x90] sm:$0xff]  }
  0x1e   : > { %2928 = vmatpush3.bf16.msra.mxu0 %v3474_v6  ;;  %3453 = vmatpush3.bf16.msra.mxu1 %v3474_v6  ;;  %v3493_v23 = vld [vmem:[%s4563_s1 + $0x80] sm:$0xff]   ;;  %v3496_v29 = vld [vmem:[%s4563_s1 + $0x88] sm:$0xff]   ;;  %v3511_v37 = vld [vmem:[%s3799_s25 + $0x3f4] ss:$36 sps:$4 sm:$0xff]  }
  0x1f   : > { %2929 = vmatprep.subr.bf16.mxu0 %v3475_v7  ;;  %3446 = vmatprep.subr.bf16.mxu1 %v3475_v7  ;;  %v3494_v24 = vld [vmem:[%s4563_s1 + $0x100] sm:$0xff]   ;;  %v3508_v30 = vld [vmem:[%s4563_s1 + $0x108] sm:$0xff]   ;;  %v3507_v38 = vld [vmem:[%s4563_s1 + $0x98] sm:$0xff]  }
  0x20   : > { %v3501_v31 = vld [vmem:[%s3799_s25 + $0x48] ss:$36 sps:$4 sm:$0xff]   ;;  %v3515_v39 = vld [vmem:[%s4563_s1 + $0xe0] sm:$0xff]   ;;  %v3513_v40 = vld [vmem:[%s3799_s25 + $0x90] ss:$36 sps:$4 sm:$0xff]  }
  0x21   : > { %v3502_v32 = vld [vmem:[%s3799_s25 + $0x3a8] ss:$36 sps:$4 sm:$0xff]   ;;  %v3514_v41 = vld [vmem:[%s3799_s25 + $0x3f0] ss:$36 sps:$4 sm:$0xff]   ;;  %v3516_v43 = vld [vmem:[%s4563_s1 + $0xa0] sm:$0xff]  }
  0x22   : > { %2930 = vmatpush3.bf16.msra.mxu0 %v3476_v8  ;;  %3454 = vmatpush3.bf16.msra.mxu1 %v3476_v8  ;;  %v3526_v42 = vld [vmem:[%s4563_s1 + $0x150] sm:$0xff]   ;;  %v3517_v44 = vld [vmem:[%s4563_s1 + $0xe8] sm:$0xff]   ;;  %v3519_v46 = vld [vmem:[%s3799_s25 + $0xdc] ss:$36 sps:$4 sm:$0xff]  }
  0x23   : > { %2931 = vmatprep.subr.bf16.mxu0 %v3477_v9  ;;  %3447 = vmatprep.subr.bf16.mxu1 %v3477_v9  ;;  %v3528_v45 = vld [vmem:[%s4563_s1 + $0x110] sm:$0xff]   ;;  %v3521_v47 = vld [vmem:[%s3799_s25 + $0x43c] ss:$36 sps:$4 sm:$0xff]   ;;  %v3518_v48 = vld [vmem:[%s4563_s1 + $0xa8] sm:$0xff]  }
  0x24   : > { %v3523_v49 = vld [vmem:[%s3799_s25 + $0xd8] ss:$36 sps:$4 sm:$0xff]   ;;  %v3525_v51 = vld [vmem:[%s4563_s1 + $0xf0] sm:$0xff]   ;;  %v3531_v53 = vld [vmem:[%s3799_s25 + $0x124] ss:$36 sps:$4 sm:$0xff]  }
  0x25   : > { %v3524_v50 = vld [vmem:[%s3799_s25 + $0x438] ss:$36 sps:$4 sm:$0xff]   ;;  %v3527_v52 = vld [vmem:[%s4563_s1 + $0xb0] sm:$0xff]   ;;  %v3533_v59 = vld [vmem:[%s3799_s25 + $0x8] ss:$36 sps:$4 sm:$0xff]  }
  0x26   : > { %2932 = vmatpush3.bf16.msra.mxu0 %v3478_v10  ;;  %3455 = vmatpush3.bf16.msra.mxu1 %v3478_v10  ;;  %v3529_v54 = vld [vmem:[%s4563_s1 + $0xf8] sm:$0xff]   ;;  %v3535_v57 = vld [vmem:[%s3799_s25 + $0xc] ss:$36 sps:$4 sm:$0xff]   ;;  %v3536_v60 = vld [vmem:[%s3799_s25 + $0x120] ss:$36 sps:$4 sm:$0xff]  }
  0x27   : > { %2933 = vmatprep.subr.bf16.mxu0 %v3479_v11  ;;  %3448 = vmatprep.subr.bf16.mxu1 %v3479_v11  ;;  %v3539_v55 = vld [vmem:[%s4563_s1 + $0x158] sm:$0xff]   ;;  %v3537_v61 = vld [vmem:[%s4563_s1 + $0x1c0] sm:$0xff]   ;;  %v3541_v63 = vld [vmem:[%s3799_s25 + $0x16c] ss:$36 sps:$4 sm:$0xff]  }
  0x28   : > { %v3540_v56 = vld [vmem:[%s4563_s1 + $0x118] sm:$0xff]   ;;  %v3538_v62 = vld [vmem:[%s4563_s1 + $0x180] sm:$0xff]   ;;  %v3554_v3 = vld [vmem:[%s4563_s1 + $0x1c8] sm:$0xff]  }
  0x29   : > { %v3530_v58 = vld [vmem:[%s4563_s1 + $0xb8] sm:$0xff]   ;;  %v3553_v0 = vld [vmem:[%s4563_s1 + $0x160] sm:$0xff]   ;;  %v3556_v4 = vld [vmem:[%s4563_s1 + $0x188] sm:$0xff]  }
  0x2a   : > { %2934 = vmatpush3.bf16.msra.mxu0 %v3480_v14  ;;  %3456 = vmatpush3.bf16.msra.mxu1 %v3480_v14  ;;  %v3543_v1 = vld [vmem:[%s3799_s25 + $0x54] ss:$36 sps:$4 sm:$0xff]   ;;  %v3555_v2 = vld [vmem:[%s4563_s1 + $0x120] sm:$0xff]   ;;  %v3545_v5 = vld [vmem:[%s3799_s25 + $0x168] ss:$36 sps:$4 sm:$0xff]  }
  0x2b   : > { %2935 = vmatprep.subr.bf16.mxu0 %v3481_v15  ;;  %3449 = vmatprep.subr.bf16.mxu1 %v3481_v15  ;;  %v3563_v6 = vld [vmem:[%s4563_s1 + $0x168] sm:$0xff]   ;;  %v3546_v8 = vld [vmem:[%s3799_s25 + $0x50] ss:$36 sps:$4 sm:$0xff]   ;;  %v3549_v10 = vld [vmem:[%s3799_s25 + $0x9c] ss:$36 sps:$4 sm:$0xff]  }
  0x2c   : > { %v3564_v7 = vld [vmem:[%s4563_s1 + $0x128] sm:$0xff]   ;;  %v3547_v9 = vld [vmem:[%s3799_s25 + $0x1b4] ss:$36 sps:$4 sm:$0xff]   ;;  %v3557_v15 = vld [vmem:[%s3799_s25 + $0x1fc] ss:$36 sps:$4 sm:$0xff]  }
  0x2d   : > { %v3571_v11 = vld [vmem:[%s4563_s1 + $0x1d0] sm:$0xff]   ;;  %v3552_v14 = vld [vmem:[%s3799_s25 + $0x98] ss:$36 sps:$4 sm:$0xff]  }
  0x2e   : > { %2936 = vmatpush3.bf16.msra.mxu0 %v3482_v16  ;;  %3457 = vmatpush3.bf16.msra.mxu1 %v3482_v16  ;;  %v3572_v12 = vld [vmem:[%s4563_s1 + $0x190] sm:$0xff]  }
  0x2f   : > { %2937 = vmatprep.subr.bf16.mxu0 %v3483_v17  ;;  %3450 = vmatprep.subr.bf16.mxu1 %v3483_v17  ;;  %v3551_v13 = vld [vmem:[%s3799_s25 + $0x1b0] ss:$36 sps:$4 sm:$0xff]  }
  0x30   : > { %v3579_v16 = vld [vmem:[%s4563_s1 + $0x170] sm:$0xff]  }
  0x31   : > { %v3580_v17 = vld [vmem:[%s4563_s1 + $0x130] sm:$0xff]  }
  0x32   : > { %2938 = vmatpush3.bf16.msra.mxu0 %v3484_v18  ;;  %3458 = vmatpush3.bf16.msra.mxu1 %v3484_v18  ;;  %v3559_v18 = vld [vmem:[%s3799_s25 + $0xe4] ss:$36 sps:$4 sm:$0xff]  }
  0x33   : > { %3035 = vmatprep.subr.bf16.mxu1 %v3491_v19  ;;  %3147 = vmatprep.subr.bf16.mxu0 %v3492_v22  ;;  %v3587_v19 = vld [vmem:[%s4563_s1 + $0x1d8] sm:$0xff]  }
  0x34   : > { %v3589_v22 = vld [vmem:[%s4563_s1 + $0x178] sm:$0xff]  }
  0x35   : > { %1711 = vmatmul.mubr.bf16.vlgmr.msra.gmra.mrb[0].mxu0 %v3485_v20  ;;  %1807 = vmatmul.mubr.bf16.vlgmr.msra.gmra.mrb[0].mxu1 %v3488_v21  ;;  %v3588_v20 = vld [vmem:[%s4563_s1 + $0x198] sm:$0xff]  }
  0x36   : > { %3036 = vmatpush3.bf16.msra.mxu1 %v3493_v23  ;;  %3148 = vmatpush3.bf16.msra.mxu0 %v3494_v24  ;;  %v3561_v21 = vld [vmem:[%s3799_s25 + $0x1f8] ss:$36 sps:$4 sm:$0xff]   ;;  %v3562_v24 = vld [vmem:[%s3799_s25 + $0xe0] ss:$36 sps:$4 sm:$0xff]  }
  0x37   : > { %3037 = vmatprep.subr.bf16.mxu1 %v3495_v25  ;;  %1718 = vmatprep.mubr.bf16.mxu0 %v3497_v26  ;;  %v3590_v23 = vld [vmem:[%s4563_s1 + $0x138] sm:$0xff]   ;;  %v3565_v25 = vld [vmem:[%s3799_s25 + $0x244] ss:$36 sps:$4 sm:$0xff]   ;;  %v3567_v26 = vld [vmem:[%s3799_s25 + $0x12c] ss:$36 sps:$4 sm:$0xff]  }
  0x38   : > { %1814 = vmatprep.mubr.bf16.mxu1 %v3499_v27  ;;  %3149 = vmatprep.subr.bf16.mxu0 %v3506_v28  ;;  %v3603_v27 = vld [vmem:[%s4563_s1 + $0x1e0] sm:$0xff]  }
  0x39   : > { %v3569_v28 = vld [vmem:[%s3799_s25 + $0x240] ss:$36 sps:$4 sm:$0xff]  }
  0x3a   : > { %3038 = vmatpush3.bf16.msra.mxu1 %v3496_v29  ;;  %3150 = vmatpush3.bf16.msra.mxu0 %v3508_v30  ;;  %v3604_v29 = vld [vmem:[%s4563_s1 + $0x200] sm:$0xff]  }
  0x3b   : > { %3039 = vmatprep.subr.bf16.mxu1 %v3503_v33  ;;  %3151 = vmatprep.subr.bf16.mxu0 %v3526_v42  ;;  %v3605_v30 = vld [vmem:[%s4563_s1 + $0x1a0] sm:$0xff]   ;;  %v3575_v33 = vld [vmem:[%s3799_s25 + $0x174] ss:$36 sps:$4 sm:$0xff]  }
  0x3c   : > { %v3633_v42 = vld [vmem:[%s4563_s1 + $0x1f0] sm:$0xff]  }
  0x3d   : > { %1719 = vmatmul.mubr.bf16.gmra.mrb[4].mxu0 %v3501_v31  ;;  %1815 = vmatmul.mubr.bf16.gmra.mrb[4].mxu1 %v3502_v32  ;;  %v3570_v31 = vld [vmem:[%s3799_s25 + $0x128] ss:$36 sps:$4 sm:$0xff]  }
  0x3e   : > { %3040 = vmatpush3.bf16.msra.mxu1 %v3504_v34  ;;  %1726 = vmatprep.mubr.bf16.mxu0 %v3509_v36  ;;  %v3573_v32 = vld [vmem:[%s3799_s25 + $0x28c] ss:$36 sps:$4 sm:$0xff]  }
  0x3f   : > { %3041 = vmatprep.subr.bf16.mxu1 %v3505_v35  ;;  %1822 = vmatprep.mubr.bf16.mxu1 %v3511_v37  ;;  %v3618_v34 = vld [vmem:[%s4563_s1 + $0x1e8] sm:$0xff]   ;;  %v3578_v36 = vld [vmem:[%s3799_s25 + $0x170] ss:$36 sps:$4 sm:$0xff]  }
  0x40   : > { %3152 = vmatpush3.bf16.msra.mxu0 %v3528_v45  ;;  %v3577_v35 = vld [vmem:[%s3799_s25 + $0x288] ss:$36 sps:$4 sm:$0xff]  }
  0x41   : > { %3153 = vmatprep.subr.bf16.mxu0 %v3539_v55  ;;  %v3620_v37 = vld [vmem:[%s4563_s1 + $0x1a8] sm:$0xff]   ;;  %v3608_v55 = vld [vmem:[%s3799_s25 + $0x5c] ss:$36 sps:$4 sm:$0xff]  }
  0x42   : > { %3042 = vmatpush3.bf16.msra.mxu1 %v3507_v38  ;;  %v3581_v38 = vld [vmem:[%s3799_s25 + $0x2d4] ss:$36 sps:$4 sm:$0xff]   ;;  %v3593_v45 = vld [vmem:[%s3799_s25 + $0x204] ss:$36 sps:$4 sm:$0xff]  }
  0x43   : > { %3043 = vmatprep.subr.bf16.mxu1 %v3515_v39  ;;  %v3583_v39 = vld [vmem:[%s3799_s25 + $0x1bc] ss:$36 sps:$4 sm:$0xff]  }
  0x44   : > { %3154 = vmatpush3.bf16.msra.mxu0 %v3540_v56  ;;  %v3619_v56 = vld [vmem:[%s4563_s1 + $0x208] sm:$0xff]  }
  0x45   : > { %1727 = vmatmul.mubr.bf16.gmra.mrb[8].mxu0 %v3513_v40  ;;  %1823 = vmatmul.mubr.bf16.gmra.mrb[8].mxu1 %v3514_v41  ;;  %v3585_v40 = vld [vmem:[%s3799_s25 + $0x2d0] ss:$36 sps:$4 sm:$0xff]   ;;  %v3586_v41 = vld [vmem:[%s3799_s25 + $0x1b8] ss:$36 sps:$4 sm:$0xff]  }
  0x46   : > { %3044 = vmatpush3.bf16.msra.mxu1 %v3516_v43  ;;  %1734 = vmatprep.mubr.bf16.mxu0 %v3519_v46  ;;  %v3591_v43 = vld [vmem:[%s3799_s25 + $0x31c] ss:$36 sps:$4 sm:$0xff]  }
  0x47   : > { %3045 = vmatprep.subr.bf16.mxu1 %v3517_v44  ;;  %1830 = vmatprep.mubr.bf16.mxu1 %v3521_v47  ;;  %v3635_v44 = vld [vmem:[%s4563_s1 + $0x1b0] sm:$0xff]   ;;  %v3595_v46 = vld [vmem:[%s3799_s25 + $0x318] ss:$36 sps:$4 sm:$0xff]   ;;  %v3596_v47 = vld [vmem:[%s3799_s25 + $0x200] ss:$36 sps:$4 sm:$0xff]  }
  0x48   : > { %3155 = vmatprep.subr.bf16.mxu0 %v3553_v0  ;;  %v3616_v0 = vld [vmem:[%s3799_s25 + $0x2d8] ss:$36 sps:$4 sm:$0xff]  }
  0x49   : > { %3156 = vmatpush3.bf16.msra.mxu0 %v3555_v2  ;;  %v3621_v2 = vld [vmem:[%s3799_s25 + $0x324] ss:$36 sps:$4 sm:$0xff]  }
  0x4a   : > { %3046 = vmatpush3.bf16.msra.mxu1 %v3518_v48  ;;  %3157 = vmatprep.subr.bf16.mxu0 %v3563_v6  ;;  %v3648_v48 = vld [vmem:[%s4563_s1 + $0x1f8] sm:$0xff]   ;;  %v3626_v6 = vld [vmem:[%s3799_s25 + $0xe8] ss:$36 sps:$4 sm:$0xff]  }
  0x4b   : > { %3047 = vmatprep.subr.bf16.mxu1 %v3525_v51  ;;  %v3601_v51 = vld [vmem:[%s3799_s25 + $0x14] ss:$36 sps:$4 sm:$0xff]  }
  0x4d   : > { %1735 = vmatmul.mubr.bf16.gmra.mrb[12].mxu0 %v3523_v49  ;;  %1831 = vmatmul.mubr.bf16.gmra.mrb[12].mxu1 %v3524_v50  ;;  %v3597_v49 = vld [vmem:[%s3799_s25 + $0x24c] ss:$36 sps:$4 sm:$0xff]   ;;  %v3650_v50 = vld [vmem:[%s4563_s1 + $0x1b8] sm:$0xff]  }
  0x4e   : > { %3048 = vmatpush3.bf16.msra.mxu1 %v3527_v52  ;;  %1742 = vmatprep.mubr.bf16.mxu0 %v3531_v53  ;;  %v3599_v52 = vld [vmem:[%s3799_s25 + $0x10] ss:$36 sps:$4 sm:$0xff]   ;;  %v3602_v53 = vld [vmem:[%s3799_s25 + $0x248] ss:$36 sps:$4 sm:$0xff]  }
  0x4f   : > { %3049 = vmatprep.subr.bf16.mxu1 %v3529_v54  ;;  %1871 = vmatprep.mubr.bf16.mxu1 %v3535_v57  ;;  %v3606_v54 = vld [vmem:[%s3799_s25 + $0x294] ss:$36 sps:$4 sm:$0xff]  }
  0x50   : > { %3158 = vmatpush3.bf16.msra.mxu0 %v3564_v7  ;;  %v3634_v57 = vld [vmem:[%s4563_s1 + $0x210] sm:$0xff]  }
  0x51   : > { %3159 = vmatprep.subr.bf16.mxu0 %v3579_v16  ;;  %v3689_v7 = vld [vmem:[%s4563_s1 + $0x230] sm:$0xff]   ;;  %v3641_v16 = vld [vmem:[%s3799_s25 + $0x178] ss:$36 sps:$4 sm:$0xff]  }
  0x52   : > { %3050 = vmatpush3.bf16.msra.mxu1 %v3530_v58  ;;  %v3610_v58 = vld [vmem:[%s3799_s25 + $0x290] ss:$36 sps:$4 sm:$0xff]  }
  0x53   : > { %3259 = vmatprep.subr.bf16.mxu1 %v3537_v61  ;;  %v3614_v61 = vld [vmem:[%s3799_s25 + $0xa4] ss:$36 sps:$4 sm:$0xff]  }
  0x54   : > { %3160 = vmatpush3.bf16.msra.mxu0 %v3580_v17  ;;  %v3642_v17 = vld [vmem:[%s3799_s25 + $0x3fc] ss:$36 sps:$4 sm:$0xff]  }
  0x55   : > { %1743 = vmatmul.mubr.bf16.gmra.mrb[16].mxu0 %v3536_v60  ;;  %1872 = vmatmul.mubr.bf16.vlgmr.msra.gmra.mrb[16].mxu1 %v3533_v59  ;;  %v3611_v59 = vld [vmem:[%s3799_s25 + $0x58] ss:$36 sps:$4 sm:$0xff]  }
  0x56   : > { %3260 = vmatpush3.bf16.msra.mxu1 %v3538_v62  ;;  %1750 = vmatprep.mubr.bf16.mxu0 %v3541_v63  ;;  %v3612_v60 = vld [vmem:[%s3799_s25 + $0x2dc] ss:$36 sps:$4 sm:$0xff]  }
  0x57   : > { %1879 = vmatprep.mubr.bf16.mxu1 %v3543_v1  ;;  %3261 = vmatprep.subr.bf16.mxu1 %v3554_v3  ;;  %v3649_v62 = vld [vmem:[%s4563_s1 + $0x218] sm:$0xff]   ;;  %v3663_v63 = vld [vmem:[%s4563_s1 + $0x220] sm:$0xff]   ;;  %v3623_v3 = vld [vmem:[%s3799_s25 + $0xec] ss:$36 sps:$4 sm:$0xff]  }
  0x58   : > { %3161 = vmatprep.subr.bf16.mxu0 %v3589_v22  ;;  %v3617_v1 = vld [vmem:[%s3799_s25 + $0xa0] ss:$36 sps:$4 sm:$0xff]   ;;  %v3653_v22 = vld [vmem:[%s3799_s25 + $0x20c] ss:$36 sps:$4 sm:$0xff]  }
  0x59   : > { %3162 = vmatpush3.bf16.msra.mxu0 %v3590_v23  ;;  %v3655_v23 = vld [vmem:[%s3799_s25 + $0x440] ss:$36 sps:$4 sm:$0xff]  }
  0x5a   : > { %3262 = vmatpush3.bf16.msra.mxu1 %v3556_v4  ;;  %3395 = vmatprep.subr.bf16.mxu0 %v3604_v29  ;;  %v3676_v4 = vld [vmem:[%s4563_s1 + $0x228] sm:$0xff]  }
  0x5b   : > { %3263 = vmatprep.subr.bf16.mxu1 %v3571_v11  ;;  %v3631_v11 = vld [vmem:[%s3799_s25 + $0x368] ss:$36 sps:$4 sm:$0xff]  }
  0x5d   : > { %1751 = vmatmul.mubr.bf16.gmra.mrb[20].mxu0 %v3545_v5  ;;  %1880 = vmatmul.mubr.bf16.gmra.mrb[20].mxu1 %v3546_v8  ;;  %v3625_v5 = vld [vmem:[%s3799_s25 + $0x320] ss:$36 sps:$4 sm:$0xff]   ;;  %v3627_v8 = vld [vmem:[%s3799_s25 + $0x36c] ss:$36 sps:$4 sm:$0xff]  }
  0x5e   : > { %1758 = vmatprep.mubr.bf16.mxu0 %v3547_v9  ;;  %1887 = vmatprep.mubr.bf16.mxu1 %v3549_v10  ;;  %v3629_v9 = vld [vmem:[%s3799_s25 + $0x134] ss:$36 sps:$4 sm:$0xff]  }
  0x5f   : > { %3264 = vmatpush3.bf16.msra.mxu1 %v3572_v12  ;;  %v3702_v10 = vld [vmem:[%s4563_s1 + $0x238] sm:$0xff]   ;;  %v3632_v12 = vld [vmem:[%s3799_s25 + $0x130] ss:$36 sps:$4 sm:$0xff]  }
  0x60   : > { %3265 = vmatprep.subr.bf16.mxu1 %v3587_v19  ;;  %v3646_v19 = vld [vmem:[%s3799_s25 + $0x3f8] ss:$36 sps:$4 sm:$0xff]  }
  0x63   : > { %3266 = vmatpush3.bf16.msra.mxu1 %v3588_v20  ;;  %v3647_v20 = vld [vmem:[%s3799_s25 + $0x1c0] ss:$36 sps:$4 sm:$0xff]  }
  0x64   : > { %3267 = vmatprep.subr.bf16.mxu1 %v3603_v27  ;;  %v3659_v27 = vld [vmem:[%s3799_s25 + $0x18] ss:$36 sps:$4 sm:$0xff]  }
  0x65   : > { %1759 = vmatmul.mubr.bf16.gmra.mrb[24].mxu0 %v3551_v13  ;;  %1888 = vmatmul.mubr.bf16.gmra.mrb[24].mxu1 %v3552_v14  ;;  %v3636_v13 = vld [vmem:[%s3799_s25 + $0x3b4] ss:$36 sps:$4 sm:$0xff]   ;;  %v3638_v14 = vld [vmem:[%s3799_s25 + $0x17c] ss:$36 sps:$4 sm:$0xff]  }
  0x66   : > { %1766 = vmatprep.mubr.bf16.mxu0 %v3557_v15  ;;  %1895 = vmatprep.mubr.bf16.mxu1 %v3559_v18  ;;  %v3640_v15 = vld [vmem:[%s3799_s25 + $0x3b0] ss:$36 sps:$4 sm:$0xff]   ;;  %v3644_v18 = vld [vmem:[%s3799_s25 + $0x1c4] ss:$36 sps:$4 sm:$0xff]  }
  0x67   : > { %3268 = vmatpush3.bf16.msra.mxu1 %v3605_v30  ;;  %v3666_v30 = vld [vmem:[%s3799_s25 + $0x64] ss:$36 sps:$4 sm:$0xff]  }
  0x68   : > { %3269 = vmatprep.subr.bf16.mxu1 %v3618_v34  ;;  %v3672_v34 = vld [vmem:[%s3799_s25 + $0xac] ss:$36 sps:$4 sm:$0xff]  }
  0x6b   : > { %3270 = vmatpush3.bf16.msra.mxu1 %v3620_v37  ;;  %v3677_v37 = vld [vmem:[%s3799_s25 + $0x32c] ss:$36 sps:$4 sm:$0xff]  }
  0x6c   : > { %3271 = vmatprep.subr.bf16.mxu1 %v3633_v42  ;;  %v3685_v42 = vld [vmem:[%s3799_s25 + $0x13c] ss:$36 sps:$4 sm:$0xff]  }
  0x6d   : > { %1767 = vmatmul.mubr.bf16.gmra.mrb[28].mxu0 %v3561_v21  ;;  %1896 = vmatmul.mubr.bf16.gmra.mrb[28].mxu1 %v3562_v24  ;;  %v3651_v21 = vld [vmem:[%s3799_s25 + $0x444] ss:$36 sps:$4 sm:$0xff]  }
  0x6e   : > { %1774 = vmatprep.mubr.bf16.mxu0 %v3565_v25  ;;  %1903 = vmatprep.mubr.bf16.mxu1 %v3567_v26  ;;  %v3656_v24 = vld [vmem:[%s3799_s25 + $0x208] ss:$36 sps:$4 sm:$0xff]   ;;  %v3657_v25 = vld [vmem:[%s3799_s25 + $0x254] ss:$36 sps:$4 sm:$0xff]   ;;  %v3661_v26 = vld [vmem:[%s3799_s25 + $0x1c] ss:$36 sps:$4 sm:$0xff]  }
  0x6f   : > { %3272 = vmatpush3.bf16.msra.mxu1 %v3635_v44  ;;  %v3688_v44 = vld [vmem:[%s3799_s25 + $0x138] ss:$36 sps:$4 sm:$0xff]  }
  0x70   : > { %3273 = vmatprep.subr.bf16.mxu1 %v3648_v48  ;;  %v3695_v48 = vld [vmem:[%s3799_s25 + $0x180] ss:$36 sps:$4 sm:$0xff]  }
  0x73   : > { %3274 = vmatpush3.bf16.msra.mxu1 %v3650_v50  ;;  %v3698_v50 = vld [vmem:[%s3799_s25 + $0x1cc] ss:$36 sps:$4 sm:$0xff]  }
  0x75   : > { %1775 = vmatmul.mubr.bf16.gmra.mrb[32].mxu0 %v3569_v28  ;;  %1904 = vmatmul.mubr.bf16.gmra.mrb[32].mxu1 %v3570_v31  ;;  %v3662_v28 = vld [vmem:[%s3799_s25 + $0x250] ss:$36 sps:$4 sm:$0xff]   ;;  %v3668_v31 = vld [vmem:[%s3799_s25 + $0x298] ss:$36 sps:$4 sm:$0xff]  }
  0x76   : > { %1782 = vmatprep.mubr.bf16.mxu0 %v3573_v32  ;;  %1911 = vmatprep.mubr.bf16.mxu1 %v3575_v33  ;;  %v3669_v32 = vld [vmem:[%s3799_s25 + $0x60] ss:$36 sps:$4 sm:$0xff]  }
  0x77   : > { %v3670_v33 = vld [vmem:[%s3799_s25 + $0x2e4] ss:$36 sps:$4 sm:$0xff]  }
  0x7d   : > { %1783 = vmatmul.mubr.bf16.gmra.mrb[36].mxu0 %v3577_v35  ;;  %1912 = vmatmul.mubr.bf16.gmra.mrb[36].mxu1 %v3578_v36  ;;  %v3674_v35 = vld [vmem:[%s3799_s25 + $0x2e0] ss:$36 sps:$4 sm:$0xff]   ;;  %v3675_v36 = vld [vmem:[%s3799_s25 + $0xa8] ss:$36 sps:$4 sm:$0xff]  }
  0x7e   : > { %1790 = vmatprep.mubr.bf16.mxu0 %v3581_v38  ;;  %1919 = vmatprep.mubr.bf16.mxu1 %v3583_v39  ;;  %v3679_v38 = vld [vmem:[%s3799_s25 + $0xf4] ss:$36 sps:$4 sm:$0xff]   ;;  %v3681_v39 = vld [vmem:[%s3799_s25 + $0x328] ss:$36 sps:$4 sm:$0xff]  }
  0x85   : > { %1791 = vmatmul.mubr.bf16.gmra.mrb[40].mxu0 %v3585_v40  ;;  %1920 = vmatmul.mubr.bf16.gmra.mrb[40].mxu1 %v3586_v41  ;;  %v3682_v40 = vld [vmem:[%s3799_s25 + $0xf0] ss:$36 sps:$4 sm:$0xff]  }
  0x86   : > { %1798 = vmatprep.mubr.bf16.mxu0 %v3591_v43  ;;  %1927 = vmatprep.mubr.bf16.mxu1 %v3593_v45  ;;  %v3683_v41 = vld [vmem:[%s3799_s25 + $0x374] ss:$36 sps:$4 sm:$0xff]   ;;  %v3690_v45 = vld [vmem:[%s3799_s25 + $0x3bc] ss:$36 sps:$4 sm:$0xff]  }
  0x87   : > { %v3687_v43 = vld [vmem:[%s3799_s25 + $0x370] ss:$36 sps:$4 sm:$0xff]  }
  0x8d   : > { %1799 = vmatmul.mubr.bf16.gmra.mrb[44].mxu0 %v3595_v46  ;;  %1928 = vmatmul.mubr.bf16.gmra.mrb[44].mxu1 %v3596_v47  ;;  %v3692_v46 = vld [vmem:[%s3799_s25 + $0x184] ss:$36 sps:$4 sm:$0xff]   ;;  %v3694_v47 = vld [vmem:[%s3799_s25 + $0x3b8] ss:$36 sps:$4 sm:$0xff]  }
  0x8e   : > { %1935 = vmatprep.mubr.bf16.mxu1 %v3597_v49  ;;  %2032 = vmatprep.mubr.bf16.mxu0 %v3601_v51  ;;  %v3696_v49 = vld [vmem:[%s3799_s25 + $0x404] ss:$36 sps:$4 sm:$0xff]  }
  0x8f   : > { %v3700_v51 = vld [vmem:[%s3799_s25 + $0x400] ss:$36 sps:$4 sm:$0xff]  }
  0x95   : > { %1936 = vmatmul.mubr.bf16.gmra.mrb[48].mxu1 %v3602_v53  ;;  %2033 = vmatmul.mubr.bf16.vlgmr.msra.gmra.mrb[48].mxu0 %v3599_v52  ;;  %v3701_v52 = vld [vmem:[%s3799_s25 + $0x1c8] ss:$36 sps:$4 sm:$0xff]  }
  0x96   : > { %3396 = vmatpush3.bf16.msra.mxu0 %v3604_v29  ;;  %1943 = vmatprep.mubr.bf16.mxu1 %v3606_v54  ;;  %v3664_v29 = vld [vmem:[%s3799_s25 + $0x29c] ss:$36 sps:$4 sm:$0xff]   ;;  %v3703_v53 = vld [vmem:[%s3799_s25 + $0x44c] ss:$36 sps:$4 sm:$0xff]   ;;  %v3705_v54 = vld [vmem:[%s3799_s25 + $0x214] ss:$36 sps:$4 sm:$0xff]  }
  0x97   : > { %2040 = vmatprep.mubr.bf16.mxu0 %v3608_v55  ;;  %3397 = vmatprep.subr.bf16.mxu0 %v3619_v56 }
  0x9a   : > { %3398 = vmatpush3.bf16.msra.mxu0 %v3619_v56 }
  0x9b   : > { %3399 = vmatprep.subr.bf16.mxu0 %v3634_v57 }
  0x9d   : > { %1944 = vmatmul.mubr.bf16.gmra.mrb[52].mxu1 %v3610_v58  ;;  %2041 = vmatmul.mubr.bf16.gmra.mrb[52].mxu0 %v3611_v59  ;;  %v3707_v59 = vld [vmem:[%s3799_s25 + $0x448] ss:$36 sps:$4 sm:$0xff]  }
  0x9e   : > { %1951 = vmatprep.mubr.bf16.mxu1 %v3612_v60  ;;  %2048 = vmatprep.mubr.bf16.mxu0 %v3614_v61  ;;  %v3708_v60 = vld [vmem:[%s3799_s25 + $0x210] ss:$36 sps:$4 sm:$0xff]  }
  0x9f   : > { %3400 = vmatpush3.bf16.msra.mxu0 %v3634_v57 }
  0xa0   : > { %3401 = vmatprep.subr.bf16.mxu0 %v3649_v62 }
  0xa3   : > { %3402 = vmatpush3.bf16.msra.mxu0 %v3649_v62 }
  0xa4   : > { %3403 = vmatprep.subr.bf16.mxu0 %v3663_v63 }
  0xa5   : > { %1952 = vmatmul.mubr.bf16.gmra.mrb[56].mxu1 %v3616_v0  ;;  %2049 = vmatmul.mubr.bf16.gmra.mrb[56].mxu0 %v3617_v1  ;;  %v3709_v1 = vld [vmem:[%s3799_s25 + $0x25c] ss:$36 sps:$4 sm:$0xff]  }
  0xa6   : > { %1959 = vmatprep.mubr.bf16.mxu1 %v3621_v2  ;;  %2056 = vmatprep.mubr.bf16.mxu0 %v3623_v3  ;;  %v3711_v2 = vld [vmem:[%s3799_s25 + $0x20] ss:$36 sps:$4 sm:$0xff]  }
  0xa7   : > { %3404 = vmatpush3.bf16.msra.mxu0 %v3663_v63 }
  0xa8   : > { %3405 = vmatprep.subr.bf16.mxu0 %v3676_v4 }
  0xab   : > { %3406 = vmatpush3.bf16.msra.mxu0 %v3676_v4 }
  0xac   : > { %3407 = vmatprep.subr.bf16.mxu0 %v3689_v7 }
  0xad   : > { %1960 = vmatmul.mubr.bf16.gmra.mrb[60].mxu1 %v3625_v5  ;;  %2057 = vmatmul.mubr.bf16.gmra.mrb[60].mxu0 %v3626_v6 }
  0xae   : > { %1967 = vmatprep.mubr.bf16.mxu1 %v3627_v8  ;;  %2064 = vmatprep.mubr.bf16.mxu0 %v3629_v9 }
  0xaf   : > { %3408 = vmatpush3.bf16.msra.mxu0 %v3689_v7 }
  0xb0   : > { %3409 = vmatprep.subr.bf16.mxu0 %v3702_v10 }
  0xb3   : > { %3410 = vmatpush3.bf16.msra.mxu0 %v3702_v10 }
  0xb5   : > { %1968 = vmatmul.mubr.bf16.gmra.mrb[64].mxu1 %v3631_v11  ;;  %2065 = vmatmul.mubr.bf16.gmra.mrb[64].mxu0 %v3632_v12  ;;  %v3712_v11 = vld [vmem:[%s3799_s25 + $0x258] ss:$36 sps:$4 sm:$0xff]   ;;  %v3713_v12 = vld [vmem:[%s3799_s25 + $0x68] ss:$36 sps:$4 sm:$0xff]  }
  0xb6   : > { %1975 = vmatprep.mubr.bf16.mxu1 %v3636_v13  ;;  %2072 = vmatprep.mubr.bf16.mxu0 %v3638_v14 }
  0xbd   : > { %1976 = vmatmul.mubr.bf16.gmra.mrb[68].mxu1 %v3640_v15  ;;  %2073 = vmatmul.mubr.bf16.gmra.mrb[68].mxu0 %v3641_v16 }
  0xbe   : > { %1983 = vmatprep.mubr.bf16.mxu1 %v3642_v17  ;;  %2080 = vmatprep.mubr.bf16.mxu0 %v3644_v18  ;;  %v3714_v17 = vld [vmem:[%s3799_s25 + $0x2a4] ss:$36 sps:$4 sm:$0xff]   ;;  %v3716_v18 = vld [vmem:[%s3799_s25 + $0xb0] ss:$36 sps:$4 sm:$0xff]  }
  0xc5   : > { %1984 = vmatmul.mubr.bf16.gmra.mrb[72].mxu1 %v3646_v19  ;;  %2081 = vmatmul.mubr.bf16.gmra.mrb[72].mxu0 %v3647_v20 }
  0xc6   : > { %1991 = vmatprep.mubr.bf16.mxu1 %v3651_v21  ;;  %2088 = vmatprep.mubr.bf16.mxu0 %v3653_v22 }
  0xcd   : > { %1992 = vmatmul.mubr.bf16.gmra.mrb[76].mxu1 %v3655_v23  ;;  %2089 = vmatmul.mubr.bf16.gmra.mrb[76].mxu0 %v3656_v24 }
  0xce   : > { %2096 = vmatprep.mubr.bf16.mxu0 %v3657_v25  ;;  %2193 = vmatprep.mubr.bf16.mxu1 %v3661_v26 }
  0xd5   : > { %2097 = vmatmul.mubr.bf16.gmra.mrb[80].mxu0 %v3662_v28  ;;  %2194 = vmatmul.mubr.bf16.vlgmr.msra.gmra.mrb[80].mxu1 %v3659_v27  ;;  %v3717_v27 = vld [vmem:[%s3799_s25 + $0x2a0] ss:$36 sps:$4 sm:$0xff]   ;;  %v3718_v28 = vld [vmem:[%s3799_s25 + $0xf8] ss:$36 sps:$4 sm:$0xff]  }
  0xd6   : > { %2104 = vmatprep.mubr.bf16.mxu0 %v3664_v29  ;;  %2201 = vmatprep.mubr.bf16.mxu1 %v3666_v30 }
  0xdd   : > { %2105 = vmatmul.mubr.bf16.gmra.mrb[84].mxu0 %v3668_v31  ;;  %2202 = vmatmul.mubr.bf16.gmra.mrb[84].mxu1 %v3669_v32 }
  0xde   : > { %2112 = vmatprep.mubr.bf16.mxu0 %v3670_v33  ;;  %2209 = vmatprep.mubr.bf16.mxu1 %v3672_v34  ;;  %v3719_v33 = vld [vmem:[%s3799_s25 + $0x2ec] ss:$36 sps:$4 sm:$0xff]   ;;  %v3721_v34 = vld [vmem:[%s3799_s25 + $0x140] ss:$36 sps:$4 sm:$0xff]  }
  0xe5   : > { %2113 = vmatmul.mubr.bf16.gmra.mrb[88].mxu0 %v3674_v35  ;;  %2210 = vmatmul.mubr.bf16.gmra.mrb[88].mxu1 %v3675_v36 }
  0xe6   : > { %2120 = vmatprep.mubr.bf16.mxu0 %v3677_v37  ;;  %2217 = vmatprep.mubr.bf16.mxu1 %v3679_v38 }
  0xed   : > { %2121 = vmatmul.mubr.bf16.gmra.mrb[92].mxu0 %v3681_v39  ;;  %2218 = vmatmul.mubr.bf16.gmra.mrb[92].mxu1 %v3682_v40 }
  0xee   : > { %2128 = vmatprep.mubr.bf16.mxu0 %v3683_v41  ;;  %2225 = vmatprep.mubr.bf16.mxu1 %v3685_v42 }
  0xf5   : > { %2129 = vmatmul.mubr.bf16.gmra.mrb[96].mxu0 %v3687_v43  ;;  %2226 = vmatmul.mubr.bf16.gmra.mrb[96].mxu1 %v3688_v44  ;;  %v3722_v43 = vld [vmem:[%s3799_s25 + $0x2e8] ss:$36 sps:$4 sm:$0xff]  }
  0xf6   : > { %2136 = vmatprep.mubr.bf16.mxu0 %v3690_v45  ;;  %2233 = vmatprep.mubr.bf16.mxu1 %v3692_v46  ;;  %v3723_v44 = vld [vmem:[%s3799_s25 + $0x188] ss:$36 sps:$4 sm:$0xff]  }
  0xfd   : > { %2137 = vmatmul.mubr.bf16.gmra.mrb[100].mxu0 %v3694_v47  ;;  %2234 = vmatmul.mubr.bf16.gmra.mrb[100].mxu1 %v3695_v48 }
  0xfe   : > { %2144 = vmatprep.mubr.bf16.mxu0 %v3696_v49  ;;  %2241 = vmatprep.mubr.bf16.mxu1 %v3698_v50  ;;  %v3724_v49 = vld [vmem:[%s3799_s25 + $0x334] ss:$36 sps:$4 sm:$0xff]  }
  0xff   : > { %v3726_v50 = vld [vmem:[%s3799_s25 + $0x1d0] ss:$36 sps:$4 sm:$0xff]  }
 0x105   : > { %2145 = vmatmul.mubr.bf16.gmra.mrb[104].mxu0 %v3700_v51  ;;  %2242 = vmatmul.mubr.bf16.gmra.mrb[104].mxu1 %v3701_v52 }
 0x106   : > { %2152 = vmatprep.mubr.bf16.mxu0 %v3703_v53  ;;  %2249 = vmatprep.mubr.bf16.mxu1 %v3705_v54 }
 0x108   : > { %v2939_v55 = vpop.f32.mrb[0].mxu0  ;;  %v3011_v56 = vpop.f32.mrb[0].mxu1 }
 0x109   : > { %v2940_v57 = vpop.f32.mrb[1].mxu0  ;;  %v3012_v58 = vpop.f32.mrb[1].mxu1 }
 0x10a   : > { %v4135_v61 = vadd.f32 %v2940_v57, %v2939_v55  ;;  %v4137_v62 = vadd.f32 %v3012_v58, %v3011_v56  ;;  %v2942_v63 = vpop.f32.mrb[2].mxu0  ;;  %v3014_v0 = vpop.f32.mrb[2].mxu1 }
 0x10b   : > { %v2943_v3 = vpop.f32.mrb[3].mxu0  ;;  %v3015_v4 = vpop.f32.mrb[3].mxu1 }
 0x10c   : > { %v4141_v5 = vadd.f32 %v2943_v3, %v2942_v63  ;;  %v4143_v6 = vadd.f32 %v3015_v4, %v3014_v0  ;;  %v3729_v3 = vld [vmem:[%s3799_s25 + $0x37c] ss:$36 sps:$4 sm:$0xff]  }
 0x10d   : > { %2153 = vmatmul.mubr.bf16.gmra.mrb[108].mxu0 %v3707_v59  ;;  %2250 = vmatmul.mubr.bf16.gmra.mrb[108].mxu1 %v3708_v60  ;;  %v3727_v59 = vld [vmem:[%s3799_s25 + $0x330] ss:$36 sps:$4 sm:$0xff]   ;;  %v3728_v60 = vld [vmem:[%s3799_s25 + $0x218] ss:$36 sps:$4 sm:$0xff]   ;;  %v3731_v4 = vld [vmem:[%s3799_s25 + $0x260] ss:$36 sps:$4 sm:$0xff]  }
 0x10e   : > { %2257 = vmatprep.mubr.bf16.mxu1 %v3709_v1  ;;  %3411 = vmatprep.mubr.bf16.mxu0 %v3711_v2 }
 0x110   : > { %v2945_v7 = vpop.f32.mrb[4].mxu0  ;;  %v3017_v8 = vpop.f32.mrb[4].mxu1 }
 0x111   : > { %v2946_v9 = vpop.f32.mrb[5].mxu0  ;;  %v3018_v10 = vpop.f32.mrb[5].mxu1 }
 0x112   : > { %v4147_v13 = vadd.f32 %v2946_v9, %v2945_v7  ;;  %v4149_v14 = vadd.f32 %v3018_v10, %v3017_v8  ;;  %v2948_v15 = vpop.f32.mrb[6].mxu0  ;;  %v3020_v16 = vpop.f32.mrb[6].mxu1 }
 0x113   : > { %v2949_v19 = vpop.f32.mrb[7].mxu0  ;;  %v3021_v20 = vpop.f32.mrb[7].mxu1 }
 0x114   : > { %v4153_v21 = vadd.f32 %v2949_v19, %v2948_v15  ;;  %v4155_v22 = vadd.f32 %v3021_v20, %v3020_v16  ;;  %v3732_v19 = vld [vmem:[%s3799_s25 + $0x378] ss:$36 sps:$4 sm:$0xff]   ;;  %v3733_v20 = vld [vmem:[%s3799_s25 + $0x2a8] ss:$36 sps:$4 sm:$0xff]  }
 0x115   : > { %2258 = vmatmul.mubr.bf16.gmra.mrb[112].mxu1 %v3712_v11  ;;  %3412 = vmatmul.mubr.bf16.vlgmr.msra.gmra.mrb[112].mxu0 %v3713_v12 }
 0x116   : > { %2265 = vmatprep.mubr.bf16.mxu1 %v3714_v17  ;;  %3415 = vmatprep.mubr.bf16.mxu0 %v3716_v18 }
 0x118   : > { %v2951_v23 = vpop.f32.mrb[8].mxu0  ;;  %v3023_v24 = vpop.f32.mrb[8].mxu1 }
 0x119   : > { %v2952_v25 = vpop.f32.mrb[9].mxu0  ;;  %v3024_v26 = vpop.f32.mrb[9].mxu1 }
 0x11a   : > { %v4159_v29 = vadd.f32 %v2952_v25, %v2951_v23  ;;  %v4161_v30 = vadd.f32 %v3024_v26, %v3023_v24  ;;  %v2954_v31 = vpop.f32.mrb[10].mxu0  ;;  %v3026_v32 = vpop.f32.mrb[10].mxu1  ;;  %v3734_v26 = vld [vmem:[%s3799_s25 + $0x3c4] ss:$36 sps:$4 sm:$0xff]  }
 0x11b   : > { %v2955_v35 = vpop.f32.mrb[11].mxu0  ;;  %v3027_v36 = vpop.f32.mrb[11].mxu1 }
 0x11c   : > { %v4165_v37 = vadd.f32 %v2955_v35, %v2954_v31  ;;  %v4167_v38 = vadd.f32 %v3027_v36, %v3026_v32 }
 0x11d   : > { %2266 = vmatmul.mubr.bf16.gmra.mrb[116].mxu1 %v3717_v27  ;;  %3416 = vmatmul.mubr.bf16.gmra.mrb[116].mxu0 %v3718_v28  ;;  %v3736_v27 = vld [vmem:[%s3799_s25 + $0x2f0] ss:$36 sps:$4 sm:$0xff]  }
 0x11e   : > { %2273 = vmatprep.mubr.bf16.mxu1 %v3719_v33  ;;  %3419 = vmatprep.mubr.bf16.mxu0 %v3721_v34 }
 0x120   : > { %v2957_v39 = vpop.f32.mrb[12].mxu0  ;;  %v3029_v40 = vpop.f32.mrb[12].mxu1 }
 0x121   : > { %v2958_v41 = vpop.f32.mrb[13].mxu0  ;;  %v3030_v42 = vpop.f32.mrb[13].mxu1 }
 0x122   : > { %v4171_v45 = vadd.f32 %v2958_v41, %v2957_v39  ;;  %v4173_v46 = vadd.f32 %v3030_v42, %v3029_v40  ;;  %v2960_v47 = vpop.f32.mrb[14].mxu0  ;;  %v3032_v48 = vpop.f32.mrb[14].mxu1  ;;  %v3737_v41 = vld [vmem:[%s3799_s25 + $0x3c0] ss:$36 sps:$4 sm:$0xff]   ;;  %v3738_v42 = vld [vmem:[%s3799_s25 + $0x338] ss:$36 sps:$4 sm:$0xff]  }
 0x123   : > { %v2961_v51 = vpop.f32.mrb[15].mxu0  ;;  %v3033_v52 = vpop.f32.mrb[15].mxu1 }
 0x124   : > { %v4177_v53 = vadd.f32 %v2961_v51, %v2960_v47  ;;  %v4179_v54 = vadd.f32 %v3033_v52, %v3032_v48  ;;  %v3739_v48 = vld [vmem:[%s3799_s25 + $0x40c] ss:$36 sps:$4 sm:$0xff]  }
 0x125   : > { %2274 = vmatmul.mubr.bf16.gmra.mrb[120].mxu1 %v3722_v43  ;;  %3420 = vmatmul.mubr.bf16.gmra.mrb[120].mxu0 %v3723_v44 }
 0x126   : > { %2281 = vmatprep.mubr.bf16.mxu1 %v3724_v49  ;;  %3423 = vmatprep.mubr.bf16.mxu0 %v3726_v50  ;;  %v3741_v49 = vld [vmem:[%s3799_s25 + $0x380] ss:$36 sps:$4 sm:$0xff]  }
 0x128   : > { %v2963_v55 = vpop.f32.mrb[16].mxu0  ;;  %v3051_v56 = vpop.f32.mrb[16].mxu1 }
 0x129   : > { %v2964_v57 = vpop.f32.mrb[17].mxu0  ;;  %v3052_v58 = vpop.f32.mrb[17].mxu1 }
 0x12a   : > { %v4183_v63 = vadd.f32 %v2964_v57, %v2963_v55  ;;  %v3053_v0 = vadd.f32 %v3052_v58, %v3051_v56  ;;  %v2966_v1 = vpop.f32.mrb[18].mxu0  ;;  %v3054_v2 = vpop.f32.mrb[18].mxu1 }
 0x12b   : > { %v2967_v7 = vpop.f32.mrb[19].mxu0  ;;  %v3055_v8 = vpop.f32.mrb[19].mxu1 }
 0x12c   : > { %v4188_v9 = vadd.f32 %v3053_v0, %v4135_v61  ;;  %v4190_v10 = vadd.f32 %v2967_v7, %v2966_v1  ;;  %v3056_v11 = vadd.f32 %v3055_v8, %v3054_v2  ;;  %v3742_v0 = vld [vmem:[%s3799_s25 + $0x408] ss:$36 sps:$4 sm:$0xff]   ;;  %v3744_v7 = vld [vmem:[%s3799_s25 + $0x454] ss:$36 sps:$4 sm:$0xff]  }
 0x12d   : > { %2282 = vmatmul.mubr.bf16.gmra.mrb[124].mxu1 %v3727_v59  ;;  %3424 = vmatmul.mubr.bf16.gmra.mrb[124].mxu0 %v3728_v60  ;;  %v3743_v1 = vld [vmem:[%s3799_s25 + $0x3c8] ss:$36 sps:$4 sm:$0xff]   ;;  %v3746_v8 = vld [vmem:[%s3799_s25 + $0x410] ss:$36 sps:$4 sm:$0xff]  }
 0x12e   : > { %v4193_v12 = vadd.f32 %v3056_v11, %v4141_v5  ;;  %2289 = vmatprep.mubr.bf16.mxu1 %v3729_v3  ;;  %3427 = vmatprep.mubr.bf16.mxu0 %v3731_v4 }
 0x130   : > { %v2969_v15 = vpop.f32.mrb[20].mxu0  ;;  %v3057_v16 = vpop.f32.mrb[20].mxu1 }
 0x131   : > { %v2970_v17 = vpop.f32.mrb[21].mxu0  ;;  %v3058_v18 = vpop.f32.mrb[21].mxu1 }
 0x132   : > { %v4197_v61 = vadd.f32 %v2970_v17, %v2969_v15  ;;  %v3059_v23 = vadd.f32 %v3058_v18, %v3057_v16  ;;  %v2972_v24 = vpop.f32.mrb[22].mxu0  ;;  %v3060_v25 = vpop.f32.mrb[22].mxu1 }
 0x133   : > { %v2973_v28 = vpop.f32.mrb[23].mxu0  ;;  %v3061_v5 = vpop.f32.mrb[23].mxu1 }
 0x134   : > { %v4202_v31 = vadd.f32 %v3059_v23, %v4147_v13  ;;  %v4204_v32 = vadd.f32 %v2973_v28, %v2972_v24  ;;  %v3062_v33 = vadd.f32 %v3061_v5, %v3060_v25  ;;  %v3747_v25 = vld [vmem:[%s3799_s25 + $0x450] ss:$36 sps:$4 sm:$0xff]  }
 0x135   : > { %2290 = vmatmul.mubr.bf16.gmra.mrb[128].mxu1 %v3732_v19  ;;  %3428 = vmatmul.mubr.bf16.gmra.mrb[128].mxu0 %v3733_v20 }
 0x136   : > { %v4207_v34 = vadd.f32 %v3062_v33, %v4153_v21  ;;  %2297 = vmatprep.mubr.bf16.mxu1 %v3734_v26  ;;  %3431 = vmatprep.mubr.bf16.mxu0 %v3736_v27  ;;  %v3748_v26 = vld [vmem:[%s3799_s25 + $0x458] ss:$36 sps:$4 sm:$0xff]  }
 0x138   : > { %v2975_v35 = vpop.f32.mrb[24].mxu0  ;;  %v3063_v36 = vpop.f32.mrb[24].mxu1 }
 0x139   : > { %v2976_v39 = vpop.f32.mrb[25].mxu0  ;;  %v3064_v40 = vpop.f32.mrb[25].mxu1 }
 0x13a   : > { %v4211_v13 = vadd.f32 %v2976_v39, %v2975_v35  ;;  %v3065_v43 = vadd.f32 %v3064_v40, %v3063_v36  ;;  %v2978_v44 = vpop.f32.mrb[26].mxu0  ;;  %v3066_v47 = vpop.f32.mrb[26].mxu1 }
 0x13b   : > { %v2979_v50 = vpop.f32.mrb[27].mxu0  ;;  %v3067_v21 = vpop.f32.mrb[27].mxu1 }
 0x13c   : > { %v4216_v51 = vadd.f32 %v3065_v43, %v4159_v29  ;;  %v4218_v52 = vadd.f32 %v2979_v50, %v2978_v44  ;;  %v3068_v55 = vadd.f32 %v3067_v21, %v3066_v47 }
 0x13d   : > { %2298 = vmatmul.mubr.bf16.gmra.mrb[132].mxu1 %v3737_v41  ;;  %3432 = vmatmul.mubr.bf16.gmra.mrb[132].mxu0 %v3738_v42 }
 0x13e   : > { %v4221_v56 = vadd.f32 %v3068_v55, %v4165_v37  ;;  %2305 = vmatprep.mubr.bf16.mxu1 %v3739_v48  ;;  %3435 = vmatprep.mubr.bf16.mxu0 %v3741_v49 }
 0x140   : > { %v2981_v57 = vpop.f32.mrb[28].mxu0  ;;  %v3069_v58 = vpop.f32.mrb[28].mxu1 }
 0x141   : > { %v2982_v59 = vpop.f32.mrb[29].mxu0  ;;  %v3070_v60 = vpop.f32.mrb[29].mxu1 }
 0x142   : > { %v4225_v29 = vadd.f32 %v2982_v59, %v2981_v57  ;;  %v3071_v2 = vadd.f32 %v3070_v60, %v3069_v58  ;;  %v2984_v3 = vpop.f32.mrb[30].mxu0  ;;  %v3072_v4 = vpop.f32.mrb[30].mxu1 }
 0x143   : > { %v2985_v11 = vpop.f32.mrb[31].mxu0  ;;  %v3073_v37 = vpop.f32.mrb[31].mxu1 }
 0x144   : > { %v4230_v15 = vadd.f32 %v3071_v2, %v4171_v45  ;;  %v4232_v16 = vadd.f32 %v2985_v11, %v2984_v3  ;;  %v3074_v17 = vadd.f32 %v3073_v37, %v3072_v4 }
 0x145   : > { %2306 = vmatmul.mubr.bf16.gmra.mrb[136].mxu1 %v3742_v0  ;;  %3436 = vmatmul.mubr.bf16.gmra.mrb[136].mxu0 %v3743_v1 }
 0x146   : > { %v4235_v18 = vadd.f32 %v3074_v17, %v4177_v53  ;;  %2313 = vmatprep.mubr.bf16.mxu1 %v3744_v7  ;;  %3439 = vmatprep.mubr.bf16.mxu0 %v3746_v8 }
 0x148   : > { %v2987_v19 = vpop.f32.mrb[32].mxu0  ;;  %v3075_v20 = vpop.f32.mrb[32].mxu1 }
 0x149   : > { %v2988_v23 = vpop.f32.mrb[33].mxu0  ;;  %v3076_v24 = vpop.f32.mrb[33].mxu1 }
 0x14a   : > { %v4239_v27 = vadd.f32 %v2988_v23, %v2987_v19  ;;  %v3077_v45 = vadd.f32 %v3076_v24, %v3075_v20  ;;  %v2990_v28 = vpop.f32.mrb[34].mxu0  ;;  %v3078_v5 = vpop.f32.mrb[34].mxu1 }
 0x14b   : > { %v2991_v33 = vpop.f32.mrb[35].mxu0  ;;  %v3079_v35 = vpop.f32.mrb[35].mxu1 }
 0x14c   : > { %v4242_v36 = vadd.f32 %v3077_v45, %v4183_v63  ;;  %v2992_v53 = vadd.f32 %v2991_v33, %v2990_v28  ;;  %v3080_v39 = vadd.f32 %v3079_v35, %v3078_v5 }
 0x14d   : > { %2314 = vmatmul.mubr.bf16.gmra.mrb[140].mxu1 %v3747_v25  ;;  %3440 = vmatmul.mubr.bf16.gmra.mrb[140].mxu0 %v3748_v26 }
 0x14e   : > { %v4245_v40 = vadd.f32 %v3080_v39, %v4190_v10 }
 0x150   : > { %v2993_v41 = vpop.f32.mrb[36].mxu0  ;;  %v3081_v42 = vpop.f32.mrb[36].mxu1 }
 0x151   : > { %v2994_v43 = vpop.f32.mrb[37].mxu0  ;;  %v3082_v44 = vpop.f32.mrb[37].mxu1 }
 0x152   : > { %v4247_v47 = vadd.f32 %v2994_v43, %v2993_v41  ;;  %v3083_v48 = vadd.f32 %v3082_v44, %v3081_v42  ;;  %v2996_v49 = vpop.f32.mrb[38].mxu0  ;;  %v3084_v50 = vpop.f32.mrb[38].mxu1 }
 0x153   : > { %v2997_v21 = vpop.f32.mrb[39].mxu0  ;;  %v3085_v55 = vpop.f32.mrb[39].mxu1 }
 0x154   : > { %v4250_v63 = vadd.f32 %v3083_v48, %v4197_v61  ;;  %v2998_v57 = vadd.f32 %v2997_v21, %v2996_v49  ;;  %v3086_v58 = vadd.f32 %v3085_v55, %v3084_v50 }
 0x156   : > { %v4253_v59 = vadd.f32 %v3086_v58, %v4204_v32 }
 0x158   : > { %v2999_v10 = vpop.f32.mrb[40].mxu0  ;;  %v3087_v60 = vpop.f32.mrb[40].mxu1 }
 0x159   : > { %v3000_v0 = vpop.f32.mrb[41].mxu0  ;;  %v3088_v1 = vpop.f32.mrb[41].mxu1 }
 0x15a   : > { %v4255_v2 = vadd.f32 %v3000_v0, %v2999_v10  ;;  %v3089_v3 = vadd.f32 %v3088_v1, %v3087_v60  ;;  %v3002_v4 = vpop.f32.mrb[42].mxu0  ;;  %v3090_v7 = vpop.f32.mrb[42].mxu1 }
 0x15b   : > { %v3003_v8 = vpop.f32.mrb[43].mxu0  ;;  %v3091_v11 = vpop.f32.mrb[43].mxu1 }
 0x15c   : > { %v4258_v37 = vadd.f32 %v3089_v3, %v4211_v13  ;;  %v4260_v61 = vadd.f32 %v3003_v8, %v3002_v4  ;;  %v3092_v17 = vadd.f32 %v3091_v11, %v3090_v7 }
 0x15e   : > { %v4263_v32 = vadd.f32 %v3092_v17, %v4218_v52 }
 0x160   : > { %v3005_v19 = vpop.f32.mrb[44].mxu0  ;;  %v3093_v20 = vpop.f32.mrb[44].mxu1 }
 0x161   : > { %v3006_v23 = vpop.f32.mrb[45].mxu0  ;;  %v3094_v24 = vpop.f32.mrb[45].mxu1 }
 0x162   : > { %v4265_v25 = vadd.f32 %v3006_v23, %v3005_v19  ;;  %v3095_v26 = vadd.f32 %v3094_v24, %v3093_v20  ;;  %v3008_v45 = vpop.f32.mrb[46].mxu0  ;;  %v3096_v28 = vpop.f32.mrb[46].mxu1 }
 0x163   : > { %v3009_v5 = vpop.f32.mrb[47].mxu0  ;;  %v3097_v33 = vpop.f32.mrb[47].mxu1 }
 0x164   : > { %v4268_v13 = vadd.f32 %v3095_v26, %v4225_v29  ;;  %v4270_v35 = vadd.f32 %v3009_v5, %v3008_v45  ;;  %v3098_v39 = vadd.f32 %v3097_v33, %v3096_v28 }
 0x166   : > { %v4273_v52 = vadd.f32 %v3098_v39, %v4232_v16 }
 0x168   : > { %v3099_v41 = vpop.f32.mrb[48].mxu1  ;;  %v3163_v42 = vpop.f32.mrb[48].mxu0 }
 0x169   : > { %v3100_v43 = vpop.f32.mrb[49].mxu1  ;;  %v3164_v44 = vpop.f32.mrb[49].mxu0 }
 0x16a   : > { %v3101_v48 = vadd.f32 %v3100_v43, %v3099_v41  ;;  %v3165_v49 = vadd.f32 %v3164_v44, %v3163_v42  ;;  %v3102_v50 = vpop.f32.mrb[50].mxu1  ;;  %v3166_v21 = vpop.f32.mrb[50].mxu0 }
 0x16b   : > { %v3103_v55 = vpop.f32.mrb[51].mxu1  ;;  %v3167_v58 = vpop.f32.mrb[51].mxu0 }
 0x16c   : > { %v4276_v10 = vadd.f32 %v3101_v48, %v4239_v27  ;;  %v4279_v29 = vadd.f32 %v3165_v49, %v4188_v9  ;;  %v3104_v60 = vadd.f32 %v3103_v55, %v3102_v50  ;;  %v3168_v0 = vadd.f32 %v3167_v58, %v3166_v21 }
 0x16e   : > { %v4281_v16 = vadd.f32 %v3104_v60, %v2992_v53  ;;  %v4284_v1 = vadd.f32 %v3168_v0, %v4193_v12 }
 0x170   : > { %v3105_v3 = vpop.f32.mrb[52].mxu1  ;;  %v3169_v4 = vpop.f32.mrb[52].mxu0 }
 0x171   : > { %v3106_v7 = vpop.f32.mrb[53].mxu1  ;;  %v3170_v8 = vpop.f32.mrb[53].mxu0 }
 0x172   : > { %v3107_v11 = vadd.f32 %v3106_v7, %v3105_v3  ;;  %v3171_v17 = vadd.f32 %v3170_v8, %v3169_v4  ;;  %v3108_v19 = vpop.f32.mrb[54].mxu1  ;;  %v3172_v20 = vpop.f32.mrb[54].mxu0 }
 0x173   : > { %v3109_v27 = vpop.f32.mrb[55].mxu1  ;;  %v3173_v23 = vpop.f32.mrb[55].mxu0 }
 0x174   : > { %v4287_v9 = vadd.f32 %v3107_v11, %v4247_v47  ;;  %v4290_v24 = vadd.f32 %v3171_v17, %v4202_v31  ;;  %v3110_v53 = vadd.f32 %v3109_v27, %v3108_v19  ;;  %v3174_v26 = vadd.f32 %v3173_v23, %v3172_v20 }
 0x176   : > { %v4292_v12 = vadd.f32 %v3110_v53, %v2998_v57  ;;  %v4295_v45 = vadd.f32 %v3174_v26, %v4207_v34 }
 0x178   : > { %v3111_v28 = vpop.f32.mrb[56].mxu1  ;;  %v3175_v5 = vpop.f32.mrb[56].mxu0 }
 0x179   : > { %v3112_v33 = vpop.f32.mrb[57].mxu1  ;;  %v3176_v39 = vpop.f32.mrb[57].mxu0 }
 0x17a   : > { %v3113_v41 = vadd.f32 %v3112_v33, %v3111_v28  ;;  %v3177_v42 = vadd.f32 %v3176_v39, %v3175_v5  ;;  %v3114_v43 = vpop.f32.mrb[58].mxu1  ;;  %v3178_v44 = vpop.f32.mrb[58].mxu0 }
 0x17b   : > { %v3115_v47 = vpop.f32.mrb[59].mxu1  ;;  %v3179_v48 = vpop.f32.mrb[59].mxu0 }
 0x17c   : > { %v4298_v31 = vadd.f32 %v3113_v41, %v4255_v2  ;;  %v4301_v49 = vadd.f32 %v3177_v42, %v4216_v51  ;;  %v3116_v57 = vadd.f32 %v3115_v47, %v3114_v43  ;;  %v3180_v50 = vadd.f32 %v3179_v48, %v3178_v44 }
 0x17e   : > { %v4304_v34 = vadd.f32 %v3116_v57, %v4260_v61  ;;  %v4307_v21 = vadd.f32 %v3180_v50, %v4221_v56 }
 0x180   : > { %v3117_v55 = vpop.f32.mrb[60].mxu1  ;;  %v3181_v58 = vpop.f32.mrb[60].mxu0 }
 0x181   : > { %v3118_v60 = vpop.f32.mrb[61].mxu1  ;;  %v3182_v0 = vpop.f32.mrb[61].mxu0 }
 0x182   : > { %v3119_v3 = vadd.f32 %v3118_v60, %v3117_v55  ;;  %v3183_v4 = vadd.f32 %v3182_v0, %v3181_v58  ;;  %v3120_v7 = vpop.f32.mrb[62].mxu1  ;;  %v3184_v2 = vpop.f32.mrb[62].mxu0 }
 0x183   : > { %v3121_v8 = vpop.f32.mrb[63].mxu1  ;;  %v3185_v11 = vpop.f32.mrb[63].mxu0 }
 0x184   : > { %v4310_v51 = vadd.f32 %v3119_v3, %v4265_v25  ;;  %v4313_v17 = vadd.f32 %v3183_v4, %v4230_v15  ;;  %v3122_v61 = vadd.f32 %v3121_v8, %v3120_v7  ;;  %v3186_v19 = vadd.f32 %v3185_v11, %v3184_v2 }
 0x186   : > { %v4316_v56 = vadd.f32 %v3122_v61, %v4270_v35  ;;  %v4319_v20 = vadd.f32 %v3186_v19, %v4235_v18 }
 0x188   : > { %v3123_v27 = vpop.f32.mrb[64].mxu1  ;;  %v3187_v23 = vpop.f32.mrb[64].mxu0 }
 0x189   : > { %v3124_v53 = vpop.f32.mrb[65].mxu1  ;;  %v3188_v26 = vpop.f32.mrb[65].mxu0 }
 0x18a   : > { %v3125_v28 = vadd.f32 %v3124_v53, %v3123_v27  ;;  %v3189_v5 = vadd.f32 %v3188_v26, %v3187_v23  ;;  %v3126_v33 = vpop.f32.mrb[66].mxu1  ;;  %v3190_v25 = vpop.f32.mrb[66].mxu0 }
 0x18b   : > { %v3127_v39 = vpop.f32.mrb[67].mxu1  ;;  %v3191_v41 = vpop.f32.mrb[67].mxu0 }
 0x18c   : > { %v4322_v15 = vadd.f32 %v3125_v28, %v4137_v62  ;;  %v4325_v42 = vadd.f32 %v3189_v5, %v4242_v36  ;;  %v3128_v35 = vadd.f32 %v3127_v39, %v3126_v33  ;;  %v3192_v43 = vadd.f32 %v3191_v41, %v3190_v25 }
 0x18e   : > { %v4328_v18 = vadd.f32 %v3128_v35, %v4143_v6  ;;  %v4331_v44 = vadd.f32 %v3192_v43, %v4245_v40 }
 0x190   : > { %v3129_v47 = vpop.f32.mrb[68].mxu1  ;;  %v3193_v48 = vpop.f32.mrb[68].mxu0 }
 0x191   : > { %v3130_v57 = vpop.f32.mrb[69].mxu1  ;;  %v3194_v50 = vpop.f32.mrb[69].mxu0 }
 0x192   : > { %v3131_v55 = vadd.f32 %v3130_v57, %v3129_v47  ;;  %v3195_v58 = vadd.f32 %v3194_v50, %v3193_v48  ;;  %v3132_v60 = vpop.f32.mrb[70].mxu1  ;;  %v3196_v62 = vpop.f32.mrb[70].mxu0 }
 0x193   : > { %v3133_v0 = vpop.f32.mrb[71].mxu1  ;;  %v3197_v3 = vpop.f32.mrb[71].mxu0 }
 0x194   : > { %v4334_v36 = vadd.f32 %v3131_v55, %v4149_v14  ;;  %v4337_v4 = vadd.f32 %v3195_v58, %v4250_v63  ;;  %v3134_v6 = vadd.f32 %v3133_v0, %v3132_v60  ;;  %v3198_v7 = vadd.f32 %v3197_v3, %v3196_v62 }
 0x196   : > { %v4340_v40 = vadd.f32 %v3134_v6, %v4155_v22  ;;  %v4343_v2 = vadd.f32 %v3198_v7, %v4253_v59 }
 0x198   : > { %v3135_v8 = vpop.f32.mrb[72].mxu1  ;;  %v3199_v11 = vpop.f32.mrb[72].mxu0 }
 0x199   : > { %v3136_v61 = vpop.f32.mrb[73].mxu1  ;;  %v3200_v19 = vpop.f32.mrb[73].mxu0 }
 0x19a   : > { %v3137_v27 = vadd.f32 %v3136_v61, %v3135_v8  ;;  %v3201_v23 = vadd.f32 %v3200_v19, %v3199_v11  ;;  %v3138_v53 = vpop.f32.mrb[74].mxu1  ;;  %v3202_v14 = vpop.f32.mrb[74].mxu0 }
 0x19b   : > { %v3139_v26 = vpop.f32.mrb[75].mxu1  ;;  %v3203_v28 = vpop.f32.mrb[75].mxu0 }
 0x19c   : > { %v4346_v63 = vadd.f32 %v3137_v27, %v4161_v30  ;;  %v4349_v5 = vadd.f32 %v3201_v23, %v4258_v37  ;;  %v3140_v22 = vadd.f32 %v3139_v26, %v3138_v53  ;;  %v3204_v33 = vadd.f32 %v3203_v28, %v3202_v14 }
 0x19e   : > { %v4352_v59 = vadd.f32 %v3140_v22, %v4167_v38  ;;  %v4355_v25 = vadd.f32 %v3204_v33, %v4263_v32 }
 0x1a0   : > { %v3141_v39 = vpop.f32.mrb[76].mxu1  ;;  %v3205_v41 = vpop.f32.mrb[76].mxu0 }
 0x1a1   : > { %v3142_v35 = vpop.f32.mrb[77].mxu1  ;;  %v3206_v43 = vpop.f32.mrb[77].mxu0 }
 0x1a2   : > { %v3143_v47 = vadd.f32 %v3142_v35, %v3141_v39  ;;  %v3207_v48 = vadd.f32 %v3206_v43, %v3205_v41  ;;  %v3144_v57 = vpop.f32.mrb[78].mxu1  ;;  %v3208_v30 = vpop.f32.mrb[78].mxu0 }
 0x1a3   : > { %v3145_v50 = vpop.f32.mrb[79].mxu1  ;;  %v3209_v55 = vpop.f32.mrb[79].mxu0 }
 0x1a4   : > { %v4358_v37 = vadd.f32 %v3143_v47, %v4173_v46  ;;  %v4361_v58 = vadd.f32 %v3207_v48, %v4268_v13  ;;  %v3146_v38 = vadd.f32 %v3145_v50, %v3144_v57  ;;  %v3210_v60 = vadd.f32 %v3209_v55, %v3208_v30 }
 0x1a6   : > { %v4364_v32 = vadd.f32 %v3146_v38, %v4179_v54  ;;  %v4367_v62 = vadd.f32 %v3210_v60, %v4273_v52 }
 0x1a8   : > { %v3211_v0 = vpop.f32.mrb[80].mxu0  ;;  %v3275_v3 = vpop.f32.mrb[80].mxu1 }
 0x1a9   : > { %v3212_v6 = vpop.f32.mrb[81].mxu0  ;;  %v3276_v7 = vpop.f32.mrb[81].mxu1 }
 0x1aa   : > { %v3213_v8 = vadd.f32 %v3212_v6, %v3211_v0  ;;  %v3277_v11 = vadd.f32 %v3276_v7, %v3275_v3  ;;  %v3214_v61 = vpop.f32.mrb[82].mxu0  ;;  %v3278_v46 = vpop.f32.mrb[82].mxu1 }
 0x1ab   : > { %v3215_v19 = vpop.f32.mrb[83].mxu0  ;;  %v3279_v27 = vpop.f32.mrb[83].mxu1 }
 0x1ac   : > { %v4370_v13 = vadd.f32 %v3213_v8, %v4276_v10  ;;  %v3216_v23 = vadd.f32 %v3215_v19, %v3214_v61  ;;  %v3280_v53 = vadd.f32 %v3279_v27, %v3278_v46  ;;  %v4373_v54 = vadd.f32 %v3277_v11, %v4279_v29 }
 0x1ae   : > { %v4376_v52 = vadd.f32 %v3216_v23, %v4281_v16  ;;  %v4379_v14 = vadd.f32 %v3280_v53, %v4284_v1 }
 0x1b0   : > { %v3217_v26 = vpop.f32.mrb[84].mxu0  ;;  %v3281_v28 = vpop.f32.mrb[84].mxu1 }
 0x1b1   : > { %v3218_v22 = vpop.f32.mrb[85].mxu0  ;;  %v3282_v33 = vpop.f32.mrb[85].mxu1 }
 0x1b2   : > { %v3219_v39 = vadd.f32 %v3218_v22, %v3217_v26  ;;  %v3283_v41 = vadd.f32 %v3282_v33, %v3281_v28  ;;  %v3220_v35 = vpop.f32.mrb[86].mxu0  ;;  %v3284_v10 = vpop.f32.mrb[86].mxu1 }
 0x1b3   : > { %v3221_v43 = vpop.f32.mrb[87].mxu0  ;;  %v3285_v47 = vpop.f32.mrb[87].mxu1 }
 0x1b4   : > { %v4382_v48 = vadd.f32 %v3219_v39, %v4287_v9  ;;  %v3222_v29 = vadd.f32 %v3221_v43, %v3220_v35  ;;  %v3286_v57 = vadd.f32 %v3285_v47, %v3284_v10  ;;  %v4385_v16 = vadd.f32 %v3283_v41, %v4290_v24 }
 0x1b6   : > { %v4388_v1 = vadd.f32 %v3222_v29, %v4292_v12  ;;  %v4391_v30 = vadd.f32 %v3286_v57, %v4295_v45 }
 0x1b8   : > { %v3223_v50 = vpop.f32.mrb[88].mxu0  ;;  %v3287_v55 = vpop.f32.mrb[88].mxu1 }
 0x1b9   : > { %v3224_v38 = vpop.f32.mrb[89].mxu0  ;;  %v3288_v60 = vpop.f32.mrb[89].mxu1 }
 0x1ba   : > { %v3225_v0 = vadd.f32 %v3224_v38, %v3223_v50  ;;  %v3289_v3 = vadd.f32 %v3288_v60, %v3287_v55  ;;  %v3226_v6 = vpop.f32.mrb[90].mxu0  ;;  %v3290_v9 = vpop.f32.mrb[90].mxu1 }
 0x1bb   : > { %v3227_v7 = vpop.f32.mrb[91].mxu0  ;;  %v3291_v8 = vpop.f32.mrb[91].mxu1 }
 0x1bc   : > { %v4394_v11 = vadd.f32 %v3225_v0, %v4298_v31  ;;  %v3228_v24 = vadd.f32 %v3227_v7, %v3226_v6  ;;  %v3292_v61 = vadd.f32 %v3291_v8, %v3290_v9  ;;  %v4397_v12 = vadd.f32 %v3289_v3, %v4301_v49 }
 0x1be   : > { %v4400_v45 = vadd.f32 %v3228_v24, %v4304_v34  ;;  %v4403_v46 = vadd.f32 %v3292_v61, %v4307_v21 }
 0x1c0   : > { %v3229_v19 = vpop.f32.mrb[92].mxu0  ;;  %v3293_v27 = vpop.f32.mrb[92].mxu1 }
 0x1c1   : > { %v3230_v23 = vpop.f32.mrb[93].mxu0  ;;  %v3294_v53 = vpop.f32.mrb[93].mxu1 }
 0x1c2   : > { %v3231_v26 = vadd.f32 %v3230_v23, %v3229_v19  ;;  %v3295_v28 = vadd.f32 %v3294_v53, %v3293_v27  ;;  %v3232_v22 = vpop.f32.mrb[94].mxu0  ;;  %v3296_v31 = vpop.f32.mrb[94].mxu1 }
 0x1c3   : > { %v3233_v33 = vpop.f32.mrb[95].mxu0  ;;  %v3297_v39 = vpop.f32.mrb[95].mxu1 }
 0x1c4   : > { %v4406_v41 = vadd.f32 %v3231_v26, %v4310_v51  ;;  %v3234_v49 = vadd.f32 %v3233_v33, %v3232_v22  ;;  %v3298_v35 = vadd.f32 %v3297_v39, %v3296_v31  ;;  %v4409_v34 = vadd.f32 %v3295_v28, %v4313_v17 }
 0x1c6   : > { %v4412_v21 = vadd.f32 %v3234_v49, %v4316_v56  ;;  %v4415_v10 = vadd.f32 %v3298_v35, %v4319_v20 }
 0x1c8   : > { %v3235_v43 = vpop.f32.mrb[96].mxu0  ;;  %v3299_v47 = vpop.f32.mrb[96].mxu1 }
 0x1c9   : > { %v3236_v29 = vpop.f32.mrb[97].mxu0  ;;  %v3300_v57 = vpop.f32.mrb[97].mxu1 }
 0x1ca   : > { %v3237_v50 = vadd.f32 %v3236_v29, %v3235_v43  ;;  %v3301_v55 = vadd.f32 %v3300_v57, %v3299_v47  ;;  %v3238_v38 = vpop.f32.mrb[98].mxu0  ;;  %v3302_v51 = vpop.f32.mrb[98].mxu1 }
 0x1cb   : > { %v3239_v60 = vpop.f32.mrb[99].mxu0  ;;  %v3303_v0 = vpop.f32.mrb[99].mxu1 }
 0x1cc   : > { %v4418_v3 = vadd.f32 %v3237_v50, %v4322_v15  ;;  %v3240_v17 = vadd.f32 %v3239_v60, %v3238_v38  ;;  %v3304_v6 = vadd.f32 %v3303_v0, %v3302_v51  ;;  %v4421_v56 = vadd.f32 %v3301_v55, %v4325_v42 }
 0x1ce   : > { %v4424_v20 = vadd.f32 %v3240_v17, %v4328_v18  ;;  %v4427_v9 = vadd.f32 %v3304_v6, %v4331_v44 }
 0x1d0   : > { %v3241_v7 = vpop.f32.mrb[100].mxu0  ;;  %v3305_v8 = vpop.f32.mrb[100].mxu1 }
 0x1d1   : > { %v3242_v24 = vpop.f32.mrb[101].mxu0  ;;  %v3306_v61 = vpop.f32.mrb[101].mxu1 }
 0x1d2   : > { %v3243_v19 = vadd.f32 %v3242_v24, %v3241_v7  ;;  %v3307_v27 = vadd.f32 %v3306_v61, %v3305_v8  ;;  %v3244_v23 = vpop.f32.mrb[102].mxu0  ;;  %v3308_v15 = vpop.f32.mrb[102].mxu1 }
 0x1d3   : > { %v3245_v53 = vpop.f32.mrb[103].mxu0  ;;  %v3309_v26 = vpop.f32.mrb[103].mxu1 }
 0x1d4   : > { %v4430_v28 = vadd.f32 %v3243_v19, %v4334_v36  ;;  %v3246_v42 = vadd.f32 %v3245_v53, %v3244_v23  ;;  %v3310_v22 = vadd.f32 %v3309_v26, %v3308_v15  ;;  %v4433_v18 = vadd.f32 %v3307_v27, %v4337_v4 }
 0x1d6   : > { %v4436_v44 = vadd.f32 %v3246_v42, %v4340_v40  ;;  %v4439_v31 = vadd.f32 %v3310_v22, %v4343_v2 }
 0x1d8   : > { %v3247_v33 = vpop.f32.mrb[104].mxu0  ;;  %v3311_v39 = vpop.f32.mrb[104].mxu1 }
 0x1d9   : > { %v3248_v49 = vpop.f32.mrb[105].mxu0  ;;  %v3312_v35 = vpop.f32.mrb[105].mxu1 }
 0x1da   : > { %v3249_v43 = vadd.f32 %v3248_v49, %v3247_v33  ;;  %v3313_v47 = vadd.f32 %v3312_v35, %v3311_v39  ;;  %v3250_v29 = vpop.f32.mrb[106].mxu0  ;;  %v3314_v36 = vpop.f32.mrb[106].mxu1 }
 0x1db   : > { %v3251_v57 = vpop.f32.mrb[107].mxu0  ;;  %v3315_v50 = vpop.f32.mrb[107].mxu1 }
 0x1dc   : > { %v4442_v55 = vadd.f32 %v3249_v43, %v4346_v63  ;;  %v3252_v4 = vadd.f32 %v3251_v57, %v3250_v29  ;;  %v3316_v38 = vadd.f32 %v3315_v50, %v3314_v36  ;;  %v4445_v40 = vadd.f32 %v3313_v47, %v4349_v5 }
 0x1de   : > { %v4448_v2 = vadd.f32 %v3252_v4, %v4352_v59  ;;  %v4451_v51 = vadd.f32 %v3316_v38, %v4355_v25 }
 0x1e0   : > { %v3253_v60 = vpop.f32.mrb[108].mxu0  ;;  %v3317_v0 = vpop.f32.mrb[108].mxu1 }
 0x1e1   : > { %v3254_v17 = vpop.f32.mrb[109].mxu0  ;;  %v3318_v6 = vpop.f32.mrb[109].mxu1 }
 0x1e2   : > { %v3255_v7 = vadd.f32 %v3254_v17, %v3253_v60  ;;  %v3319_v8 = vadd.f32 %v3318_v6, %v3317_v0  ;;  %v3256_v24 = vpop.f32.mrb[110].mxu0  ;;  %v3320_v63 = vpop.f32.mrb[110].mxu1 }
 0x1e3   : > { %v3257_v61 = vpop.f32.mrb[111].mxu0  ;;  %v3321_v19 = vpop.f32.mrb[111].mxu1 }
 0x1e4   : > { %v4454_v5 = vadd.f32 %v3255_v7, %v4358_v37  ;;  %v3258_v27 = vadd.f32 %v3257_v61, %v3256_v24  ;;  %v3322_v59 = vadd.f32 %v3321_v19, %v3320_v63  ;;  %v4457_v23 = vadd.f32 %v3319_v8, %v4361_v58 }
 0x1e6   : > { %v4460_v25 = vadd.f32 %v3258_v27, %v4364_v32  ;;  %v4463_v15 = vadd.f32 %v3322_v59, %v4367_v62 }
 0x1e8   : > { %v3323_v53 = vpop.f32.mrb[112].mxu1  ;;  %v3413_v26 = vpop.f32.mrb[112].mxu0 }
 0x1e9   : > { %v2365_v42 = vadd.f32 %v3413_v26, %v4385_v16  ;;  %v3324_v22 = vpop.f32.mrb[113].mxu1  ;;  %v2356_v37 = vpop.f32.mrb[113].mxu0 }
 0x1ea   : > { %v3325_v33 = vadd.f32 %v3324_v22, %v3323_v53  ;;  %v2357_v39 = vadd.f32 %v2356_v37, %v4373_v54  ;;  %v3326_v58 = vpop.f32.mrb[114].mxu1  ;;  %v3414_v49 = vpop.f32.mrb[114].mxu0 }
 0x1eb   : > { %2485 = vst [vmem:[%s3794_s22 + $0x10] sm:$0xff] %v2365_v42  ;;  %v2368_v32 = vadd.f32 %v3414_v49, %v4391_v30  ;;  %v3327_v35 = vpop.f32.mrb[115].mxu1  ;;  %v2359_v43 = vpop.f32.mrb[115].mxu0  ;;  %v2558_v50 = vmul.f32 %v2365_v42, %v2365_v42 }
 0x1ec   : > { %2483 = vst [vmem:[%s3794_s22] sm:$0xff] %v2357_v39  ;;  %v3328_v62 = vadd.f32 %v3327_v35, %v3326_v58  ;;  %v2360_v47 = vadd.f32 %v2359_v43, %v4379_v14  ;;  %v4472_v29 = vadd.f32 %v3325_v33, %v4370_v13  ;;  %v2556_v16 = vmul.f32 %v2357_v39, %v2357_v39 }
 0x1ed   : > { %2486 = vst [vmem:[%s3794_s22 + $0x18] sm:$0xff] %v2368_v32  ;;  %v2559_v0 = vmul.f32 %v2368_v32, %v2368_v32 }
 0x1ee   : > { %2484 = vst [vmem:[%s3794_s22 + $0x8] sm:$0xff] %v2360_v47  ;;  %v2516_v36 = vadd.f32 %v2360_v47, %v2357_v39  ;;  %v2557_v57 = vmul.f32 %v2360_v47, %v2360_v47  ;;  %v4477_v54 = vadd.f32 %v3328_v62, %v4376_v52 }
 0x1f0   : > { %v2517_v30 = vadd.f32 %v2516_v36, %v2365_v42  ;;  %v2588_v4 = vadd.f32 %v2557_v57, %v2556_v16  ;;  %v3329_v38 = vpop.f32.mrb[116].mxu1  ;;  %v3417_v60 = vpop.f32.mrb[116].mxu0 }
 0x1f1   : > { %v2381_v14 = vadd.f32 %v3417_v60, %v4409_v34  ;;  %v3330_v13 = vpop.f32.mrb[117].mxu1  ;;  %v2372_v17 = vpop.f32.mrb[117].mxu0 }
 0x1f2   : > { %v2589_v6 = vadd.f32 %v2588_v4, %v2558_v50  ;;  %v3331_v7 = vadd.f32 %v3330_v13, %v3329_v38  ;;  %v2373_v8 = vadd.f32 %v2372_v17, %v4397_v12  ;;  %v2518_v24 = vadd.f32 %v2517_v30, %v2368_v32  ;;  %v3332_v52 = vpop.f32.mrb[118].mxu1  ;;  %v3418_v63 = vpop.f32.mrb[118].mxu0 }
 0x1f3   : > { %2489 = vst [vmem:[%s3794_s22 + $0x30] sm:$0xff] %v2381_v14  ;;  %v2384_v61 = vadd.f32 %v3418_v63, %v4415_v10  ;;  %v3333_v19 = vpop.f32.mrb[119].mxu1  ;;  %v2375_v27 = vpop.f32.mrb[119].mxu0  ;;  %v2562_v49 = vmul.f32 %v2381_v14, %v2381_v14 }
 0x1f4   : > { %2487 = vst [vmem:[%s3794_s22 + $0x20] sm:$0xff] %v2373_v8  ;;  %v2519_v59 = vadd.f32 %v2518_v24, %v2373_v8  ;;  %v2560_v53 = vmul.f32 %v2373_v8, %v2373_v8  ;;  %v2590_v34 = vadd.f32 %v2589_v6, %v2559_v0  ;;  %v3334_v26 = vadd.f32 %v3333_v19, %v3332_v52 }
 0x1f5   : > { %2490 = vst [vmem:[%s3794_s22 + $0x38] sm:$0xff] %v2384_v61  ;;  %v2376_v42 = vadd.f32 %v2375_v27, %v4403_v46  ;;  %v4487_v22 = vadd.f32 %v3331_v7, %v4382_v48  ;;  %v2563_v36 = vmul.f32 %v2384_v61, %v2384_v61 }
 0x1f6   : > { %v2591_v12 = vadd.f32 %v2590_v34, %v2560_v53  ;;  %v4490_v37 = vadd.f32 %v3334_v26, %v4388_v1 }
 0x1f7   : > { %2488 = vst [vmem:[%s3794_s22 + $0x28] sm:$0xff] %v2376_v42  ;;  %v2520_v33 = vadd.f32 %v2519_v59, %v2376_v42  ;;  %v2561_v10 = vmul.f32 %v2376_v42, %v2376_v42 }
 0x1f8   : > { %v3335_v39 = vpop.f32.mrb[120].mxu1  ;;  %v3421_v58 = vpop.f32.mrb[120].mxu0 }
 0x1f9   : > { %v2521_v32 = vadd.f32 %v2520_v33, %v2381_v14  ;;  %v2592_v35 = vadd.f32 %v2591_v12, %v2561_v10  ;;  %v2397_v43 = vadd.f32 %v3421_v58, %v4433_v18  ;;  %v3336_v46 = vpop.f32.mrb[121].mxu1  ;;  %v2388_v62 = vpop.f32.mrb[121].mxu0 }
 0x1fa   : > { %v3337_v48 = vadd.f32 %v3336_v46, %v3335_v39  ;;  %v2389_v47 = vadd.f32 %v2388_v62, %v4421_v56  ;;  %v3338_v16 = vpop.f32.mrb[122].mxu1  ;;  %v3422_v1 = vpop.f32.mrb[122].mxu0 }
 0x1fb   : > { %v2593_v57 = vadd.f32 %v2592_v35, %v2562_v49  ;;  %2493 = vst [vmem:[%s3794_s22 + $0x50] sm:$0xff] %v2397_v43  ;;  %v2522_v50 = vadd.f32 %v2521_v32, %v2384_v61  ;;  %v2400_v30 = vadd.f32 %v3422_v1, %v4439_v31  ;;  %v3339_v4 = vpop.f32.mrb[123].mxu1  ;;  %v2391_v38 = vpop.f32.mrb[123].mxu0  ;;  %v2566_v52 = vmul.f32 %v2397_v43, %v2397_v43 }
 0x1fc   : > { %2491 = vst [vmem:[%s3794_s22 + $0x40] sm:$0xff] %v2389_v47  ;;  %v2564_v60 = vmul.f32 %v2389_v47, %v2389_v47  ;;  %v3340_v18 = vadd.f32 %v3339_v4, %v3338_v16  ;;  %v2392_v0 = vadd.f32 %v2391_v38, %v4427_v9  ;;  %v4500_v14 = vadd.f32 %v3337_v48, %v4394_v11 }
 0x1fd   : > { %v2523_v56 = vadd.f32 %v2522_v50, %v2389_v47  ;;  %v2594_v13 = vadd.f32 %v2593_v57, %v2563_v36  ;;  %2494 = vst [vmem:[%s3794_s22 + $0x58] sm:$0xff] %v2400_v30  ;;  %v2567_v34 = vmul.f32 %v2400_v30, %v2400_v30 }
 0x1fe   : > { %2492 = vst [vmem:[%s3794_s22 + $0x48] sm:$0xff] %v2392_v0  ;;  %v2565_v17 = vmul.f32 %v2392_v0, %v2392_v0  ;;  %v4505_v6 = vadd.f32 %v3340_v18, %v4400_v45 }
 0x1ff   : > { %v2595_v7 = vadd.f32 %v2594_v13, %v2564_v60  ;;  %v2524_v31 = vadd.f32 %v2523_v56, %v2392_v0 }
 0x200   : > { %v3341_v8 = vpop.f32.mrb[124].mxu1  ;;  %v3425_v24 = vpop.f32.mrb[124].mxu0 }
 0x201   : > { %v2525_v63 = vadd.f32 %v2524_v31, %v2397_v43  ;;  %v2596_v9 = vadd.f32 %v2595_v7, %v2565_v17  ;;  %v2413_v11 = vadd.f32 %v3425_v24, %v4457_v23  ;;  %v3342_v61 = vpop.f32.mrb[125].mxu1  ;;  %v2404_v19 = vpop.f32.mrb[125].mxu0 }
 0x202   : > { %v3343_v27 = vadd.f32 %v3342_v61, %v3341_v8  ;;  %v2405_v59 = vadd.f32 %v2404_v19, %v4445_v40  ;;  %v3344_v53 = vpop.f32.mrb[126].mxu1  ;;  %v3426_v45 = vpop.f32.mrb[126].mxu0 }
 0x203   : > { %v2597_v26 = vadd.f32 %v2596_v9, %v2566_v52  ;;  %2497 = vst [vmem:[%s3794_s22 + $0x70] sm:$0xff] %v2413_v11  ;;  %v2526_v42 = vadd.f32 %v2525_v63, %v2400_v30  ;;  %v2416_v12 = vadd.f32 %v3426_v45, %v4463_v15  ;;  %v3345_v33 = vpop.f32.mrb[127].mxu1  ;;  %v2407_v10 = vpop.f32.mrb[127].mxu0  ;;  %v2570_v47 = vmul.f32 %v2413_v11, %v2413_v11 }
 0x204   : > { %2495 = vst [vmem:[%s3794_s22 + $0x60] sm:$0xff] %v2405_v59  ;;  %v2568_v39 = vmul.f32 %v2405_v59, %v2405_v59  ;;  %v3346_v23 = vadd.f32 %v3345_v33, %v3344_v53  ;;  %v2408_v58 = vadd.f32 %v2407_v10, %v4451_v51  ;;  %v2284_v49 = vadd.f32 %v3343_v27, %v4406_v41 }
 0x205   : > { %v2527_v40 = vadd.f32 %v2526_v42, %v2405_v59  ;;  %v2598_v32 = vadd.f32 %v2597_v26, %v2567_v34  ;;  %2498 = vst [vmem:[%s3794_s22 + $0x78] sm:$0xff] %v2416_v12 }
 0x206   : > { %2496 = vst [vmem:[%s3794_s22 + $0x68] sm:$0xff] %v2408_v58  ;;  %v2569_v35 = vmul.f32 %v2408_v58, %v2408_v58  ;;  %v2287_v43 = vadd.f32 %v3346_v23, %v4412_v21  ;;  %v2571_v21 = vmul.f32 %v2416_v12, %v2416_v12 }
 0x207   : > { %v2599_v46 = vadd.f32 %v2598_v32, %v2568_v39  ;;  %v2528_v62 = vadd.f32 %v2527_v40, %v2408_v58 }
 0x208   : > { %v3347_v15 = vpop.f32.mrb[128].mxu1  ;;  %v3429_v48 = vpop.f32.mrb[128].mxu0 }
 0x209   : > { %v2529_v16 = vadd.f32 %v2528_v62, %v2413_v11  ;;  %v2600_v1 = vadd.f32 %v2599_v46, %v2569_v35  ;;  %v2429_v51 = vadd.f32 %v3429_v48, %v4487_v22  ;;  %v3348_v36 = vpop.f32.mrb[129].mxu1  ;;  %v2420_v41 = vpop.f32.mrb[129].mxu0 }
 0x20a   : > { %v3349_v57 = vadd.f32 %v3348_v36, %v3347_v15  ;;  %v2421_v50 = vadd.f32 %v2420_v41, %v4472_v29  ;;  %v3350_v30 = vpop.f32.mrb[130].mxu1  ;;  %v3430_v4 = vpop.f32.mrb[130].mxu0 }
 0x20b   : > { %v2601_v38 = vadd.f32 %v2600_v1, %v2570_v47  ;;  %2501 = vst [vmem:[%s3794_s22 + $0x90] sm:$0xff] %v2429_v51  ;;  %v2530_v60 = vadd.f32 %v2529_v16, %v2416_v12  ;;  %v2432_v18 = vadd.f32 %v3430_v4, %v4490_v37  ;;  %v3351_v0 = vpop.f32.mrb[131].mxu1  ;;  %v2423_v56 = vpop.f32.mrb[131].mxu0  ;;  %v2574_v11 = vmul.f32 %v2429_v51, %v2429_v51 }
 0x20c   : > { %2499 = vst [vmem:[%s3794_s22 + $0x80] sm:$0xff] %v2421_v50  ;;  %v2572_v13 = vmul.f32 %v2421_v50, %v2421_v50  ;;  %v3352_v22 = vadd.f32 %v3351_v0, %v3350_v30  ;;  %v2424_v17 = vadd.f32 %v2423_v56, %v4477_v54  ;;  %v2292_v7 = vadd.f32 %v3349_v57, %v4418_v3 }
 0x20d   : > { %v2531_v29 = vadd.f32 %v2530_v60, %v2421_v50  ;;  %v2602_v31 = vadd.f32 %v2601_v38, %v2571_v21  ;;  %2502 = vst [vmem:[%s3794_s22 + $0x98] sm:$0xff] %v2432_v18 }
 0x20e   : > { %2500 = vst [vmem:[%s3794_s22 + $0x88] sm:$0xff] %v2424_v17  ;;  %v2573_v8 = vmul.f32 %v2424_v17, %v2424_v17  ;;  %v2295_v24 = vadd.f32 %v3352_v22, %v4424_v20  ;;  %v2575_v20 = vmul.f32 %v2432_v18, %v2432_v18 }
 0x20f   : > { %v2603_v52 = vadd.f32 %v2602_v31, %v2572_v13  ;;  %v2532_v63 = vadd.f32 %v2531_v29, %v2424_v17 }
 0x210   : > { %v3353_v37 = vpop.f32.mrb[132].mxu1  ;;  %v3433_v9 = vpop.f32.mrb[132].mxu0 }
 0x211   : > { %v2533_v61 = vadd.f32 %v2532_v63, %v2429_v51  ;;  %v2604_v19 = vadd.f32 %v2603_v52, %v2573_v8  ;;  %v2445_v27 = vadd.f32 %v3433_v9, %v2284_v49  ;;  %v3354_v54 = vpop.f32.mrb[133].mxu1  ;;  %v2436_v59 = vpop.f32.mrb[133].mxu0 }
 0x212   : > { %v3355_v3 = vadd.f32 %v3354_v54, %v3353_v37  ;;  %v2437_v53 = vadd.f32 %v2436_v59, %v4500_v14  ;;  %v3356_v45 = vpop.f32.mrb[134].mxu1  ;;  %v3434_v34 = vpop.f32.mrb[134].mxu0 }
 0x213   : > { %v2605_v26 = vadd.f32 %v2604_v19, %v2574_v11  ;;  %2505 = vst [vmem:[%s3794_s22 + $0xb0] sm:$0xff] %v2445_v27  ;;  %v2534_v42 = vadd.f32 %v2533_v61, %v2432_v18  ;;  %v2448_v12 = vadd.f32 %v3434_v34, %v2287_v43  ;;  %v3357_v33 = vpop.f32.mrb[135].mxu1  ;;  %v2439_v10 = vpop.f32.mrb[135].mxu0  ;;  %v2578_v48 = vmul.f32 %v2445_v27, %v2445_v27 }
 0x214   : > { %2503 = vst [vmem:[%s3794_s22 + $0xa0] sm:$0xff] %v2437_v53  ;;  %v2576_v39 = vmul.f32 %v2437_v53, %v2437_v53  ;;  %v3358_v23 = vadd.f32 %v3357_v33, %v3356_v45  ;;  %v2440_v58 = vadd.f32 %v2439_v10, %v4505_v6  ;;  %v2300_v49 = vadd.f32 %v3355_v3, %v4430_v28 }
 0x215   : > { %v2535_v40 = vadd.f32 %v2534_v42, %v2437_v53  ;;  %v2606_v14 = vadd.f32 %v2605_v26, %v2575_v20  ;;  %2506 = vst [vmem:[%s3794_s22 + $0xb8] sm:$0xff] %v2448_v12  ;;  %v2579_v50 = vmul.f32 %v2448_v12, %v2448_v12 }
 0x216   : > { %2504 = vst [vmem:[%s3794_s22 + $0xa8] sm:$0xff] %v2440_v58  ;;  %v2577_v32 = vmul.f32 %v2440_v58, %v2440_v58  ;;  %v2303_v35 = vadd.f32 %v3358_v23, %v4436_v44 }
 0x217   : > { %v2607_v46 = vadd.f32 %v2606_v14, %v2576_v39  ;;  %v2536_v62 = vadd.f32 %v2535_v40, %v2440_v58 }
 0x218   : > { %v3359_v43 = vpop.f32.mrb[136].mxu1  ;;  %v3437_v15 = vpop.f32.mrb[136].mxu0 }
 0x219   : > { %v2537_v47 = vadd.f32 %v2536_v62, %v2445_v27  ;;  %v2608_v16 = vadd.f32 %v2607_v46, %v2577_v32  ;;  %v2461_v1 = vadd.f32 %v3437_v15, %v2300_v49  ;;  %v3360_v6 = vpop.f32.mrb[137].mxu1  ;;  %v2452_v51 = vpop.f32.mrb[137].mxu0 }
 0x21a   : > { %v3361_v28 = vadd.f32 %v3360_v6, %v3359_v43  ;;  %v2453_v36 = vadd.f32 %v2452_v51, %v2292_v7  ;;  %v3362_v41 = vpop.f32.mrb[138].mxu1  ;;  %v3438_v57 = vpop.f32.mrb[138].mxu0 }
 0x21b   : > { %v2609_v44 = vadd.f32 %v2608_v16, %v2578_v48  ;;  %2509 = vst [vmem:[%s3794_s22 + $0xd0] sm:$0xff] %v2461_v1  ;;  %v2538_v30 = vadd.f32 %v2537_v47, %v2448_v12  ;;  %v2464_v4 = vadd.f32 %v3438_v57, %v2303_v35  ;;  %v3363_v21 = vpop.f32.mrb[139].mxu1  ;;  %v2455_v38 = vpop.f32.mrb[139].mxu0  ;;  %v2582_v63 = vmul.f32 %v2461_v1, %v2461_v1  ;;  %v2555_v57 = vld [vmem:[%s4566_s4] sm:$0x1] }
 0x21c   : > { %2507 = vst [vmem:[%s3794_s22 + $0xc0] sm:$0xff] %v2453_v36  ;;  %v2580_v60 = vmul.f32 %v2453_v36, %v2453_v36  ;;  %v3364_v18 = vadd.f32 %v3363_v21, %v3362_v41  ;;  %v2456_v0 = vadd.f32 %v2455_v38, %v2295_v24  ;;  %v2308_v56 = vadd.f32 %v3361_v28, %v4442_v55  ;;  %v2515_v28 = vld [vmem:[%s4565_s3] sm:$0x1] }
 0x21d   : > { %v2539_v13 = vadd.f32 %v2538_v30, %v2453_v36  ;;  %v2610_v22 = vadd.f32 %v2609_v44, %v2579_v50  ;;  %2510 = vst [vmem:[%s3794_s22 + $0xd8] sm:$0xff] %v2464_v4  ;;  %v2583_v54 = vmul.f32 %v2464_v4, %v2464_v4 }
 0x21e   : > { %2508 = vst [vmem:[%s3794_s22 + $0xc8] sm:$0xff] %v2456_v0  ;;  %v2581_v17 = vmul.f32 %v2456_v0, %v2456_v0  ;;  %v2311_v7 = vadd.f32 %v3364_v18, %v4448_v2 }
 0x21f   : > { %v2611_v29 = vadd.f32 %v2610_v22, %v2580_v60  ;;  %v2540_v31 = vadd.f32 %v2539_v13, %v2456_v0 }
 0x220   : > { %v3365_v8 = vpop.f32.mrb[140].mxu1  ;;  %v3441_v52 = vpop.f32.mrb[140].mxu0 }
 0x221   : > { %v2541_v37 = vadd.f32 %v2540_v31, %v2461_v1  ;;  %v2612_v9 = vadd.f32 %v2611_v29, %v2581_v17  ;;  %v3366_v11 = vpop.f32.mrb[141].mxu1  ;;  %v2468_v61 = vpop.f32.mrb[141].mxu0 }
 0x222   : > { %v3367_v24 = vadd.f32 %v3366_v11, %v3365_v8  ;;  %v2469_v19 = vadd.f32 %v2468_v61, %v2308_v56  ;;  %v3368_v55 = vpop.f32.mrb[142].mxu1  ;;  %v3442_v27 = vpop.f32.mrb[142].mxu0 }
 0x223   : > { %v2613_v59 = vadd.f32 %v2612_v9, %v2582_v63  ;;  %v2542_v3 = vadd.f32 %v2541_v37, %v2464_v4  ;;  %v3369_v2 = vpop.f32.mrb[143].mxu1  ;;  %v2471_v53 = vpop.f32.mrb[143].mxu0 }
 0x224   : > { %v2316_v45 = vadd.f32 %v3367_v24, %v4454_v5  ;;  %2511 = vst [vmem:[%s3794_s22 + $0xe0] sm:$0xff] %v2469_v19  ;;  %v2584_v34 = vmul.f32 %v2469_v19, %v2469_v19  ;;  %v3370_v20 = vadd.f32 %v3369_v2, %v3368_v55  ;;  %v2472_v26 = vadd.f32 %v2471_v53, %v2311_v7 }
 0x225   : > { %v2543_v42 = vadd.f32 %v2542_v3, %v2469_v19  ;;  %v2614_v12 = vadd.f32 %v2613_v59, %v2583_v54 }
 0x226   : > { %v2477_v33 = vadd.f32 %v3441_v52, %v2316_v45  ;;  %v2319_v10 = vadd.f32 %v3370_v20, %v4460_v25  ;;  %2512 = vst [vmem:[%s3794_s22 + $0xe8] sm:$0xff] %v2472_v26  ;;  %v2585_v39 = vmul.f32 %v2472_v26, %v2472_v26 }
 0x227   : > { %v2615_v23 = vadd.f32 %v2614_v12, %v2584_v34  ;;  %v2544_v58 = vadd.f32 %v2543_v42, %v2472_v26 }
 0x228   : > { %2513 = vst [vmem:[%s3794_s22 + $0xf0] sm:$0xff] %v2477_v33  ;;  %v2586_v49 = vmul.f32 %v2477_v33, %v2477_v33  ;;  %v2480_v40 = vadd.f32 %v3442_v27, %v2319_v10 }
 0x229   : > { %v2545_v14 = vadd.f32 %v2544_v58, %v2477_v33  ;;  %v2616_v32 = vadd.f32 %v2615_v23, %v2585_v39 }
 0x22a   : > { %2514 = vst [vmem:[%s3794_s22 + $0xf8] sm:$0xff] %v2480_v40  ;;  %v2587_v5 = vmul.f32 %v2480_v40, %v2480_v40 }
 0x22b   : > { %v2546_v35 = vadd.f32 %v2545_v14, %v2480_v40  ;;  %v2617_v46 = vadd.f32 %v2616_v32, %v2586_v49 }
 0x22d   : > { %v2547_v62 = vrot.slane %v2546_v35, 4  ;;  %v2618_v43 = vadd.f32 %v2617_v46, %v2587_v5 }
 0x22f   : > { %v2548_v15 = vadd.f32 %v2547_v62, %v2546_v35  ;;  %v2619_v48 = vrot.slane %v2618_v43, 4 }
 0x231   : > { %v2549_v47 = vrot.slane %v2548_v15, 2  ;;  %v2620_v16 = vadd.f32 %v2619_v48, %v2618_v43 }
 0x233   : > { %v2550_v25 = vadd.f32 %v2549_v47, %v2548_v15  ;;  %v2621_v1 = vrot.slane %v2620_v16, 2 }
 0x235   : > { %v2551_v6 = vrot.slane %v2550_v25, 1  ;;  %v2622_v51 = vadd.f32 %v2621_v1, %v2620_v16 }
 0x237   : > { %v2552_v36 = vadd.f32 %v2551_v6, %v2550_v25  ;;  %v2623_v41 = vrot.slane %v2622_v51, 1 }
 0x239   : > { %v2553_v50 = vadd.f32 %v2552_v36, %v2515_v28  ;;  %v2624_v44 = vadd.f32 %v2623_v41, %v2622_v51 }
 0x23b   : > { %2554 = vst [vmem:[%s4565_s3] sm:$0x1] %v2553_v50  ;;  %v2625_v30 = vadd.f32 %v2624_v44, %v2555_v57 }
 0x23d   : > { %2626 = vst [vmem:[%s4566_s4] sm:$0x1] %v2625_v30 }
 0x23e PF: > { %s15_s15 = sadd.s32 1, %s3755_s15  }
 0x23f   : > { %p12_p5 = scmp.ge.s32.totalorder %s15_s15, 4  }
 0x241   :  { %14 = sbr.rel (!%p12_p5) target bundleno = 1 (0x1), region = 78 }

</bundles_post_ra>
